<compile_context>
chip_gen: v5e
topology: v5e:2x2
jax: 0.10.0
libtpu: 0.0.40
codegen_flags: <defaults>
</compile_context>

<pallas_src>
import functools
import numpy as np
import jax
import jax.numpy as jnp
from jax import lax
from jax.experimental import pallas as pl
from jax.experimental.pallas import tpu as pltpu


def _round_up(x, m):
    return ((x + m - 1) // m) * m


def _query_and_group_kernel(radius_sq, nsample, kc_pad, gidx_row,
                            qrows_ref, sub_ref, pbatch_ref, pdata_ref, tri_ref,
                            out_ref, acc_ref, cnt_ref):
    c = pl.program_id(1)
    last = pl.num_programs(1) - 1
    tm = qrows_ref.shape[0]
    n_chunk = pdata_ref.shape[1]

    @pl.when(c == 0)
    def _init():
        acc_ref[...] = jnp.zeros_like(acc_ref)
        cnt_ref[...] = jnp.zeros_like(cnt_ref)

    q = qrows_ref[...]          # (tm, 8)  [x, y, z, batch, 0...]
    pdata = pdata_ref[...]      # (kc_pad, n_chunk)  [x, y, z, feat..., gidx+1, 0...]
    pb = pbatch_ref[...]        # (1, n_chunk)  point batch id (f32, padded = -2)

    # squared distances, points on the 128-wide lane axis (direct form — do NOT
    # rewrite as |q|^2 + |p|^2 - 2 q.p, cancellation would flip d2 < r^2).
    d2 = jnp.zeros((tm, n_chunk), jnp.float32)
    for k in range(3):
        dk = q[:, k:k + 1] - pdata[k:k + 1, :]
        d2 = d2 + dk * dk
    valid = jnp.logical_and(q[:, 3:4] == pb, d2 < jnp.float32(radius_sq))

    # in-chunk inclusive prefix sum on the MXU: {0,1} values are exact in bf16,
    # accumulation is f32 -> exact integer ranks.
    vf = jnp.where(valid, jnp.float32(1.0), jnp.float32(0.0)).astype(jnp.bfloat16)
    prefix = jnp.dot(vf, tri_ref[...], preferred_element_type=jnp.float32)
    cnt_prev = cnt_ref[...]                                   # (tm, 1)
    rank = jnp.where(valid, prefix + cnt_prev, jnp.float32(0.0))
    cnt_ref[...] = cnt_prev + prefix[:, n_chunk - 1:n_chunk]

    # per-slot one-hot gather: (kc_pad, n_chunk) x (n_chunk, tm) -> (kc_pad, tm)
    # (contracting the last dims of both operands = the flash-attention "NT" form).
    for s in range(nsample):
        hot = (rank == jnp.float32(s + 1)).astype(jnp.float32)
        g = lax.dot_general(pdata, hot, (((1,), (1,)), ((), ())),
                            precision=lax.Precision.HIGHEST,
                            preferred_element_type=jnp.float32)
        acc_ref[s * kc_pad:(s + 1) * kc_pad, :] += g

    @pl.when(c == last)
    def _finalize():
        sub = sub_ref[...]                       # (kc_pad, tm): [qx,qy,qz,0...,qstart+1,0..]
        first = acc_ref[0:kc_pad, :]             # slot 0 == first in-ball point
        has_any = first[gidx_row:gidx_row + 1, :] > 0.5       # (1, tm), empty-ball mask
        for s in range(nsample):
            acc_s = acc_ref[s * kc_pad:(s + 1) * kc_pad, :]
            filled = acc_s[gidx_row:gidx_row + 1, :] > 0.5
            row = jnp.where(filled, acc_s, first) - sub        # center xyz, localize idx
            row = jnp.where(has_any, row, jnp.float32(0.0))    # empty balls -> all zeros
            out_ref[s * kc_pad:(s + 1) * kc_pad, :] = row


def query_and_group(radius, nsample, xyz, xyz_batch_cnt, new_xyz,
                    new_xyz_batch_cnt, features=None, use_xyz=True,
                    tile_m=256, point_chunk=512):
    """Pallas implementation of QueryAndGroup.forward.

    Returns (new_features (M, 3+C, nsample) float32, idx (M, nsample) int32),
    matching the PyTorch module's semantics (idx are batch-local indices).
    Requires N < 2**24 - 1 (point indices travel as an f32 channel).
    """
    xyz = jnp.asarray(xyz, jnp.float32)
    new_xyz = jnp.asarray(new_xyz, jnp.float32)
    xyz_batch_cnt = jnp.asarray(xyz_batch_cnt, jnp.int32)
    new_xyz_batch_cnt = jnp.asarray(new_xyz_batch_cnt, jnp.int32)
    B = xyz_batch_cnt.shape[0]
    N = xyz.shape[0]
    M = new_xyz.shape[0]
    nsample = int(nsample)

    if features is not None:
        features = jnp.asarray(features, jnp.float32)
        C = features.shape[1]
    else:
        assert use_xyz, "Cannot have not features and not use xyz as a feature!"
        C = 0
    c_all = 3 + C
    kc_pad = _round_up(c_all + 1, 8)     # [xyz | feat | gidx+1 | zero pad] rows
    gidx_row = c_all

    # --- glue (plain XLA): per-point/query batch ids and segment starts -------
    point_batch = jnp.repeat(jnp.arange(B, dtype=jnp.int32), xyz_batch_cnt,
                             total_repeat_length=N)
    query_batch = jnp.repeat(jnp.arange(B, dtype=jnp.int32), new_xyz_batch_cnt,
                             total_repeat_length=M)
    xyz_starts = jnp.concatenate(
        [jnp.zeros((1,), jnp.int32),
         jnp.cumsum(xyz_batch_cnt)[:-1].astype(jnp.int32)])
    query_start = xyz_starts[query_batch].astype(jnp.float32)

    # --- tiling: all lane dims are multiples of 128 ---------------------------
    # On v7x keep M large enough that Mp//tm >= 2 so both TensorCores get tiles.
    tm = _round_up(max(128, min(int(tile_m), _round_up(M, 128))), 128)
    n_chunk = _round_up(max(128, min(int(point_chunk), _round_up(N, 128))), 128)
    Mp = _round_up(M, tm)
    Np = _round_up(N, n_chunk)

    # packed query rows: [x, y, z, batch, 0, 0, 0, 0]; padded queries batch = -1
    qrows = jnp.zeros((Mp, 8), jnp.float32)
    qrows = qrows.at[:, 3].set(-1.0)
    qrows = qrows.at[:M, 0:3].set(new_xyz)
    qrows = qrows.at[:M, 3].set(query_batch.astype(jnp.float32))

    # per-query subtraction slab (channel-major): xyz rows = query center,
    # gidx row = segment_start + 1 (because the gidx channel stores index + 1).
    sub_t = jnp.zeros((kc_pad, Mp), jnp.float32)
    sub_t = sub_t.at[0:3, :M].set(new_xyz.T)
    sub_t = sub_t.at[gidx_row, :M].set(query_start + 1.0)

    # point data channel-major (contiguous DMA rows, no lane padding in VMEM)
    pdata_t = jnp.zeros((kc_pad, Np), jnp.float32)
    pdata_t = pdata_t.at[0:3, :N].set(xyz.T)
    if C:
        pdata_t = pdata_t.at[3:3 + C, :N].set(features.T)
    pdata_t = pdata_t.at[gidx_row, :N].set(jnp.arange(1, N + 1, dtype=jnp.float32))

    pbatch = jnp.full((1, Np), -2.0, jnp.float32)      # padded points never match
    pbatch = pbatch.at[0, :N].set(point_batch.astype(jnp.float32))

    # lower-triangular-inclusive ones (p <= j) for the MXU prefix sum; constant
    # index_map -> fetched once and kept resident.
    tri = (jnp.arange(n_chunk)[:, None] <= jnp.arange(n_chunk)[None, :]
           ).astype(jnp.bfloat16)

    g0, g1 = Mp // tm, Np // n_chunk
    r2 = float(np.float32(radius) * np.float32(radius))
    out_rows = nsample * kc_pad

    kernel = functools.partial(_query_and_group_kernel, r2, nsample, kc_pad, gidx_row)

    flops = int(g0 * g1 * (2 * tm * n_chunk * n_chunk
                           + 2 * nsample * kc_pad * n_chunk * tm
                           + 12 * tm * n_chunk))
    bytes_accessed = int(g0 * g1 * (kc_pad + 1) * n_chunk * 4
                         + g0 * (out_rows + 8 + kc_pad) * tm * 4
                         + n_chunk * n_chunk * 2)

    out = pl.pallas_call(
        kernel,
        out_shape=jax.ShapeDtypeStruct((out_rows, Mp), jnp.float32),
        grid=(g0, g1),
        in_specs=[
            pl.BlockSpec((tm, 8), lambda i, c: (i, 0)),             # packed query rows
            pl.BlockSpec((kc_pad, tm), lambda i, c: (0, i)),        # per-query subtraction
            pl.BlockSpec((1, n_chunk), lambda i, c: (0, c)),        # point batch ids
            pl.BlockSpec((kc_pad, n_chunk), lambda i, c: (0, c)),   # point data (chan-major)
            pl.BlockSpec((n_chunk, n_chunk), lambda i, c: (0, 0)),  # triangular ones
        ],
        out_specs=pl.BlockSpec((out_rows, tm), lambda i, c: (0, i)),
        scratch_shapes=[
            pltpu.VMEM((out_rows, tm), jnp.float32),   # lane-dense gather accumulator
            pltpu.VMEM((tm, 1), jnp.float32),          # carried per-query in-ball count
        ],
        compiler_params=pltpu.CompilerParams(
            dimension_semantics=("parallel", "arbitrary"),
            vmem_limit_bytes=32 * 1024 * 1024),
        cost_estimate=pl.CostEstimate(flops=flops, transcendentals=0,
                                      bytes_accessed=bytes_accessed),
    )(qrows, sub_t, pbatch, pdata_t, tri)

    out = out.reshape(nsample, kc_pad, Mp)
    new_features = jnp.transpose(out[:, :c_all, :M], (2, 1, 0))           # (M, 3+C, ns)
    idx = jnp.rint(jnp.transpose(out[:, gidx_row, :M])).astype(jnp.int32)  # (M, ns)
    if features is not None and not use_xyz:
        new_features = new_features[:, 3:, :]
    return new_features, idx


def _reference(radius, nsample, xyz, xyz_cnt, new_xyz, new_xyz_cnt, features, use_xyz):
    """Plain numpy reference matching the CUDA ball_query + group_points semantics."""
    xyz = np.asarray(xyz, np.float32)
    new_xyz = np.asarray(new_xyz, np.float32)
    xyz_cnt = np.asarray(xyz_cnt)
    new_xyz_cnt = np.asarray(new_xyz_cnt)
    feats = None if features is None else np.asarray(features, np.float32)
    B = len(xyz_cnt)
    M = new_xyz.shape[0]
    xyz_starts = np.concatenate([[0], np.cumsum(xyz_cnt)[:-1]]).astype(np.int64)
    qb = np.repeat(np.arange(B), new_xyz_cnt)
    idx = np.zeros((M, nsample), np.int32)
    empty = np.zeros(M, bool)
    r2 = np.float32(radius) * np.float32(radius)
    for m in range(M):
        b = qb[m]
        s = xyz_starts[b]
        n = xyz_cnt[b]
        cnt = 0
        for k in range(int(n)):
            d = new_xyz[m] - xyz[s + k]
            d2 = np.float32((d * d).sum())
            if d2 < r2:
                if cnt == 0:
                    idx[m, :] = k
                idx[m, cnt] = k
                cnt += 1
                if cnt >= nsample:
                    break
        if cnt == 0:
            empty[m] = True
            idx[m, :] = 0
    C = 0 if feats is None else feats.shape[1]
    gxyz = np.zeros((M, 3, nsample), np.float32)
    gfeat = np.zeros((M, C, nsample), np.float32)
    for m in range(M):
        s = xyz_starts[qb[m]]
        for j in range(nsample):
            gxyz[m, :, j] = xyz[s + idx[m, j]] - new_xyz[m]
            if C:
                gfeat[m, :, j] = feats[s + idx[m, j]]
    gxyz[empty] = 0
    gfeat[empty] = 0
    if feats is not None:
        out = np.concatenate([gxyz, gfeat], axis=1) if use_xyz else gfeat
    else:
        out = gxyz
    return out, idx


if __name__ == "__main__":
    key = jax.random.PRNGKey(0)
    B = 2
    xyz_cnt = np.array([20, 12], np.int32)          # N1, N2
    new_cnt = np.array([6, 6], np.int32)            # M1, M2
    N = int(xyz_cnt.sum())
    M = int(new_cnt.sum())
    C = 4
    nsample = 8
    radius = 0.35

    k1, k2, k3 = jax.random.split(key, 3)
    xyz = jax.random.uniform(k1, (N, 3), jnp.float32)
    new_xyz = jax.random.uniform(k2, (M, 3), jnp.float32)
    # force one query to have an empty ball to exercise the empty_ball_mask path
    new_xyz = new_xyz.at[3].set(jnp.array([10.0, 10.0, 10.0], jnp.float32))
    features = jax.random.normal(k3, (N, C), jnp.float32)

    new_features, idx = query_and_group(radius, nsample, xyz, xyz_cnt,
                                        new_xyz, new_cnt, features, use_xyz=True)
    jax.block_until_ready((new_features, idx))

    ref_feat, ref_idx = _reference(radius, nsample, np.asarray(xyz), xyz_cnt,
                                   np.asarray(new_xyz), new_cnt,
                                   np.asarray(features), True)

    assert new_features.shape == (M, 3 + C, nsample)
    assert idx.shape == (M, nsample) and idx.dtype == jnp.int32
    np.testing.assert_array_equal(np.asarray(idx), ref_idx)
    np.testing.assert_allclose(np.asarray(new_features), ref_feat, rtol=1e-5, atol=1e-5)
    print("KERNEL_OK")
</pallas_src>

<mosaic_0001>
module attributes {stable_mosaic.version = 11 : i64} {
  func.func @_query_and_group_kernel(%arg0: i32, %arg1: i32, %arg2: memref<128x8xf32, #tpu.memory_space<vmem>>, %arg3: memref<8x128xf32, #tpu.memory_space<vmem>>, %arg4: memref<1x128xf32, #tpu.memory_space<vmem>>, %arg5: memref<8x128xf32, #tpu.memory_space<vmem>>, %arg6: memref<128x128xbf16, #tpu.memory_space<vmem>>, %arg7: memref<64x128xf32, #tpu.memory_space<vmem>>, %arg8: memref<64x128xf32, #tpu.memory_space<vmem>>, %arg9: memref<128x1xf32, #tpu.memory_space<vmem>>) attributes {dimension_semantics = [#tpu.dimension_semantics<parallel>, #tpu.dimension_semantics<arbitrary>], iteration_bounds = array<i64: 1, 1>, scalar_prefetch = 0 : i64, scratch_operands = 2 : i64, tpu.core_type = #tpu.core_type<tc>, window_params = [{transform_indices = @transform_0, window_bounds = array<i64: 128, 8>}, {transform_indices = @transform_1, window_bounds = array<i64: 8, 128>}, {transform_indices = @transform_2, window_bounds = array<i64: 1, 128>}, {transform_indices = @transform_3, window_bounds = array<i64: 8, 128>}, {pipeline_mode = #tpu.pipeline_mode<synchronous>, transform_indices = @transform_4, window_bounds = array<i64: 128, 128>}, {transform_indices = @transform_5, window_bounds = array<i64: 64, 128>}]} {
    %c0_i32 = arith.constant 0 : i32
    %0 = arith.cmpi eq, %arg1, %c0_i32 : i32
    %1 = arith.extui %0 : i1 to i32
    %c0_i32_0 = arith.constant 0 : i32
    %2 = arith.cmpi ne, %1, %c0_i32_0 : i32
    scf.if %2 {
      %cst_60 = arith.constant 0.000000e+00 : f32
      %116 = vector.broadcast %cst_60 : f32 to vector<64x128xf32>
      %c0_61 = arith.constant 0 : index
      %c0_62 = arith.constant 0 : index
      %117 = vector.load %arg8[%c0_61, %c0_62] : memref<64x128xf32, #tpu.memory_space<vmem>>, vector<64x128xf32>
      tpu.vector_store %arg8[%c0_61, %c0_62], %116 {strides = array<i32>} : memref<64x128xf32, #tpu.memory_space<vmem>>, vector<64x128xf32>,
      %cst_63 = arith.constant 0.000000e+00 : f32
      %118 = vector.broadcast %cst_63 : f32 to vector<128x1xf32>
      %c0_64 = arith.constant 0 : index
      %c0_65 = arith.constant 0 : index
      %119 = vector.load %arg9[%c0_64, %c0_65] : memref<128x1xf32, #tpu.memory_space<vmem>>, vector<128x1xf32>
      tpu.vector_store %arg9[%c0_64, %c0_65], %118 {strides = array<i32>} : memref<128x1xf32, #tpu.memory_space<vmem>>, vector<128x1xf32>,
    } else {
    }
    %c0 = arith.constant 0 : index
    %c0_1 = arith.constant 0 : index
    %3 = vector.load %arg2[%c0, %c0_1] : memref<128x8xf32, #tpu.memory_space<vmem>>, vector<128x8xf32>
    %c0_2 = arith.constant 0 : index
    %c0_3 = arith.constant 0 : index
    %4 = vector.load %arg5[%c0_2, %c0_3] : memref<8x128xf32, #tpu.memory_space<vmem>>, vector<8x128xf32>
    %c0_4 = arith.constant 0 : index
    %c0_5 = arith.constant 0 : index
    %5 = vector.load %arg4[%c0_4, %c0_5] : memref<1x128xf32, #tpu.memory_space<vmem>>, vector<1x128xf32>
    %cst = arith.constant 0.000000e+00 : f32
    %6 = vector.broadcast %cst : f32 to vector<128x128xf32>
    %7 = vector.extract_strided_slice %3 {offsets = [0, 0], sizes = [128, 1], strides = [1, 1]} : vector<128x8xf32> to vector<128x1xf32>
    %8 = vector.extract_strided_slice %4 {offsets = [0, 0], sizes = [1, 128], strides = [1, 1]} : vector<8x128xf32> to vector<1x128xf32>
    %9 = vector.broadcast %7 : vector<128x1xf32> to vector<128x128xf32>
    %10 = vector.broadcast %8 : vector<1x128xf32> to vector<128x128xf32>
    %11 = arith.subf %9, %10 : vector<128x128xf32>
    %12 = arith.mulf %11, %11 : vector<128x128xf32>
    %13 = arith.addf %6, %12 : vector<128x128xf32>
    %14 = vector.extract_strided_slice %3 {offsets = [0, 1], sizes = [128, 1], strides = [1, 1]} : vector<128x8xf32> to vector<128x1xf32>
    %15 = vector.extract_strided_slice %4 {offsets = [1, 0], sizes = [1, 128], strides = [1, 1]} : vector<8x128xf32> to vector<1x128xf32>
    %16 = vector.broadcast %14 : vector<128x1xf32> to vector<128x128xf32>
    %17 = vector.broadcast %15 : vector<1x128xf32> to vector<128x128xf32>
    %18 = arith.subf %16, %17 : vector<128x128xf32>
    %19 = arith.mulf %18, %18 : vector<128x128xf32>
    %20 = arith.addf %13, %19 : vector<128x128xf32>
    %21 = vector.extract_strided_slice %3 {offsets = [0, 2], sizes = [128, 1], strides = [1, 1]} : vector<128x8xf32> to vector<128x1xf32>
    %22 = vector.extract_strided_slice %4 {offsets = [2, 0], sizes = [1, 128], strides = [1, 1]} : vector<8x128xf32> to vector<1x128xf32>
    %23 = vector.broadcast %21 : vector<128x1xf32> to vector<128x128xf32>
    %24 = vector.broadcast %22 : vector<1x128xf32> to vector<128x128xf32>
    %25 = arith.subf %23, %24 : vector<128x128xf32>
    %26 = arith.mulf %25, %25 : vector<128x128xf32>
    %27 = arith.addf %20, %26 : vector<128x128xf32>
    %28 = vector.extract_strided_slice %3 {offsets = [0, 3], sizes = [128, 1], strides = [1, 1]} : vector<128x8xf32> to vector<128x1xf32>
    %29 = vector.broadcast %28 : vector<128x1xf32> to vector<128x128xf32>
    %30 = vector.broadcast %5 : vector<1x128xf32> to vector<128x128xf32>
    %31 = arith.cmpf oeq, %29, %30 : vector<128x128xf32>
    %cst_6 = arith.constant 0.122499995 : f32
    %32 = vector.broadcast %cst_6 : f32 to vector<128x128xf32>
    %33 = arith.cmpf olt, %27, %32 : vector<128x128xf32>
    %34 = arith.andi %31, %33 : vector<128x128xi1>
    %cst_7 = arith.constant 1.000000e+00 : f32
    %cst_8 = arith.constant 0.000000e+00 : f32
    %35 = vector.broadcast %cst_7 : f32 to vector<128x128xf32>
    %36 = vector.broadcast %cst_8 : f32 to vector<128x128xf32>
    %37 = arith.select %34, %35, %36 : vector<128x128xi1>, vector<128x128xf32>
    %38 = arith.truncf %37 : vector<128x128xf32> to vector<128x128xbf16>
    %c0_9 = arith.constant 0 : index
    %c0_10 = arith.constant 0 : index
    %39 = vector.load %arg6[%c0_9, %c0_10] : memref<128x128xbf16, #tpu.memory_space<vmem>>, vector<128x128xbf16>
    %cst_11 = arith.constant dense<0.000000e+00> : vector<128x128xf32>
    %40 = tpu.matmul %38, %39, %cst_11 {dimension_numbers = #tpu.dot_dimension_numbers<[1], [0], [0], [1], [0, 0, 1, 1], [], []>} : vector<128x128xbf16>, vector<128x128xbf16>, vector<128x128xf32> -> vector<128x128xf32>
    %c0_12 = arith.constant 0 : index
    %c0_13 = arith.constant 0 : index
    %41 = vector.load %arg9[%c0_12, %c0_13] : memref<128x1xf32, #tpu.memory_space<vmem>>, vector<128x1xf32>
    %42 = vector.broadcast %41 : vector<128x1xf32> to vector<128x128xf32>
    %43 = arith.addf %40, %42 : vector<128x128xf32>
    %cst_14 = arith.constant 0.000000e+00 : f32
    %44 = vector.broadcast %cst_14 : f32 to vector<128x128xf32>
    %45 = arith.select %34, %43, %44 : vector<128x128xi1>, vector<128x128xf32>
    %46 = vector.extract_strided_slice %40 {offsets = [0, 127], sizes = [128, 1], strides = [1, 1]} : vector<128x128xf32> to vector<128x1xf32>
    %47 = arith.addf %41, %46 : vector<128x1xf32>
    %c0_15 = arith.constant 0 : index
    %c0_16 = arith.constant 0 : index
    %48 = vector.load %arg9[%c0_15, %c0_16] : memref<128x1xf32, #tpu.memory_space<vmem>>, vector<128x1xf32>
    tpu.vector_store %arg9[%c0_15, %c0_16], %47 {strides = array<i32>} : memref<128x1xf32, #tpu.memory_space<vmem>>, vector<128x1xf32>,
    %cst_17 = arith.constant 1.000000e+00 : f32
    %49 = vector.broadcast %cst_17 : f32 to vector<128x128xf32>
    %50 = arith.cmpf oeq, %45, %49 : vector<128x128xf32>
    %51 = arith.extui %50 : vector<128x128xi1> to vector<128x128xi32>
    %52 = arith.sitofp %51 : vector<128x128xi32> to vector<128x128xf32>
    %cst_18 = arith.constant dense<0.000000e+00> : vector<8x128xf32>
    %53 = tpu.matmul %4, %52, %cst_18 {dimension_numbers = #tpu.dot_dimension_numbers<[1], [1], [0], [0], [0, 0, 1, 0], [], []>, precision = #tpu.contract_precision<fp32>} : vector<8x128xf32>, vector<128x128xf32>, vector<8x128xf32> -> vector<8x128xf32>
    %c0_19 = arith.constant 0 : index
    %c0_20 = arith.constant 0 : index
    %54 = vector.load %arg8[%c0_19, %c0_20] : memref<64x128xf32, #tpu.memory_space<vmem>>, vector<8x128xf32>
    %55 = arith.addf %54, %53 : vector<8x128xf32>
    %c0_21 = arith.constant 0 : index
    %c0_22 = arith.constant 0 : index
    %56 = vector.load %arg8[%c0_21, %c0_22] : memref<64x128xf32, #tpu.memory_space<vmem>>, vector<8x128xf32>
    tpu.vector_store %arg8[%c0_21, %c0_22], %55 {strides = array<i32>} : memref<64x128xf32, #tpu.memory_space<vmem>>, vector<8x128xf32>,
    %cst_23 = arith.constant 2.000000e+00 : f32
    %57 = vector.broadcast %cst_23 : f32 to vector<128x128xf32>
    %58 = arith.cmpf oeq, %45, %57 : vector<128x128xf32>
    %59 = arith.extui %58 : vector<128x128xi1> to vector<128x128xi32>
    %60 = arith.sitofp %59 : vector<128x128xi32> to vector<128x128xf32>
    %cst_24 = arith.constant dense<0.000000e+00> : vector<8x128xf32>
    %61 = tpu.matmul %4, %60, %cst_24 {dimension_numbers = #tpu.dot_dimension_numbers<[1], [1], [0], [0], [0, 0, 1, 0], [], []>, precision = #tpu.contract_precision<fp32>} : vector<8x128xf32>, vector<128x128xf32>, vector<8x128xf32> -> vector<8x128xf32>
    %c8 = arith.constant 8 : index
    %c0_25 = arith.constant 0 : index
    %62 = vector.load %arg8[%c8, %c0_25] : memref<64x128xf32, #tpu.memory_space<vmem>>, vector<8x128xf32>
    %63 = arith.addf %62, %61 : vector<8x128xf32>
    %c8_26 = arith.constant 8 : index
    %c0_27 = arith.constant 0 : index
    %64 = vector.load %arg8[%c8_26, %c0_27] : memref<64x128xf32, #tpu.memory_space<vmem>>, vector<8x128xf32>
    tpu.vector_store %arg8[%c8_26, %c0_27], %63 {strides = array<i32>} : memref<64x128xf32, #tpu.memory_space<vmem>>, vector<8x128xf32>,
    %cst_28 = arith.constant 3.000000e+00 : f32
    %65 = vector.broadcast %cst_28 : f32 to vector<128x128xf32>
    %66 = arith.cmpf oeq, %45, %65 : vector<128x128xf32>
    %67 = arith.extui %66 : vector<128x128xi1> to vector<128x128xi32>
    %68 = arith.sitofp %67 : vector<128x128xi32> to vector<128x128xf32>
    %cst_29 = arith.constant dense<0.000000e+00> : vector<8x128xf32>
    %69 = tpu.matmul %4, %68, %cst_29 {dimension_numbers = #tpu.dot_dimension_numbers<[1], [1], [0], [0], [0, 0, 1, 0], [], []>, precision = #tpu.contract_precision<fp32>} : vector<8x128xf32>, vector<128x128xf32>, vector<8x128xf32> -> vector<8x128xf32>
    %c16 = arith.constant 16 : index
    %c0_30 = arith.constant 0 : index
    %70 = vector.load %arg8[%c16, %c0_30] : memref<64x128xf32, #tpu.memory_space<vmem>>, vector<8x128xf32>
    %71 = arith.addf %70, %69 : vector<8x128xf32>
    %c16_31 = arith.constant 16 : index
    %c0_32 = arith.constant 0 : index
    %72 = vector.load %arg8[%c16_31, %c0_32] : memref<64x128xf32, #tpu.memory_space<vmem>>, vector<8x128xf32>
    tpu.vector_store %arg8[%c16_31, %c0_32], %71 {strides = array<i32>} : memref<64x128xf32, #tpu.memory_space<vmem>>, vector<8x128xf32>,
    %cst_33 = arith.constant 4.000000e+00 : f32
    %73 = vector.broadcast %cst_33 : f32 to vector<128x128xf32>
    %74 = arith.cmpf oeq, %45, %73 : vector<128x128xf32>
    %75 = arith.extui %74 : vector<128x128xi1> to vector<128x128xi32>
    %76 = arith.sitofp %75 : vector<128x128xi32> to vector<128x128xf32>
    %cst_34 = arith.constant dense<0.000000e+00> : vector<8x128xf32>
    %77 = tpu.matmul %4, %76, %cst_34 {dimension_numbers = #tpu.dot_dimension_numbers<[1], [1], [0], [0], [0, 0, 1, 0], [], []>, precision = #tpu.contract_precision<fp32>} : vector<8x128xf32>, vector<128x128xf32>, vector<8x128xf32> -> vector<8x128xf32>
    %c24 = arith.constant 24 : index
    %c0_35 = arith.constant 0 : index
    %78 = vector.load %arg8[%c24, %c0_35] : memref<64x128xf32, #tpu.memory_space<vmem>>, vector<8x128xf32>
    %79 = arith.addf %78, %77 : vector<8x128xf32>
    %c24_36 = arith.constant 24 : index
    %c0_37 = arith.constant 0 : index
    %80 = vector.load %arg8[%c24_36, %c0_37] : memref<64x128xf32, #tpu.memory_space<vmem>>, vector<8x128xf32>
    tpu.vector_store %arg8[%c24_36, %c0_37], %79 {strides = array<i32>} : memref<64x128xf32, #tpu.memory_space<vmem>>, vector<8x128xf32>,
    %cst_38 = arith.constant 5.000000e+00 : f32
    %81 = vector.broadcast %cst_38 : f32 to vector<128x128xf32>
    %82 = arith.cmpf oeq, %45, %81 : vector<128x128xf32>
    %83 = arith.extui %82 : vector<128x128xi1> to vector<128x128xi32>
    %84 = arith.sitofp %83 : vector<128x128xi32> to vector<128x128xf32>
    %cst_39 = arith.constant dense<0.000000e+00> : vector<8x128xf32>
    %85 = tpu.matmul %4, %84, %cst_39 {dimension_numbers = #tpu.dot_dimension_numbers<[1], [1], [0], [0], [0, 0, 1, 0], [], []>, precision = #tpu.contract_precision<fp32>} : vector<8x128xf32>, vector<128x128xf32>, vector<8x128xf32> -> vector<8x128xf32>
    %c32 = arith.constant 32 : index
    %c0_40 = arith.constant 0 : index
    %86 = vector.load %arg8[%c32, %c0_40] : memref<64x128xf32, #tpu.memory_space<vmem>>, vector<8x128xf32>
    %87 = arith.addf %86, %85 : vector<8x128xf32>
    %c32_41 = arith.constant 32 : index
    %c0_42 = arith.constant 0 : index
    %88 = vector.load %arg8[%c32_41, %c0_42] : memref<64x128xf32, #tpu.memory_space<vmem>>, vector<8x128xf32>
    tpu.vector_store %arg8[%c32_41, %c0_42], %87 {strides = array<i32>} : memref<64x128xf32, #tpu.memory_space<vmem>>, vector<8x128xf32>,
    %cst_43 = arith.constant 6.000000e+00 : f32
    %89 = vector.broadcast %cst_43 : f32 to vector<128x128xf32>
    %90 = arith.cmpf oeq, %45, %89 : vector<128x128xf32>
    %91 = arith.extui %90 : vector<128x128xi1> to vector<128x128xi32>
    %92 = arith.sitofp %91 : vector<128x128xi32> to vector<128x128xf32>
    %cst_44 = arith.constant dense<0.000000e+00> : vector<8x128xf32>
    %93 = tpu.matmul %4, %92, %cst_44 {dimension_numbers = #tpu.dot_dimension_numbers<[1], [1], [0], [0], [0, 0, 1, 0], [], []>, precision = #tpu.contract_precision<fp32>} : vector<8x128xf32>, vector<128x128xf32>, vector<8x128xf32> -> vector<8x128xf32>
    %c40 = arith.constant 40 : index
    %c0_45 = arith.constant 0 : index
    %94 = vector.load %arg8[%c40, %c0_45] : memref<64x128xf32, #tpu.memory_space<vmem>>, vector<8x128xf32>
    %95 = arith.addf %94, %93 : vector<8x128xf32>
    %c40_46 = arith.constant 40 : index
    %c0_47 = arith.constant 0 : index
    %96 = vector.load %arg8[%c40_46, %c0_47] : memref<64x128xf32, #tpu.memory_space<vmem>>, vector<8x128xf32>
    tpu.vector_store %arg8[%c40_46, %c0_47], %95 {strides = array<i32>} : memref<64x128xf32, #tpu.memory_space<vmem>>, vector<8x128xf32>,
    %cst_48 = arith.constant 7.000000e+00 : f32
    %97 = vector.broadcast %cst_48 : f32 to vector<128x128xf32>
    %98 = arith.cmpf oeq, %45, %97 : vector<128x128xf32>
    %99 = arith.extui %98 : vector<128x128xi1> to vector<128x128xi32>
    %100 = arith.sitofp %99 : vector<128x128xi32> to vector<128x128xf32>
    %cst_49 = arith.constant dense<0.000000e+00> : vector<8x128xf32>
    %101 = tpu.matmul %4, %100, %cst_49 {dimension_numbers = #tpu.dot_dimension_numbers<[1], [1], [0], [0], [0, 0, 1, 0], [], []>, precision = #tpu.contract_precision<fp32>} : vector<8x128xf32>, vector<128x128xf32>, vector<8x128xf32> -> vector<8x128xf32>
    %c48 = arith.constant 48 : index
    %c0_50 = arith.constant 0 : index
    %102 = vector.load %arg8[%c48, %c0_50] : memref<64x128xf32, #tpu.memory_space<vmem>>, vector<8x128xf32>
    %103 = arith.addf %102, %101 : vector<8x128xf32>
    %c48_51 = arith.constant 48 : index
    %c0_52 = arith.constant 0 : index
    %104 = vector.load %arg8[%c48_51, %c0_52] : memref<64x128xf32, #tpu.memory_space<vmem>>, vector<8x128xf32>
    tpu.vector_store %arg8[%c48_51, %c0_52], %103 {strides = array<i32>} : memref<64x128xf32, #tpu.memory_space<vmem>>, vector<8x128xf32>,
    %cst_53 = arith.constant 8.000000e+00 : f32
    %105 = vector.broadcast %cst_53 : f32 to vector<128x128xf32>
    %106 = arith.cmpf oeq, %45, %105 : vector<128x128xf32>
    %107 = arith.extui %106 : vector<128x128xi1> to vector<128x128xi32>
    %108 = arith.sitofp %107 : vector<128x128xi32> to vector<128x128xf32>
    %cst_54 = arith.constant dense<0.000000e+00> : vector<8x128xf32>
    %109 = tpu.matmul %4, %108, %cst_54 {dimension_numbers = #tpu.dot_dimension_numbers<[1], [1], [0], [0], [0, 0, 1, 0], [], []>, precision = #tpu.contract_precision<fp32>} : vector<8x128xf32>, vector<128x128xf32>, vector<8x128xf32> -> vector<8x128xf32>
    %c56 = arith.constant 56 : index
    %c0_55 = arith.constant 0 : index
    %110 = vector.load %arg8[%c56, %c0_55] : memref<64x128xf32, #tpu.memory_space<vmem>>, vector<8x128xf32>
    %111 = arith.addf %110, %109 : vector<8x128xf32>
    %c56_56 = arith.constant 56 : index
    %c0_57 = arith.constant 0 : index
    %112 = vector.load %arg8[%c56_56, %c0_57] : memref<64x128xf32, #tpu.memory_space<vmem>>, vector<8x128xf32>
    tpu.vector_store %arg8[%c56_56, %c0_57], %111 {strides = array<i32>} : memref<64x128xf32, #tpu.memory_space<vmem>>, vector<8x128xf32>,
    %c0_i32_58 = arith.constant 0 : i32
    %113 = arith.cmpi eq, %arg1, %c0_i32_58 : i32
    %114 = arith.extui %113 : i1 to i32
    %c0_i32_59 = arith.constant 0 : i32
    %115 = arith.cmpi ne, %114, %c0_i32_59 : i32
    scf.if %115 {
      %c0_60 = arith.constant 0 : index
      %c0_61 = arith.constant 0 : index
      %116 = vector.load %arg3[%c0_60, %c0_61] : memref<8x128xf32, #tpu.memory_space<vmem>>, vector<8x128xf32>
      %c0_62 = arith.constant 0 : index
      %c0_63 = arith.constant 0 : index
      %117 = vector.load %arg8[%c0_62, %c0_63] : memref<64x128xf32, #tpu.memory_space<vmem>>, vector<8x128xf32>
      %118 = vector.extract_strided_slice %117 {offsets = [7, 0], sizes = [1, 128], strides = [1, 1]} : vector<8x128xf32> to vector<1x128xf32>
      %cst_64 = arith.constant 5.000000e-01 : f32
      %119 = vector.broadcast %cst_64 : f32 to vector<1x128xf32>
      %120 = arith.cmpf ogt, %118, %119 : vector<1x128xf32>
      %c0_65 = arith.constant 0 : index
      %c0_66 = arith.constant 0 : index
      %121 = vector.load %arg8[%c0_65, %c0_66] : memref<64x128xf32, #tpu.memory_space<vmem>>, vector<8x128xf32>
      %122 = vector.extract_strided_slice %121 {offsets = [7, 0], sizes = [1, 128], strides = [1, 1]} : vector<8x128xf32> to vector<1x128xf32>
      %cst_67 = arith.constant 5.000000e-01 : f32
      %123 = vector.broadcast %cst_67 : f32 to vector<1x128xf32>
      %124 = arith.cmpf ogt, %122, %123 : vector<1x128xf32>
      %125 = vector.shape_cast %124 : vector<1x128xi1> to vector<1x128xi1>
      %126 = vector.broadcast %125 : vector<1x128xi1> to vector<8x128xi1>
      %127 = arith.select %126, %121, %117 : vector<8x128xi1>, vector<8x128xf32>
      %128 = arith.subf %127, %116 : vector<8x128xf32>
      %cst_68 = arith.constant 0.000000e+00 : f32
      %129 = vector.shape_cast %120 : vector<1x128xi1> to vector<1x128xi1>
      %130 = vector.broadcast %129 : vector<1x128xi1> to vector<8x128xi1>
      %131 = vector.broadcast %cst_68 : f32 to vector<8x128xf32>
      %132 = arith.select %130, %128, %131 : vector<8x128xi1>, vector<8x128xf32>
      %c0_69 = arith.constant 0 : index
      %c0_70 = arith.constant 0 : index
      %133 = vector.load %arg7[%c0_69, %c0_70] : memref<64x128xf32, #tpu.memory_space<vmem>>, vector<8x128xf32>
      tpu.vector_store %arg7[%c0_69, %c0_70], %132 {strides = array<i32>} : memref<64x128xf32, #tpu.memory_space<vmem>>, vector<8x128xf32>,
      %c8_71 = arith.constant 8 : index
      %c0_72 = arith.constant 0 : index
      %134 = vector.load %arg8[%c8_71, %c0_72] : memref<64x128xf32, #tpu.memory_space<vmem>>, vector<8x128xf32>
      %135 = vector.extract_strided_slice %134 {offsets = [7, 0], sizes = [1, 128], strides = [1, 1]} : vector<8x128xf32> to vector<1x128xf32>
      %cst_73 = arith.constant 5.000000e-01 : f32
      %136 = vector.broadcast %cst_73 : f32 to vector<1x128xf32>
      %137 = arith.cmpf ogt, %135, %136 : vector<1x128xf32>
      %138 = vector.shape_cast %137 : vector<1x128xi1> to vector<1x128xi1>
      %139 = vector.broadcast %138 : vector<1x128xi1> to vector<8x128xi1>
      %140 = arith.select %139, %134, %117 : vector<8x128xi1>, vector<8x128xf32>
      %141 = arith.subf %140, %116 : vector<8x128xf32>
      %cst_74 = arith.constant 0.000000e+00 : f32
      %142 = vector.shape_cast %120 : vector<1x128xi1> to vector<1x128xi1>
      %143 = vector.broadcast %142 : vector<1x128xi1> to vector<8x128xi1>
      %144 = vector.broadcast %cst_74 : f32 to vector<8x128xf32>
      %145 = arith.select %143, %141, %144 : vector<8x128xi1>, vector<8x128xf32>
      %c8_75 = arith.constant 8 : index
      %c0_76 = arith.constant 0 : index
      %146 = vector.load %arg7[%c8_75, %c0_76] : memref<64x128xf32, #tpu.memory_space<vmem>>, vector<8x128xf32>
      tpu.vector_store %arg7[%c8_75, %c0_76], %145 {strides = array<i32>} : memref<64x128xf32, #tpu.memory_space<vmem>>, vector<8x128xf32>,
      %c16_77 = arith.constant 16 : index
      %c0_78 = arith.constant 0 : index
      %147 = vector.load %arg8[%c16_77, %c0_78] : memref<64x128xf32, #tpu.memory_space<vmem>>, vector<8x128xf32>
      %148 = vector.extract_strided_slice %147 {offsets = [7, 0], sizes = [1, 128], strides = [1, 1]} : vector<8x128xf32> to vector<1x128xf32>
      %cst_79 = arith.constant 5.000000e-01 : f32
      %149 = vector.broadcast %cst_79 : f32 to vector<1x128xf32>
      %150 = arith.cmpf ogt, %148, %149 : vector<1x128xf32>
      %151 = vector.shape_cast %150 : vector<1x128xi1> to vector<1x128xi1>
      %152 = vector.broadcast %151 : vector<1x128xi1> to vector<8x128xi1>
      %153 = arith.select %152, %147, %117 : vector<8x128xi1>, vector<8x128xf32>
      %154 = arith.subf %153, %116 : vector<8x128xf32>
      %cst_80 = arith.constant 0.000000e+00 : f32
      %155 = vector.shape_cast %120 : vector<1x128xi1> to vector<1x128xi1>
      %156 = vector.broadcast %155 : vector<1x128xi1> to vector<8x128xi1>
      %157 = vector.broadcast %cst_80 : f32 to vector<8x128xf32>
      %158 = arith.select %156, %154, %157 : vector<8x128xi1>, vector<8x128xf32>
      %c16_81 = arith.constant 16 : index
      %c0_82 = arith.constant 0 : index
      %159 = vector.load %arg7[%c16_81, %c0_82] : memref<64x128xf32, #tpu.memory_space<vmem>>, vector<8x128xf32>
      tpu.vector_store %arg7[%c16_81, %c0_82], %158 {strides = array<i32>} : memref<64x128xf32, #tpu.memory_space<vmem>>, vector<8x128xf32>,
      %c24_83 = arith.constant 24 : index
      %c0_84 = arith.constant 0 : index
      %160 = vector.load %arg8[%c24_83, %c0_84] : memref<64x128xf32, #tpu.memory_space<vmem>>, vector<8x128xf32>
      %161 = vector.extract_strided_slice %160 {offsets = [7, 0], sizes = [1, 128], strides = [1, 1]} : vector<8x128xf32> to vector<1x128xf32>
      %cst_85 = arith.constant 5.000000e-01 : f32
      %162 = vector.broadcast %cst_85 : f32 to vector<1x128xf32>
      %163 = arith.cmpf ogt, %161, %162 : vector<1x128xf32>
      %164 = vector.shape_cast %163 : vector<1x128xi1> to vector<1x128xi1>
      %165 = vector.broadcast %164 : vector<1x128xi1> to vector<8x128xi1>
      %166 = arith.select %165, %160, %117 : vector<8x128xi1>, vector<8x128xf32>
      %167 = arith.subf %166, %116 : vector<8x128xf32>
      %cst_86 = arith.constant 0.000000e+00 : f32
      %168 = vector.shape_cast %120 : vector<1x128xi1> to vector<1x128xi1>
      %169 = vector.broadcast %168 : vector<1x128xi1> to vector<8x128xi1>
      %170 = vector.broadcast %cst_86 : f32 to vector<8x128xf32>
      %171 = arith.select %169, %167, %170 : vector<8x128xi1>, vector<8x128xf32>
      %c24_87 = arith.constant 24 : index
      %c0_88 = arith.constant 0 : index
      %172 = vector.load %arg7[%c24_87, %c0_88] : memref<64x128xf32, #tpu.memory_space<vmem>>, vector<8x128xf32>
      tpu.vector_store %arg7[%c24_87, %c0_88], %171 {strides = array<i32>} : memref<64x128xf32, #tpu.memory_space<vmem>>, vector<8x128xf32>,
      %c32_89 = arith.constant 32 : index
      %c0_90 = arith.constant 0 : index
      %173 = vector.load %arg8[%c32_89, %c0_90] : memref<64x128xf32, #tpu.memory_space<vmem>>, vector<8x128xf32>
      %174 = vector.extract_strided_slice %173 {offsets = [7, 0], sizes = [1, 128], strides = [1, 1]} : vector<8x128xf32> to vector<1x128xf32>
      %cst_91 = arith.constant 5.000000e-01 : f32
      %175 = vector.broadcast %cst_91 : f32 to vector<1x128xf32>
      %176 = arith.cmpf ogt, %174, %175 : vector<1x128xf32>
      %177 = vector.shape_cast %176 : vector<1x128xi1> to vector<1x128xi1>
      %178 = vector.broadcast %177 : vector<1x128xi1> to vector<8x128xi1>
      %179 = arith.select %178, %173, %117 : vector<8x128xi1>, vector<8x128xf32>
      %180 = arith.subf %179, %116 : vector<8x128xf32>
      %cst_92 = arith.constant 0.000000e+00 : f32
      %181 = vector.shape_cast %120 : vector<1x128xi1> to vector<1x128xi1>
      %182 = vector.broadcast %181 : vector<1x128xi1> to vector<8x128xi1>
      %183 = vector.broadcast %cst_92 : f32 to vector<8x128xf32>
      %184 = arith.select %182, %180, %183 : vector<8x128xi1>, vector<8x128xf32>
      %c32_93 = arith.constant 32 : index
      %c0_94 = arith.constant 0 : index
      %185 = vector.load %arg7[%c32_93, %c0_94] : memref<64x128xf32, #tpu.memory_space<vmem>>, vector<8x128xf32>
      tpu.vector_store %arg7[%c32_93, %c0_94], %184 {strides = array<i32>} : memref<64x128xf32, #tpu.memory_space<vmem>>, vector<8x128xf32>,
      %c40_95 = arith.constant 40 : index
      %c0_96 = arith.constant 0 : index
      %186 = vector.load %arg8[%c40_95, %c0_96] : memref<64x128xf32, #tpu.memory_space<vmem>>, vector<8x128xf32>
      %187 = vector.extract_strided_slice %186 {offsets = [7, 0], sizes = [1, 128], strides = [1, 1]} : vector<8x128xf32> to vector<1x128xf32>
      %cst_97 = arith.constant 5.000000e-01 : f32
      %188 = vector.broadcast %cst_97 : f32 to vector<1x128xf32>
      %189 = arith.cmpf ogt, %187, %188 : vector<1x128xf32>
      %190 = vector.shape_cast %189 : vector<1x128xi1> to vector<1x128xi1>
      %191 = vector.broadcast %190 : vector<1x128xi1> to vector<8x128xi1>
      %192 = arith.select %191, %186, %117 : vector<8x128xi1>, vector<8x128xf32>
      %193 = arith.subf %192, %116 : vector<8x128xf32>
      %cst_98 = arith.constant 0.000000e+00 : f32
      %194 = vector.shape_cast %120 : vector<1x128xi1> to vector<1x128xi1>
      %195 = vector.broadcast %194 : vector<1x128xi1> to vector<8x128xi1>
      %196 = vector.broadcast %cst_98 : f32 to vector<8x128xf32>
      %197 = arith.select %195, %193, %196 : vector<8x128xi1>, vector<8x128xf32>
      %c40_99 = arith.constant 40 : index
      %c0_100 = arith.constant 0 : index
      %198 = vector.load %arg7[%c40_99, %c0_100] : memref<64x128xf32, #tpu.memory_space<vmem>>, vector<8x128xf32>
      tpu.vector_store %arg7[%c40_99, %c0_100], %197 {strides = array<i32>} : memref<64x128xf32, #tpu.memory_space<vmem>>, vector<8x128xf32>,
      %c48_101 = arith.constant 48 : index
      %c0_102 = arith.constant 0 : index
      %199 = vector.load %arg8[%c48_101, %c0_102] : memref<64x128xf32, #tpu.memory_space<vmem>>, vector<8x128xf32>
      %200 = vector.extract_strided_slice %199 {offsets = [7, 0], sizes = [1, 128], strides = [1, 1]} : vector<8x128xf32> to vector<1x128xf32>
      %cst_103 = arith.constant 5.000000e-01 : f32
      %201 = vector.broadcast %cst_103 : f32 to vector<1x128xf32>
      %202 = arith.cmpf ogt, %200, %201 : vector<1x128xf32>
      %203 = vector.shape_cast %202 : vector<1x128xi1> to vector<1x128xi1>
      %204 = vector.broadcast %203 : vector<1x128xi1> to vector<8x128xi1>
      %205 = arith.select %204, %199, %117 : vector<8x128xi1>, vector<8x128xf32>
      %206 = arith.subf %205, %116 : vector<8x128xf32>
      %cst_104 = arith.constant 0.000000e+00 : f32
      %207 = vector.shape_cast %120 : vector<1x128xi1> to vector<1x128xi1>
      %208 = vector.broadcast %207 : vector<1x128xi1> to vector<8x128xi1>
      %209 = vector.broadcast %cst_104 : f32 to vector<8x128xf32>
      %210 = arith.select %208, %206, %209 : vector<8x128xi1>, vector<8x128xf32>
      %c48_105 = arith.constant 48 : index
      %c0_106 = arith.constant 0 : index
      %211 = vector.load %arg7[%c48_105, %c0_106] : memref<64x128xf32, #tpu.memory_space<vmem>>, vector<8x128xf32>
      tpu.vector_store %arg7[%c48_105, %c0_106], %210 {strides = array<i32>} : memref<64x128xf32, #tpu.memory_space<vmem>>, vector<8x128xf32>,
      %c56_107 = arith.constant 56 : index
      %c0_108 = arith.constant 0 : index
      %212 = vector.load %arg8[%c56_107, %c0_108] : memref<64x128xf32, #tpu.memory_space<vmem>>, vector<8x128xf32>
      %213 = vector.extract_strided_slice %212 {offsets = [7, 0], sizes = [1, 128], strides = [1, 1]} : vector<8x128xf32> to vector<1x128xf32>
      %cst_109 = arith.constant 5.000000e-01 : f32
      %214 = vector.broadcast %cst_109 : f32 to vector<1x128xf32>
      %215 = arith.cmpf ogt, %213, %214 : vector<1x128xf32>
      %216 = vector.shape_cast %215 : vector<1x128xi1> to vector<1x128xi1>
      %217 = vector.broadcast %216 : vector<1x128xi1> to vector<8x128xi1>
      %218 = arith.select %217, %212, %117 : vector<8x128xi1>, vector<8x128xf32>
      %219 = arith.subf %218, %116 : vector<8x128xf32>
      %cst_110 = arith.constant 0.000000e+00 : f32
      %220 = vector.shape_cast %120 : vector<1x128xi1> to vector<1x128xi1>
      %221 = vector.broadcast %220 : vector<1x128xi1> to vector<8x128xi1>
      %222 = vector.broadcast %cst_110 : f32 to vector<8x128xf32>
      %223 = arith.select %221, %219, %222 : vector<8x128xi1>, vector<8x128xf32>
      %c56_111 = arith.constant 56 : index
      %c0_112 = arith.constant 0 : index
      %224 = vector.load %arg7[%c56_111, %c0_112] : memref<64x128xf32, #tpu.memory_space<vmem>>, vector<8x128xf32>
      tpu.vector_store %arg7[%c56_111, %c0_112], %223 {strides = array<i32>} : memref<64x128xf32, #tpu.memory_space<vmem>>, vector<8x128xf32>,
    } else {
    }
    return
  }
  func.func @transform_0(%arg0: i32, %arg1: i32) -> (i32, i32) {
    %c0_i32 = arith.constant 0 : i32
    %c0_i32_0 = arith.constant 0 : i32
    return %arg0, %c0_i32 : i32, i32
  }
  func.func @transform_1(%arg0: i32, %arg1: i32) -> (i32, i32) {
    %c0_i32 = arith.constant 0 : i32
    %c0_i32_0 = arith.constant 0 : i32
    return %c0_i32, %arg0 : i32, i32
  }
  func.func @transform_2(%arg0: i32, %arg1: i32) -> (i32, i32) {
    %c0_i32 = arith.constant 0 : i32
    %c0_i32_0 = arith.constant 0 : i32
    return %c0_i32, %arg1 : i32, i32
  }
  func.func @transform_3(%arg0: i32, %arg1: i32) -> (i32, i32) {
    %c0_i32 = arith.constant 0 : i32
    %c0_i32_0 = arith.constant 0 : i32
    return %c0_i32, %arg1 : i32, i32
  }
  func.func @transform_4(%arg0: i32, %arg1: i32) -> (i32, i32) {
    %c0_i32 = arith.constant 0 : i32
    %c0_i32_0 = arith.constant 0 : i32
    %c0_i32_1 = arith.constant 0 : i32
    return %c0_i32, %c0_i32_0 : i32, i32
  }
  func.func @transform_5(%arg0: i32, %arg1: i32) -> (i32, i32) {
    %c0_i32 = arith.constant 0 : i32
    %c0_i32_0 = arith.constant 0 : i32
    return %c0_i32, %arg0 : i32, i32
  }
}

</mosaic_0001>

<bundles_post_ra>
// kernel: tpu_custom_call.1
= control target key start
LH: loop header
LB: loop body
LE: loop exit
PB: predicated region body
PF: predicated region fallthrough
CT: control target
= control target key end

     0   :  { %v4799_v1 = vmov 2   ;;  %v4800_v2 = vmov 1   ;;  %v8441_v3 = vmov 0   ;;  %s8413_s0 = inlined_call_operand.vmem [shape: f32[128,8], index: 0, kind: input, shape index: {}]   ;;  %s8414_s1 = inlined_call_operand.vmem [shape: f32[8,128], index: 1, kind: input, shape index: {}]   ;;  %s8415_s2 = inlined_call_operand.vmem [shape: f32[1,128], index: 2, kind: input, shape index: {}]   ;;  %s8416_s3 = inlined_call_operand.vmem [shape: f32[8,128], index: 3, kind: input, shape index: {}]   ;;  %s8417_s4 = inlined_call_operand.vmem [shape: bf16[128,128], index: 4, kind: input, shape index: {}]   ;;  %s8418_s5 = inlined_call_operand.hbm [shape: f32[64,128], index: 5, kind: output, shape index: {}]  }
   0x1   :  { %v50_v0 = vld [vmem:[%s8413_s0] sm:$0xff]  ;;  %4710 = vset.pattern.permute.xlu2 %v4799_v1  ;;  %4709 = vset.pattern.permute.xlu1 %v4800_v2 }
   0x2   :  { %4708 = vset.pattern.permute.xlu0 %v8441_v3  ;;  %311 = vperm.xlu2 %4710, %v50_v0  }
   0x3   :  { %10 = vsyncpa [#allocation5], 0  ;;  %198 = vperm.xlu1 %4709, %v50_v0   ;;  %70 = vperm.xlu0 %4708, %v50_v0   ;;  %v51_v4 = vld [vmem:[%s8413_s0 + $0x8] sm:$0xff]  ;;  %v54_v5 = vld [vmem:[%s8413_s0 + $0x20] sm:$0xff]  ;;  %v4802_v7 = vmov 3   ;;  %vm8419_vm0 = vcmask 7168  }
   0x4   :  { %v52_v6 = vld [vmem:[%s8413_s0 + $0x10] sm:$0xff]  ;;  %v53_v8 = vld [vmem:[%s8413_s0 + $0x18] sm:$0xff]  ;;  %v55_v11 = vld [vmem:[%s8413_s0 + $0x28] sm:$0xff]  ;;  %v4803_v36 = vmov 0.0   ;;  %s4117_s26 = sshll.u32 %s8418_s5, 4  ;;  %s4808_s27 = smov 128   ;;  %s4118_s26 = int_to_ptr.hbm [resolvable:$true] %s4117_s26 }
   0x5   :  { %v56_v9 = vld [vmem:[%s8413_s0 + $0x30] sm:$0xff]  ;;  %v57_v10 = vld [vmem:[%s8413_s0 + $0x38] sm:$0xff]  ;;  %v4887_v12 = vld [vmem:[%s8413_s0 + $0x40] sm:$0xff]  ;;  %47 = vst.msk [vmem:[#allocation3 + $0x68] sm:$0xff] %vm8419_vm0, %v4803_v36  ;;  %s4809_s28 = smov 8  }
   0x6   :  { %v4896_v13 = vld [vmem:[%s8413_s0 + $0x58] sm:$0xff]  ;;  %v4907_v15 = vld [vmem:[%s8413_s0 + $0x50] sm:$0xff]  ;;  %v4923_v19 = vld [vmem:[%s8413_s0 + $0x68] sm:$0xff]  ;;  %34 = vst.msk [vmem:[#allocation3] sm:$0xff] %vm8419_vm0, %v4803_v36 }
   0x7   :  { %v4696_v16 = vld [vmem:[%s8417_s4 + $0x38] sm:$0xff]  ;;  %v4695_v18 = vld [vmem:[%s8417_s4 + $0x30] sm:$0xff]  ;;  %v4694_v20 = vld [vmem:[%s8417_s4 + $0x28] sm:$0xff]  ;;  %35 = vst.msk [vmem:[#allocation3 + $0x8] sm:$0xff] %vm8419_vm0, %v4803_v36 }
   0x8   :  { %626 = vmatpush.bf16.msra.mxu0 %v4696_v16  ;;  %v59_v21 = vld [vmem:[%s8413_s0 + $0x48] sm:$0xff]  ;;  %v4693_v23 = vld [vmem:[%s8417_s4 + $0x20] sm:$0xff]  ;;  %v4692_v24 = vld [vmem:[%s8417_s4 + $0x18] sm:$0xff]  ;;  %36 = vst.msk [vmem:[#allocation3 + $0x10] sm:$0xff] %vm8419_vm0, %v4803_v36 }
   0x9   :  { %v4948_v25 = vld [vmem:[%s8413_s0 + $0x70] sm:$0xff]  ;;  %v4690_v30 = vld [vmem:[%s8417_s4 + $0x8] sm:$0xff]  ;;  %v4965_v31 = vld [vmem:[%s8413_s0 + $0x78] sm:$0xff]  ;;  %37 = vst.msk [vmem:[#allocation3 + $0x18] sm:$0xff] %vm8419_vm0, %v4803_v36 }
   0xa   :  { %315 = vperm.xlu2 %4710, %v51_v4   ;;  %v4691_v29 = vld [vmem:[%s8417_s4 + $0x10] sm:$0xff]  ;;  %v4689_v34 = vld [vmem:[%s8417_s4] sm:$0xff]  ;;  %38 = vst.msk [vmem:[#allocation3 + $0x20] sm:$0xff] %vm8419_vm0, %v4803_v36 }
   0xb   :  { %202 = vperm.xlu1 %4709, %v51_v4   ;;  %75 = vperm.xlu0 %4708, %v51_v4   ;;  %39 = vst.msk [vmem:[#allocation3 + $0x28] sm:$0xff] %vm8419_vm0, %v4803_v36  ;;  %v66_v40 = vld [vmem:[%s8416_s3] sm:$0xff] }
   0xc   :  { %627 = vmatpush.bf16.msra.mxu0 %v4695_v18  ;;  %v688_v39 = vld [vmem:[#allocation3 + $0x68] sm:$0xff]  ;;  %40 = vst.msk [vmem:[#allocation3 + $0x30] sm:$0xff] %vm8419_vm0, %v4803_v36  ;;  %v5014_v42 = vperm.slane %v66_v40, 1  ;;  %v5016_v43 = vperm.slane %v66_v40, 0  ;;  %v5028_v47 = vperm.slane %v66_v40, 2  ;;  %v8530_v18 = vmov 0 }
   0xd   :  { %41 = vst.msk [vmem:[#allocation3 + $0x38] sm:$0xff] %vm8419_vm0, %v4803_v36 }
   0xe   :  { %42 = vst.msk [vmem:[#allocation3 + $0x40] sm:$0xff] %vm8419_vm0, %v4803_v36 }
   0xf   :  { %43 = vst.msk [vmem:[#allocation3 + $0x48] sm:$0xff] %vm8419_vm0, %v4803_v36 }
  0x10   :  { %628 = vmatpush.bf16.msra.mxu0 %v4694_v20  ;;  %44 = vst.msk [vmem:[#allocation3 + $0x50] sm:$0xff] %vm8419_vm0, %v4803_v36 }
  0x11   :  { %45 = vst.msk [vmem:[#allocation3 + $0x58] sm:$0xff] %vm8419_vm0, %v4803_v36 }
  0x12   :  { %4712 = vset.pattern.permute.xlu2 %v8441_v3  ;;  %46 = vst.msk [vmem:[#allocation3 + $0x60] sm:$0xff] %vm8419_vm0, %v4803_v36  ;;  %v5043_v59 = vld [vmem:[#allocation3 + $0x28] sm:$0xff] }
  0x13   :  { %4711 = vset.pattern.permute.xlu1 %v4802_v7  ;;  %90 = vperm.xlu0 %4708, %v54_v5   ;;  %48 = vst.msk [vmem:[#allocation3 + $0x70] sm:$0xff] %vm8419_vm0, %v4803_v36 }
  0x14   :  { %80 = vperm.xlu2 %4712, %v52_v6   ;;  %428 = vperm.xlu1 %4711, %v51_v4   ;;  %49 = vst.msk [vmem:[#allocation3 + $0x78] sm:$0xff] %vm8419_vm0, %v4803_v36  ;;  %v5053_v4 = vld [vmem:[%s8415_s2] ss:$0 sm:$0xff] }
  0x15   :  { %629 = vmatpush.bf16.msra.mxu0 %v4693_v23  ;;  %v5030_v49 = vld [vmem:[#allocation3 + $0x40] sm:$0xff] }
  0x19   :  { %630 = vmatpush.bf16.msra.mxu0 %v4692_v24 }
  0x1b   :  { %4719 = vset.pattern.permute.xlu0 %v4800_v2 }
  0x1c   :  { %4714 = vset.pattern.permute.xlu2 %v4800_v2  ;;  %4713 = vset.pattern.permute.xlu1 %v8441_v3 }
  0x1d   :  { %210 = vperm.xlu0 %4719, %v53_v8   ;;  %206 = vperm.xlu2 %4714, %v52_v6  }
  0x1e   :  { %85 = vperm.xlu1 %4713, %v53_v8   ;;  %631 = vmatpush.bf16.msra.mxu0 %v4691_v29 }
  0x22   :  { %632 = vmatpush.bf16.msra.mxu0 %v4690_v30 }
  0x25   :  { %222 = vperm.xlu0 %4719, %v56_v9   ;;  %4716 = vset.pattern.permute.xlu2 %v4799_v1 }
  0x26   :  { %4715 = vset.pattern.permute.xlu1 %v4799_v1  ;;  %323 = vperm.xlu2 %4716, %v53_v8  }
  0x27   :  { %319 = vperm.xlu1 %4715, %v52_v6   ;;  %633 = vmatpush.bf16.msra.mxu0 %v4689_v34 }
  0x2d   :  { %4728 = vset.pattern.permute.xlu0 %v4802_v7 }
  0x2e   :  { %424 = vperm.xlu0 %4728, %v50_v0   ;;  %4718 = vset.pattern.permute.xlu2 %v4802_v7 }
  0x2f   :  { %4717 = vset.pattern.permute.xlu1 %v4802_v7  ;;  %436 = vperm.xlu2 %4718, %v53_v8  }
  0x30   :  { %432 = vperm.xlu1 %4717, %v52_v6  }
  0x36   :  { %452 = vperm.xlu0 %4728, %v57_v10  }
  0x37   :  { %4721 = vset.pattern.permute.xlu2 %v4800_v2 }
  0x38   :  { %4720 = vset.pattern.permute.xlu1 %v8441_v3  ;;  %214 = vperm.xlu2 %4721, %v54_v5  }
  0x39   :  { %95 = vperm.xlu1 %4720, %v55_v11  }
  0x3e   :  { %4733 = vset.pattern.permute.xlu0 %v4799_v1 }
  0x3f   :  { %331 = vperm.xlu0 %4733, %v55_v11  }
  0x40   :  { %4723 = vset.pattern.permute.xlu2 %v4799_v1 }
  0x41   :  { %4722 = vset.pattern.permute.xlu1 %v4800_v2  ;;  %327 = vperm.xlu2 %4723, %v54_v5  }
  0x42   :  { %218 = vperm.xlu1 %4722, %v55_v11  }
  0x47   :  { %343 = vperm.xlu0 %4733, %v4887_v12  }
  0x49   :  { %4725 = vset.pattern.permute.xlu2 %v4802_v7 }
  0x4a   :  { %4724 = vset.pattern.permute.xlu1 %v4802_v7  ;;  %444 = vperm.xlu2 %4725, %v55_v11  }
  0x4b   :  { %440 = vperm.xlu1 %4724, %v54_v5  }
  0x4f   :  { %4742 = vset.pattern.permute.xlu0 %v8441_v3 }
  0x50   :  { %125 = vperm.xlu0 %4742, %v4896_v13  }
  0x52   :  { %4727 = vset.pattern.permute.xlu2 %v8441_v3 }
  0x53   :  { %4726 = vset.pattern.permute.xlu1 %v8441_v3  ;;  %105 = vperm.xlu2 %4727, %v57_v10  }
  0x54   :  { %100 = vperm.xlu1 %4726, %v56_v9  }
  0x58   :  { %4747 = vset.pattern.permute.xlu0 %v4802_v7 }
  0x59   :  { %464 = vperm.xlu0 %4747, %v4907_v15  }
  0x5b   :  { %4730 = vset.pattern.permute.xlu2 %v4799_v1 }
  0x5c   :  { %4729 = vset.pattern.permute.xlu1 %v4800_v2  ;;  %335 = vperm.xlu2 %4730, %v56_v9   ;;  %v4901_v14 = vpop.permute.xlu2 %311 }
  0x5d   :  { %226 = vperm.xlu1 %4729, %v57_v10   ;;  %v375_v60 = vsub.f32 %v4901_v14, %v5028_v47 }
  0x5f   :  { %v391_v6 = vmul.f32 %v375_v60, %v375_v60 }
  0x61   :  { %4752 = vset.pattern.permute.xlu0 %v4800_v2 }
  0x62   :  { %250 = vperm.xlu0 %4752, %v4923_v19  }
  0x64   :  { %4732 = vset.pattern.permute.xlu2 %v4802_v7  ;;  %v4914_v17 = vpop.permute.xlu2 %315 }
  0x65   :  { %4731 = vset.pattern.permute.xlu1 %v4799_v1  ;;  %448 = vperm.xlu2 %4732, %v56_v9   ;;  %v376_v55 = vsub.f32 %v4914_v17, %v5028_v47 }
  0x66   :  { %339 = vperm.xlu1 %4731, %v57_v10   ;;  %v5061_v10 = vld [vmem:[#allocation3 + $0x10] sm:$0xff] }
  0x67   :  { %v392_v62 = vmul.f32 %v376_v55, %v376_v55 }
  0x6a   :  { %4757 = vset.pattern.permute.xlu0 %v8441_v3 }
  0x6b   :  { %140 = vperm.xlu0 %4757, %v4948_v25  }
  0x6d   :  { %4735 = vset.pattern.permute.xlu2 %v8441_v3 }
  0x6e   :  { %4734 = vset.pattern.permute.xlu1 %v8441_v3  ;;  %115 = vperm.xlu2 %4735, %v59_v21   ;;  %v4935_v22 = vpop.permute.xlu2 %80 }
  0x6f   :  { %110 = vperm.xlu1 %4734, %v4887_v12   ;;  %v151_v14 = vsub.f32 %v4935_v22, %v5016_v43 }
  0x71   :  { %v167_v29 = vmul.f32 %v151_v14, %v151_v14  ;;  %v8538_v14 = vmov 0 }
  0x73   :  { %4762 = vset.pattern.permute.xlu0 %v4799_v1 }
  0x74   :  { %371 = vperm.xlu0 %4762, %v4965_v31  }
  0x75   :  { %v199_v26 = vpop.permute.xlu1 %198  ;;  %v71_v27 = vpop.permute.xlu0 %70 }
  0x76   :  { %4737 = vset.pattern.permute.xlu2 %v4800_v2  ;;  %v262_v50 = vsub.f32 %v199_v26, %v5014_v42  ;;  %v149_v51 = vsub.f32 %v71_v27, %v5016_v43  ;;  %v4804_v27 = vmov 1.0|1.0  }
  0x77   :  { %4736 = vset.pattern.permute.xlu1 %v4800_v2  ;;  %234 = vperm.xlu2 %4737, %v59_v21   ;;  %v4953_v28 = vpop.permute.xlu2 %206 }
  0x78   :  { %230 = vperm.xlu1 %4736, %v4887_v12   ;;  %v278_v56 = vmul.f32 %v262_v50, %v262_v50  ;;  %v165_v57 = vmul.f32 %v149_v51, %v149_v51  ;;  %v264_v17 = vsub.f32 %v4953_v28, %v5014_v42 }
  0x7a   :  { %v294_v63 = vadd.f32 %v278_v56, %v165_v57  ;;  %v280_v30 = vmul.f32 %v264_v17, %v264_v17 }
  0x7c   :  { %4767 = vset.pattern.permute.xlu0 %v8441_v3  ;;  %v407_v9 = vadd.f32 %v391_v6, %v294_v63 }
  0x7d   :  { %v203_v32 = vpop.permute.xlu1 %202  ;;  %v76_v33 = vpop.permute.xlu0 %75  ;;  %758 = vperm.xlu0 %4767, %v688_v39  }
  0x7e   :  { %v263_v44 = vsub.f32 %v203_v32, %v5014_v42  ;;  %v150_v45 = vsub.f32 %v76_v33, %v5016_v43  ;;  %vm506_vm4 = vcmp.lt.f32.partialorder %v407_v9, 0.122499995 }
  0x7f   :  { %4739 = vset.pattern.permute.xlu2 %v4802_v7 }
  0x80   :  { %4738 = vset.pattern.permute.xlu1 %v4799_v1  ;;  %456 = vperm.xlu2 %4739, %v4887_v12   ;;  %v4975_v35 = vpop.permute.xlu2 %323  ;;  %v279_v52 = vmul.f32 %v263_v44, %v263_v44  ;;  %v166_v53 = vmul.f32 %v150_v45, %v150_v45 }
  0x81   :  { %347 = vperm.xlu1 %4738, %v59_v21   ;;  %v378_v22 = vsub.f32 %v4975_v35, %v5028_v47 }
  0x82   :  { %v295_v58 = vadd.f32 %v279_v52, %v166_v53 }
  0x83   :  { %v394_v32 = vmul.f32 %v378_v22, %v378_v22 }
  0x84   :  { %v408_v5 = vadd.f32 %v392_v62, %v295_v58 }
  0x85   :  { %v4987_v37 = vpop.permute.xlu0 %90  ;;  %733 = vperm.xlu0 %4767, %v5030_v49  }
  0x86   :  { %v4991_v38 = vpop.permute.xlu1 %428  ;;  %vm507_vm2 = vcmp.lt.f32.partialorder %v408_v5, 0.122499995 }
  0x87   :  { %vm491_vm1 = vcmp.eq.f32.partialorder %v4991_v38, %v5053_v4  ;;  %v296_v38 = vadd.f32 %v280_v30, %v167_v29 }
  0x88   :  { %4741 = vset.pattern.permute.xlu2 %v8441_v3  ;;  %vm5069_vm3 = vmand %vm491_vm1, %vm507_vm2 }
  0x89   :  { %4740 = vset.pattern.permute.xlu1 %v4802_v7  ;;  %120 = vperm.xlu2 %4741, %v4907_v15   ;;  %v5008_v41 = vpop.permute.xlu2 %436 }
  0x8a   :  { %460 = vperm.xlu1 %4740, %v59_v21   ;;  %v5082_v21 = vld [vmem:[%s8413_s0 + $0x60] sm:$0xff]  ;;  %vm493_vm9 = vcmp.eq.f32.partialorder %v5008_v41, %v5053_v4  ;;  %s4805_s0 = smov 1  }
  0x8d   :  { %718 = vperm.xlu0 %4767, %v5043_v59  }
  0x8f   :  { %v211_v46 = vpop.permute.xlu0 %210 }
  0x90   :  { %v86_v48 = vpop.permute.xlu1 %85  ;;  %v265_v12 = vsub.f32 %v211_v46, %v5014_v42 }
  0x91   :  { %4744 = vset.pattern.permute.xlu2 %v4800_v2  ;;  %v152_v11 = vsub.f32 %v86_v48, %v5016_v43  ;;  %v8532_v48 = vmov 0 }
  0x92   :  { %4743 = vset.pattern.permute.xlu1 %v4800_v2  ;;  %242 = vperm.xlu2 %4744, %v4896_v13   ;;  %v5038_v54 = vpop.permute.xlu2 %214  ;;  %v281_v24 = vmul.f32 %v265_v12, %v265_v12 }
  0x93   :  { %238 = vperm.xlu1 %4743, %v4907_v15   ;;  %v168_v23 = vmul.f32 %v152_v11, %v152_v11  ;;  %v266_v46 = vsub.f32 %v5038_v54, %v5014_v42 }
  0x95   :  { %703 = vperm.xlu0 %4767, %v5061_v10   ;;  %v297_v33 = vadd.f32 %v281_v24, %v168_v23  ;;  %v282_v52 = vmul.f32 %v266_v46, %v266_v46  ;;  %v5192_v46 = vld [vmem:[#allocation3 + $0x60] sm:$0xff] }
  0x97   :  { %v5047_v61 = vpop.permute.xlu0 %222  ;;  %v410_v39 = vadd.f32 %v394_v32, %v297_v33 }
  0x99   :  { %v320_v0 = vpop.permute.xlu1 %319  ;;  %vm509_vm10 = vcmp.lt.f32.partialorder %v410_v39, 0.122499995 }
  0x9a   :  { %4746 = vset.pattern.permute.xlu2 %v4799_v1  ;;  %v377_v26 = vsub.f32 %v320_v0, %v5028_v47  ;;  %vm5115_vm13 = vmand %vm493_vm9, %vm509_vm10 }
  0x9b   :  { %4745 = vset.pattern.permute.xlu1 %v4799_v1  ;;  %355 = vperm.xlu2 %4746, %v4896_v13   ;;  %v328_v8 = vpop.permute.xlu2 %327 }
  0x9c   :  { %351 = vperm.xlu1 %4745, %v4907_v15   ;;  %v8528_v15 = vmov 0  ;;  %v393_v34 = vmul.f32 %v377_v26, %v377_v26  ;;  %v379_v53 = vsub.f32 %v328_v8, %v5028_v47 }
  0x9d   :  { %v8529_v15 = vsel %vm5069_vm3, 4294967295, %v8528_v15 }
  0x9e   :  { %v409_v40 = vadd.f32 %v393_v34, %v296_v38  ;;  %v395_v58 = vmul.f32 %v379_v53, %v379_v53 }
  0xa0   :  { %v425_v16 = vpop.permute.xlu0 %424  ;;  %vm508_vm11 = vcmp.lt.f32.partialorder %v409_v40, 0.122499995 }
  0xa1   :  { %vm490_vm5 = vcmp.eq.f32.partialorder %v425_v16, %v5053_v4 }
  0xa2   :  { %vm5075_vm6 = vmand %vm490_vm5, %vm506_vm4  ;;  %v433_v20 = vpop.permute.xlu1 %432 }
  0xa3   :  { %v8531_v18 = vsel %vm5075_vm6, 4294967295, %v8530_v18  ;;  %4749 = vset.pattern.permute.xlu2 %v8441_v3  ;;  %vm4161_vm7 = vmpackc.low %vm5069_vm3, %vm5075_vm6  ;;  %vm492_vm8 = vcmp.eq.f32.partialorder %v433_v20, %v5053_v4 }
  0xa4   :  { %4748 = vset.pattern.permute.xlu1 %v4802_v7  ;;  %4162 = vmatmul.msk.bf16.vlgmr.msra.gmra.mxu0 %vm4161_vm7, %v4804_v27  ;;  %v445_v28 = vpop.permute.xlu2 %444  ;;  %vm5111_vm12 = vmand %vm492_vm8, %vm508_vm11 }
  0xa5   :  { %130 = vperm.xlu2 %4749, %v5082_v21   ;;  %468 = vperm.xlu1 %4748, %v4896_v13   ;;  %v153_v13 = vsub.f32 %v4987_v37, %v5016_v43  ;;  %v8533_v48 = vsel %vm5111_vm12, 4294967295, %v8532_v48  ;;  %v8534_v37 = vmov 0  ;;  %vm4163_vm14 = vmpackc.low %vm5115_vm13, %vm5111_vm12  ;;  %vm495_vm15 = vcmp.eq.f32.partialorder %v445_v28, %v5053_v4 }
  0xa6   :  { %v8535_v37 = vsel %vm5115_vm13, 4294967295, %v8534_v37 }
  0xa7   :  { %v169_v51 = vmul.f32 %v153_v13, %v153_v13 }
  0xa8   :  { %v5096_v35 = vpop.permute.xlu0 %452 }
  0xa9   :  { %v298_v57 = vadd.f32 %v282_v52, %v169_v51  ;;  %vm497_vm11 = vcmp.eq.f32.partialorder %v5096_v35, %v5053_v4 }
  0xab   :  { %v96_v44 = vpop.permute.xlu1 %95  ;;  %v411_v8 = vadd.f32 %v395_v58, %v298_v57 }
  0xac   :  { %v154_v54 = vsub.f32 %v96_v44, %v5016_v43 }
  0xad   :  { %4751 = vset.pattern.permute.xlu2 %v4800_v2  ;;  %4750 = vset.pattern.permute.xlu1 %v8441_v3  ;;  %v5101_v45 = vpop.permute.xlu2 %105  ;;  %vm510_vm4 = vcmp.lt.f32.partialorder %v411_v8, 0.122499995 }
  0xae   :  { %246 = vperm.xlu2 %4751, %v5082_v21   ;;  %135 = vperm.xlu1 %4750, %v4923_v19   ;;  %v170_v62 = vmul.f32 %v154_v54, %v154_v54  ;;  %v156_v30 = vsub.f32 %v5101_v45, %v5016_v43 }
  0xb0   :  { %v172_v38 = vmul.f32 %v156_v30, %v156_v30  ;;  %v5233_v30 = vld [vmem:[#allocation3 + $0x18] sm:$0xff] }
  0xb1   :  { %v332_v50 = vpop.permute.xlu0 %331 }
  0xb2   :  { %v380_v41 = vsub.f32 %v332_v50, %v5028_v47  ;;  %v5194_v50 = vld [vmem:[#allocation3 + $0x58] sm:$0xff] }
  0xb4   :  { %v219_v55 = vpop.permute.xlu1 %218  ;;  %4164 = vmatmul.msk.bf16.gmra.mxu0 %vm4163_vm14, %v4804_v27  ;;  %v396_v0 = vmul.f32 %v380_v41, %v380_v41 }
  0xb5   :  { %v267_v56 = vsub.f32 %v219_v55, %v5014_v42 }
  0xb6   :  { %4754 = vset.pattern.permute.xlu2 %v4799_v1  ;;  %4753 = vset.pattern.permute.xlu1 %v4799_v1  ;;  %v336_v60 = vpop.permute.xlu2 %335 }
  0xb7   :  { %v283_v63 = vmul.f32 %v267_v56, %v267_v56  ;;  %363 = vperm.xlu2 %4754, %v4923_v19   ;;  %359 = vperm.xlu1 %4753, %v5082_v21   ;;  %v381_v23 = vsub.f32 %v336_v60, %v5028_v47 }
  0xb9   :  { %v299_v5 = vadd.f32 %v283_v63, %v170_v62  ;;  %v397_v29 = vmul.f32 %v381_v23, %v381_v23  ;;  %v344_v41 = vpop.permute.xlu0 %343  ;;  %v5203_v62 = vld [vmem:[#allocation3 + $0x50] sm:$0xff]  ;;  %v5205_v63 = vld [vmem:[#allocation3 + $0x48] sm:$0xff] }
  0xba   :  { %v383_v55 = vsub.f32 %v344_v41, %v5028_v47  ;;  %v5212_v23 = vld [vmem:[#allocation3 + $0x30] sm:$0xff] }
  0xbb   :  { %v412_v6 = vadd.f32 %v396_v0, %v299_v5 }
  0xbc   :  { %v399_v0 = vmul.f32 %v383_v55, %v383_v55 }
  0xbd   :  { %vm511_vm1 = vcmp.lt.f32.partialorder %v412_v6, 0.122499995  ;;  %v441_v9 = vpop.permute.xlu1 %440 }
  0xbe   :  { %vm494_vm2 = vcmp.eq.f32.partialorder %v441_v9, %v5053_v4  ;;  %vm5136_vm5 = vmand %vm495_vm15, %vm511_vm1 }
  0xbf   :  { %4756 = vset.pattern.permute.xlu2 %v4802_v7  ;;  %4755 = vset.pattern.permute.xlu1 %v4802_v7  ;;  %v449_v12 = vpop.permute.xlu2 %448  ;;  %vm5140_vm7 = vmand %vm494_vm2, %vm510_vm4 }
  0xc0   :  { %v8539_v14 = vsel %vm5140_vm7, 4294967295, %v8538_v14  ;;  %476 = vperm.xlu2 %4756, %v4923_v19   ;;  %472 = vperm.xlu1 %4755, %v5082_v21   ;;  %vm4165_vm8 = vmpackc.low %vm5136_vm5, %vm5140_vm7  ;;  %v268_v19 = vsub.f32 %v5047_v61, %v5014_v42  ;;  %vm496_vm9 = vcmp.eq.f32.partialorder %v449_v12, %v5053_v4 }
  0xc2   :  { %v284_v22 = vmul.f32 %v268_v19, %v268_v19 }
  0xc4   :  { %4166 = vmatmul.msk.bf16.gmra.mxu0 %vm4165_vm8, %v4804_v27 }
  0xc6   :  { %v101_v16 = vpop.permute.xlu1 %100 }
  0xc7   :  { %v155_v20 = vsub.f32 %v101_v16, %v5016_v43 }
  0xc8   :  { %4759 = vset.pattern.permute.xlu2 %v4800_v2  ;;  %4758 = vset.pattern.permute.xlu1 %v8441_v3  ;;  %v116_v17 = vpop.permute.xlu2 %115 }
  0xc9   :  { %254 = vperm.xlu2 %4759, %v4948_v25   ;;  %145 = vperm.xlu1 %4758, %v4965_v31   ;;  %v171_v24 = vmul.f32 %v155_v20, %v155_v20  ;;  %v158_v57 = vsub.f32 %v116_v17, %v5016_v43 }
  0xcb   :  { %v300_v61 = vadd.f32 %v284_v22, %v171_v24  ;;  %v174_v6 = vmul.f32 %v158_v57, %v158_v57  ;;  %v5210_v22 = vld [vmem:[#allocation3 + $0x38] sm:$0xff] }
  0xcd   :  { %v413_v33 = vadd.f32 %v397_v29, %v300_v61  ;;  %v5231_v61 = vld [vmem:[#allocation3 + $0x20] sm:$0xff] }
  0xcf   :  { %v227_v21 = vpop.permute.xlu1 %226  ;;  %vm512_vm10 = vcmp.lt.f32.partialorder %v413_v33, 0.122499995 }
  0xd0   :  { %v269_v28 = vsub.f32 %v227_v21, %v5014_v42  ;;  %vm5174_vm14 = vmand %vm496_vm9, %vm512_vm10 }
  0xd1   :  { %4761 = vset.pattern.permute.xlu2 %v4799_v1  ;;  %4760 = vset.pattern.permute.xlu1 %v4800_v2  ;;  %v235_v26 = vpop.permute.xlu2 %234 }
  0xd2   :  { %367 = vperm.xlu2 %4761, %v4948_v25   ;;  %258 = vperm.xlu1 %4760, %v4965_v31   ;;  %v285_v32 = vmul.f32 %v269_v28, %v269_v28  ;;  %v271_v58 = vsub.f32 %v235_v26, %v5014_v42 }
  0xd4   :  { %v301_v39 = vadd.f32 %v285_v32, %v172_v38  ;;  %v287_v8 = vmul.f32 %v271_v58, %v271_v58  ;;  %v126_v32 = vpop.permute.xlu0 %125 }
  0xd6   :  { %v303_v20 = vadd.f32 %v287_v8, %v174_v6 }
  0xd8   :  { %v340_v34 = vpop.permute.xlu1 %339 }
  0xd9   :  { %v382_v1 = vsub.f32 %v340_v34, %v5028_v47  ;;  %v160_v34 = vsub.f32 %v126_v32, %v5016_v43 }
  0xda   :  { %4764 = vset.pattern.permute.xlu2 %v4802_v7  ;;  %4763 = vset.pattern.permute.xlu1 %v4802_v7  ;;  %v457_v2 = vpop.permute.xlu2 %456 }
  0xdb   :  { %v398_v40 = vmul.f32 %v382_v1, %v382_v1  ;;  %484 = vperm.xlu2 %4764, %v4965_v31   ;;  %480 = vperm.xlu1 %4763, %v4948_v25   ;;  %v690_v25 = vld [vmem:[#allocation3 + $0x78] sm:$0xff]  ;;  %v5186_v31 = vld [vmem:[#allocation3 + $0x70] sm:$0xff]  ;;  %vm498_vm4 = vcmp.eq.f32.partialorder %v457_v2, %v5053_v4 }
  0xdd   :  { %v414_v44 = vadd.f32 %v398_v40, %v301_v39  ;;  %v5240_v39 = vld [vmem:[#allocation3 + $0x8] sm:$0xff]  ;;  %v5242_v40 = vld [vmem:[#allocation3] sm:$0xff] }
  0xdf   :  { %vm513_vm15 = vcmp.lt.f32.partialorder %v414_v44, 0.122499995 }
  0xe0   :  { %vm5178_vm1 = vmand %vm497_vm11, %vm513_vm15 }
  0xe1   :  { %v111_v13 = vpop.permute.xlu1 %110  ;;  %vm4167_vm2 = vmpackc.low %vm5178_vm1, %vm5174_vm14 }
  0xe2   :  { %4168 = vmatmul.msk.bf16.gmra.mxu0 %vm4167_vm2, %v4804_v27  ;;  %v157_v53 = vsub.f32 %v111_v13, %v5016_v43  ;;  %v176_v13 = vmul.f32 %v160_v34, %v160_v34 }
  0xe3   :  { %4766 = vset.pattern.permute.xlu2 %v8441_v3  ;;  %4765 = vset.pattern.permute.xlu1 %v8441_v3  ;;  %v121_v35 = vpop.permute.xlu2 %120 }
  0xe4   :  { %768 = vperm.xlu1 %4765, %v690_v25   ;;  %763 = vperm.xlu2 %4766, %v5186_v31   ;;  %v173_v60 = vmul.f32 %v157_v53, %v157_v53  ;;  %v159_v44 = vsub.f32 %v121_v35, %v5016_v43 }
  0xe6   :  { %v175_v41 = vmul.f32 %v159_v44, %v159_v44 }
  0xea   :  { %v231_v51 = vpop.permute.xlu1 %230 }
  0xeb   :  { %v270_v52 = vsub.f32 %v231_v51, %v5014_v42 }
  0xec   :  { %753 = vperm.xlu1 %4765, %v5192_v46   ;;  %748 = vperm.xlu2 %4766, %v5194_v50   ;;  %v243_v54 = vpop.permute.xlu2 %242 }
  0xed   :  { %v286_v56 = vmul.f32 %v270_v52, %v270_v52  ;;  %v273_v38 = vsub.f32 %v243_v54, %v5014_v42  ;;  %v465_v52 = vpop.permute.xlu0 %464 }
  0xef   :  { %v302_v5 = vadd.f32 %v286_v56, %v173_v60  ;;  %v289_v25 = vmul.f32 %v273_v38, %v273_v38 }
  0xf1   :  { %v415_v19 = vadd.f32 %v399_v0, %v302_v5  ;;  %v305_v56 = vadd.f32 %v289_v25, %v176_v13 }
  0xf3   :  { %v348_v9 = vpop.permute.xlu1 %347  ;;  %vm514_vm8 = vcmp.lt.f32.partialorder %v415_v19, 0.122499995 }
  0xf4   :  { %v384_v12 = vsub.f32 %v348_v9, %v5028_v47  ;;  %743 = vperm.xlu1 %4765, %v5203_v62   ;;  %738 = vperm.xlu2 %4766, %v5205_v63   ;;  %vm5218_vm11 = vmand %vm498_vm4, %vm514_vm8  ;;  %vm500_vm4 = vcmp.eq.f32.partialorder %v465_v52, %v5053_v4 }
  0xf5   :  { %v356_v16 = vpop.permute.xlu2 %355  ;;  %v251_v6 = vpop.permute.xlu0 %250 }
  0xf6   :  { %v400_v17 = vmul.f32 %v384_v12, %v384_v12  ;;  %v386_v51 = vsub.f32 %v356_v16, %v5028_v47 }
  0xf8   :  { %v416_v21 = vadd.f32 %v400_v17, %v303_v20  ;;  %v402_v57 = vmul.f32 %v386_v51, %v386_v51  ;;  %v275_v17 = vsub.f32 %v251_v6, %v5014_v42 }
  0xfa   :  { %vm515_vm9 = vcmp.lt.f32.partialorder %v416_v21, 0.122499995  ;;  %v418_v5 = vadd.f32 %v402_v57, %v305_v56 }
  0xfc   :  { %v461_v24 = vpop.permute.xlu1 %460  ;;  %728 = vperm.xlu1 %4765, %v5210_v22   ;;  %723 = vperm.xlu2 %4766, %v5212_v23  }
  0xfd   :  { %vm499_vm10 = vcmp.eq.f32.partialorder %v461_v24, %v5053_v4  ;;  %v141_v20 = vpop.permute.xlu0 %140 }
  0xfe   :  { %vm5222_vm15 = vmand %vm499_vm10, %vm515_vm9  ;;  %vm517_vm10 = vcmp.lt.f32.partialorder %v418_v5, 0.122499995 }
  0xff   :  { %vm4169_vm2 = vmpackc.low %vm5222_vm15, %vm5218_vm11  ;;  %v131_v29 = vpop.permute.xlu2 %130 }
 0x100   :  { %4170 = vmatmul.msk.bf16.gmra.mxu0 %vm4169_vm2, %v4804_v27 }
 0x104   :  { %713 = vperm.xlu1 %4765, %v5231_v61   ;;  %708 = vperm.xlu2 %4766, %v5233_v30  }
 0x105   :  { %v239_v33 = vpop.permute.xlu1 %238 }
 0x106   :  { %v272_v2 = vsub.f32 %v239_v33, %v5014_v42  ;;  %v291_v33 = vmul.f32 %v275_v17, %v275_v17 }
 0x108   :  { %v247_v1 = vpop.permute.xlu2 %246  ;;  %v288_v53 = vmul.f32 %v272_v2, %v272_v2  ;;  %v161_v2 = vsub.f32 %v131_v29, %v5016_v43 }
 0x109   :  { %v274_v44 = vsub.f32 %v247_v1, %v5014_v42 }
 0x10a   :  { %v304_v58 = vadd.f32 %v288_v53, %v175_v41  ;;  %v177_v51 = vmul.f32 %v161_v2, %v161_v2 }
 0x10b   :  { %v290_v52 = vmul.f32 %v274_v44, %v274_v44 }
 0x10c   :  { %698 = vperm.xlu1 %4765, %v5240_v39   ;;  %693 = vperm.xlu2 %4766, %v5242_v40  }
 0x10e   :  { %v352_v54 = vpop.permute.xlu1 %351 }
 0x10f   :  { %v385_v55 = vsub.f32 %v352_v54, %v5028_v47 }
 0x111   :  { %v401_v60 = vmul.f32 %v385_v55, %v385_v55  ;;  %v364_v0 = vpop.permute.xlu2 %363  ;;  %v372_v55 = vpop.permute.xlu0 %371 }
 0x112   :  { %v388_v34 = vsub.f32 %v364_v0, %v5028_v47 }
 0x113   :  { %v417_v35 = vadd.f32 %v401_v60, %v304_v58  ;;  %v306_v60 = vadd.f32 %v290_v52, %v177_v51 }
 0x114   :  { %v404_v13 = vmul.f32 %v388_v34, %v388_v34 }
 0x115   :  { %vm516_vm8 = vcmp.lt.f32.partialorder %v417_v35, 0.122499995 }
 0x116   :  { %vm5251_vm2 = vmand %vm500_vm4, %vm516_vm8 }
 0x117   :  { %v469_v8 = vpop.permute.xlu1 %468 }
 0x118   :  { %vm501_vm9 = vcmp.eq.f32.partialorder %v469_v8, %v5053_v4 }
 0x119   :  { %vm5255_vm0 = vmand %vm501_vm9, %vm517_vm10  ;;  %v5292_v6 = vpop.permute.xlu0 %758 }
 0x11a   :  { %vm4171_vm6 = vmpackc.low %vm5255_vm0, %vm5251_vm2  ;;  %v477_v16 = vpop.permute.xlu2 %476 }
 0x11b   :  { %4172 = vmatmul.msk.bf16.gmra.mxu0 %vm4171_vm6, %v4804_v27  ;;  %vm503_vm6 = vcmp.eq.f32.partialorder %v477_v16, %v5053_v4 }
 0x120   :  { %v136_v19 = vpop.permute.xlu1 %135 }
 0x121   :  { %v162_v21 = vsub.f32 %v136_v19, %v5016_v43  ;;  %v5266_v24 = vpop.f32.mrf.mxu0  ;;  %v163_v19 = vsub.f32 %v141_v20, %v5016_v43  ;;  %v5304_v34 = vpop.permute.xlu0 %733 }
 0x122   :  { %819 = vrot.lane.b32.xlu0 %v5266_v24, %s4805_s0 }
 0x123   :  { %v255_v32 = vpop.permute.xlu2 %254  ;;  %v178_v38 = vmul.f32 %v162_v21, %v162_v21  ;;  %v179_v2 = vmul.f32 %v163_v19, %v163_v19 }
 0x124   :  { %v276_v21 = vsub.f32 %v255_v32, %v5014_v42 }
 0x125   :  { %v307_v25 = vadd.f32 %v291_v33, %v178_v38 }
 0x126   :  { %v292_v44 = vmul.f32 %v276_v21, %v276_v21 }
 0x127   :  { %v420_v58 = vadd.f32 %v404_v13, %v307_v25  ;;  %v390_v25 = vsub.f32 %v372_v55, %v5028_v47 }
 0x129   :  { %v360_v53 = vpop.permute.xlu1 %359  ;;  %v5273_v54 = vpop.f32.mrf.mxu0  ;;  %vm519_vm4 = vcmp.lt.f32.partialorder %v420_v58, 0.122499995 }
 0x12a   :  { %v387_v41 = vsub.f32 %v360_v53, %v5028_v47  ;;  %821 = vrot.lane.b32.xlu1 %v5273_v54, %s4805_s0  ;;  %vm5284_vm10 = vmand %vm503_vm6, %vm519_vm4  ;;  %v308_v53 = vadd.f32 %v292_v44, %v179_v2 }
 0x12c   :  { %v403_v56 = vmul.f32 %v387_v41, %v387_v41  ;;  %v368_v57 = vpop.permute.xlu2 %367 }
 0x12d   :  { %v389_v13 = vsub.f32 %v368_v57, %v5028_v47 }
 0x12e   :  { %v419_v29 = vadd.f32 %v403_v56, %v306_v60  ;;  %v406_v56 = vmul.f32 %v390_v25, %v390_v25 }
 0x12f   :  { %v405_v32 = vmul.f32 %v389_v13, %v389_v13 }
 0x130   :  { %vm518_vm8 = vcmp.lt.f32.partialorder %v419_v29, 0.122499995  ;;  %v719_v29 = vpop.permute.xlu0 %718 }
 0x131   :  { %v5279_v1 = vpop.f32.mrf.mxu0  ;;  %v421_v47 = vadd.f32 %v405_v32, %v308_v53 }
 0x132   :  { %v473_v0 = vpop.permute.xlu1 %472  ;;  %823 = vrot.lane.b32.xlu2 %v5279_v1, %s4805_s0 }
 0x133   :  { %vm502_vm9 = vcmp.eq.f32.partialorder %v473_v0, %v5053_v4 }
 0x134   :  { %vm5288_vm3 = vmand %vm502_vm9, %vm518_vm8  ;;  %vm520_vm8 = vcmp.lt.f32.partialorder %v421_v47, 0.122499995 }
 0x135   :  { %v485_v8 = vpop.permute.xlu2 %484  ;;  %vm4173_vm13 = vmpackc.low %vm5284_vm10, %vm5288_vm3 }
 0x136   :  { %4174 = vmatmul.msk.bf16.gmra.mxu0 %vm4173_vm13, %v4804_v27  ;;  %vm505_vm13 = vcmp.eq.f32.partialorder %v485_v8, %v5053_v4 }
 0x139   :  { %v642_v16 = vpop.f32.mrf.mxu0 }
 0x13a   :  { %825 = vrot.lane.b32.xlu0 %v642_v16, %s4805_s0 }
 0x13b   :  { %v146_v17 = vpop.permute.xlu1 %145 }
 0x13c   :  { %v164_v51 = vsub.f32 %v146_v17, %v5016_v43 }
 0x13e   :  { %v5302_v33 = vpop.permute.xlu2 %763  ;;  %v180_v58 = vmul.f32 %v164_v51, %v164_v51 }
 0x141   :  { %v645_v38 = vpop.f32.mrf.mxu0 }
 0x142   :  { %827 = vrot.lane.b32.xlu1 %v645_v38, %s4805_s0 }
 0x144   :  { %v259_v52 = vpop.permute.xlu1 %258 }
 0x145   :  { %v277_v20 = vsub.f32 %v259_v52, %v5014_v42 }
 0x146   :  { %v5311_v41 = vpop.permute.xlu2 %748 }
 0x147   :  { %v293_v60 = vmul.f32 %v277_v20, %v277_v20 }
 0x149   :  { %v309_v0 = vadd.f32 %v293_v60, %v180_v58  ;;  %v647_v19 = vpop.f32.mrf.mxu0 }
 0x14a   :  { %v5313_v57 = vadd.f32 %v719_v29, %v647_v19  ;;  %829 = vrot.lane.b32.xlu2 %v647_v19, %s4805_s0 }
 0x14b   :  { %v422_v43 = vadd.f32 %v406_v56, %v309_v0  ;;  %v5352_v0 = vpop.permute.xlu0 %703 }
 0x14d   :  { %v481_v55 = vpop.permute.xlu1 %480  ;;  %vm521_vm6 = vcmp.lt.f32.partialorder %v422_v43, 0.122499995 }
 0x14e   :  { %vm504_vm4 = vcmp.eq.f32.partialorder %v481_v55, %v5053_v4  ;;  %v739_v42 = vpop.permute.xlu2 %738  ;;  %vm5318_vm9 = vmand %vm505_vm13, %vm521_vm6 }
 0x14f   :  { %vm5322_vm12 = vmand %vm504_vm4, %vm520_vm8 }
 0x150   :  { %vm4175_vm7 = vmpackc.low %vm5318_vm9, %vm5322_vm12 }
 0x151   :  { %4176 = vmatmul.msk.bf16.gmra.mxu0 %vm4175_vm7, %v4804_v27  ;;  %vm8560_vm7 = vcmask 7168  }
 0x152   :  { %vm8561_vm13 = vmmov %vm8560_vm7 }
 0x153   :  { %vm8562_vm6 = vmmov %vm8560_vm7 }
 0x154   :  { %vm8563_vm4 = vmmov %vm8562_vm6 }
 0x155   :  { %vm8564_vm8 = vmmov %vm8563_vm4 }
 0x156   :  { %v5331_v8 = vpop.permute.xlu1 %768  ;;  %v724_v4 = vpop.permute.xlu2 %723 }
 0x15e   :  { %v754_v2 = vpop.permute.xlu1 %753  ;;  %v709_v44 = vpop.permute.xlu2 %708 }
 0x15f   :  { %v5333_v13 = vadd.f32 %v709_v44, %v642_v16  ;;  %v650_v25 = vpop.f32.mrf.mxu0 }
 0x160   :  { %v5335_v51 = vadd.f32 %v724_v4, %v650_v25  ;;  %831 = vrot.lane.b32.xlu0 %v650_v25, %s4805_s0 }
 0x166   :  { %v744_v52 = vpop.permute.xlu1 %743  ;;  %v5347_v16 = vpop.permute.xlu2 %693 }
 0x167   :  { %v652_v20 = vpop.f32.mrf.mxu0 }
 0x168   :  { %833 = vrot.lane.b32.xlu1 %v652_v20, %s4805_s0 }
 0x16e   :  { %v729_v53 = vpop.permute.xlu1 %728 }
 0x16f   :  { %v5339_v32 = vadd.f32 %v729_v53, %v652_v20 }
 0x176   :  { %v714_v27 = vpop.permute.xlu1 %713 }
 0x177   :  { %v5341_v56 = vadd.f32 %v714_v27, %v645_v38 }
 0x17d   :  { %v5343_v58 = vpop.f32.mrf.mxu0 }
 0x17e   :  { %835 = vrot.lane.b32.xlu2 %v5343_v58, %s4805_s0  ;;  %v5356_v38 = vpop.permute.xlu1 %698 }
 0x185   :  { %v657_v60 = vpop.f32.mrf.mxu0 }
 0x186   :  { %v5349_v29 = vadd.f32 %v739_v42, %v657_v60  ;;  %837 = vrot.lane.b32.xlu0 %v657_v60, %s4805_s0 }
 0x18c   :  { %v824_v19 = vpop.permute.xlu2 %823 }
 0x18d   :  { %v869_v47 = vadd.f32 %v824_v19, %v5061_v10 }
 0x18f   :  { %886 = vst.msk [vmem:[#allocation3 + $0x10] sm:$0xff] %vm8560_vm7, %v869_v47  ;;  %vm8565_vm7 = vmmov %vm8563_vm4 }
 0x194   :  { %v820_v43 = vpop.permute.xlu0 %819 }
 0x195   :  { %v867_v55 = vadd.f32 %v820_v43, %v5242_v40 }
 0x197   :  { %884 = vst.msk [vmem:[#allocation3] sm:$0xff] %vm8561_vm13, %v867_v55 }
 0x198   :  { %v660_v4 = vpop.f32.mrf.mxu0 }
 0x199   :  { %v781_v44 = vadd.f32 %v744_v52, %v660_v4  ;;  %839 = vrot.lane.b32.xlu1 %v660_v4, %s4805_s0 }
 0x19c   :  { %v822_v42 = vpop.permute.xlu1 %821 }
 0x19d   :  { %v868_v25 = vadd.f32 %v822_v42, %v5240_v39 }
 0x19f   :  { %885 = vst.msk [vmem:[#allocation3 + $0x8] sm:$0xff] %vm8562_vm6, %v868_v25  ;;  %vm8566_vm6 = vmmov %vm8563_vm4 }
 0x1a0   :  { %v662_v20 = vpop.f32.mrf.mxu0 }
 0x1a1   :  { %841 = vrot.lane.b32.xlu2 %v662_v20, %s4805_s0  ;;  %v782_v42 = vadd.f32 %v5311_v41, %v662_v20 }
 0x1a3   :  { %v5399_v35 = vsel %vm5255_vm0, %v782_v42, 0.0  ;;  %vm8568_vm0 = vmmov %vm8566_vm6 }
 0x1a4   :  { %v830_v10 = vpop.permute.xlu2 %829 }
 0x1a5   :  { %v872_v53 = vadd.f32 %v830_v10, %v5043_v59  ;;  %v4806_v10 = vmov 1.0  }
 0x1a7   :  { %889 = vst.msk [vmem:[#allocation3 + $0x28] sm:$0xff] %vm8563_vm4, %v872_v53 }
 0x1ac   :  { %v826_v40 = vpop.permute.xlu0 %825 }
 0x1ad   :  { %v870_v27 = vadd.f32 %v826_v40, %v5233_v30 }
 0x1af   :  { %887 = vst.msk [vmem:[#allocation3 + $0x18] sm:$0xff] %vm8564_vm8, %v870_v27  ;;  %vm8567_vm8 = vmmov %vm8566_vm6 }
 0x1b3   :  { %v665_v52 = vpop.f32.mrf.mxu0 }
 0x1b4   :  { %843 = vrot.lane.b32.xlu0 %v665_v52, %s4805_s0  ;;  %v828_v60 = vpop.permute.xlu1 %827  ;;  %v783_v4 = vadd.f32 %v754_v2, %v665_v52 }
 0x1b5   :  { %v871_v39 = vadd.f32 %v828_v60, %v5231_v61 }
 0x1b7   :  { %888 = vst.msk [vmem:[#allocation3 + $0x20] sm:$0xff] %vm8565_vm7, %v871_v39  ;;  %v5456_v39 = vsel %vm5222_vm15, %v5349_v29, 0.0 }
 0x1b8   :  { %vm8428_vm15 = vcmp.eq.f32.partialorder %v5456_v39, 1.0 }
 0x1bb   :  { %v667_v19 = vpop.f32.mrf.mxu0 }
 0x1bc   :  { %845 = vrot.lane.b32.xlu1 %v667_v19, %s4805_s0  ;;  %v784_v30 = vadd.f32 %v5292_v6, %v667_v19  ;;  %v5389_v6 = vsel %vm5288_vm3, %v783_v4, 0.0 }
 0x1bd   :  { %vm8427_vm4 = vcmp.eq.f32.partialorder %v5389_v6, 1.0 }
 0x1be   :  { %v5384_v25 = vsel %vm5284_vm10, %v784_v30, 0.0  ;;  %v4189_v40 = vsel %vm8427_vm4, 1.0, %v4803_v36 }
 0x1bf   :  { %v5458_v19 = vsub.f32 %v4189_v40, %v4189_v40 }
 0x1c1   :  { %v1009_v26 = vand.u32 4294901760, %v5458_v19 }
 0x1ce   :  { %v670_v47 = vpop.f32.mrf.mxu0 }
 0x1cf   :  { %v785_v59 = vadd.f32 %v5302_v33, %v670_v47  ;;  %847 = vrot.lane.b32.xlu2 %v670_v47, %s4805_s0 }
 0x1d1   :  { %v5377_v43 = vsel %vm5322_vm12, %v785_v59, 0.0  ;;  %vm913_vm12 = vcmp.eq.f32.partialorder %v5384_v25, 1.0 }
 0x1d2   :  { %v832_v55 = vpop.permute.xlu0 %831  ;;  %vm914_vm13 = vcmp.eq.f32.partialorder %v5377_v43, 1.0  ;;  %v4190_v17 = vsel %vm913_vm12, 1.0, %v4803_v36  ;;  %vm1306_vm7 = vcmp.eq.f32.partialorder %v5377_v43, 2.0 }
 0x1d3   :  { %v873_v61 = vadd.f32 %v832_v55, %v5212_v23  ;;  %v4191_v23 = vsel %vm914_vm13, 1.0, %v4803_v36  ;;  %v5439_v52 = vsub.f32 %v4190_v17, %v4190_v17 }
 0x1d4   :  { %v5408_v20 = vsub.f32 %v4191_v23, %v4191_v23  ;;  %v1010_v23 = vsub.f32 %v5458_v19, %v1009_v26 }
 0x1d5   :  { %890 = vst.msk [vmem:[#allocation3 + $0x30] sm:$0xff] %vm8566_vm6, %v873_v61  ;;  %vm1305_vm6 = vcmp.eq.f32.partialorder %v5384_v25, 2.0  ;;  %v1003_v28 = vand.u32 4294901760, %v5439_v52  ;;  %v5501_v61 = vsel %vm5178_vm1, %v5339_v32, 0.0  ;;  %v5524_v32 = vsel %vm5174_vm14, %v5335_v51, 0.0 }
 0x1d6   :  { %v672_v33 = vpop.f32.mrf.mxu0  ;;  %v997_v9 = vand.u32 4294901760, %v5408_v20  ;;  %vm8432_vm1 = vcmp.eq.f32.partialorder %v5501_v61, 1.0  ;;  %v5547_v51 = vsel %vm5136_vm5, %v5313_v57, 0.0  ;;  %vm8434_vm14 = vcmp.eq.f32.partialorder %v5524_v32, 1.0 }
 0x1d7   :  { %v786_v21 = vadd.f32 %v5331_v8, %v672_v33  ;;  %849 = vrot.lane.b32.xlu0 %v672_v33, %s4805_s0  ;;  %v1004_v4 = vsub.f32 %v5439_v52, %v1003_v28  ;;  %v4186_v33 = vsel %vm8428_vm15, 1.0, %v4803_v36  ;;  %v4184_v17 = vsel %vm8432_vm1, 1.0, %v4803_v36 }
 0x1d8   :  { %v836_v41 = vpop.permute.xlu2 %835  ;;  %v5567_v57 = vsub.f32 %v4184_v17, %v4184_v17  ;;  %vm8435_vm5 = vcmp.eq.f32.partialorder %v5547_v51, 1.0 }
 0x1d9   :  { %v5403_v5 = vsel %vm5318_vm9, %v786_v21, 0.0  ;;  %v875_v2 = vadd.f32 %v836_v41, %v5030_v49  ;;  %vm8425_vm9 = vcmp.eq.f32.partialorder %v5399_v35, 1.0  ;;  %v1005_v21 = vand.u32 4294901760, %v1004_v4 }
 0x1da   :  { %v834_v8 = vpop.permute.xlu1 %833  ;;  %vm915_vm3 = vcmp.eq.f32.partialorder %v5403_v5, 1.0  ;;  %vm8440_vm10 = vcmp.eq.f32.partialorder %v5403_v5, 2.0  ;;  %v4188_v47 = vsel %vm8425_vm9, 1.0, %v4803_v36  ;;  %v5526_v41 = vsub.f32 %v4186_v33, %v4186_v33 }
 0x1db   :  { %892 = vst.msk [vmem:[#allocation3 + $0x40] sm:$0xff] %vm8567_vm8, %v875_v2  ;;  %v874_v12 = vadd.f32 %v834_v8, %v5210_v22  ;;  %4193 = vmatpush.xpose.msk.msra.mxu1 %vm915_vm3, %v4806_v10  ;;  %4257 = vmatpush.xpose.msk.msrb.mxu0 %vm8440_vm10, %v4806_v10  ;;  %v4192_v49 = vsel %vm915_vm3, 1.0, %v4803_v36  ;;  %v5429_v22 = vsel %vm5251_vm2, %v781_v44, 0.0  ;;  %v779_v44 = vadd.f32 %v5304_v34, %v5343_v58 }
 0x1dc   :  { %v5425_v53 = vsub.f32 %v4192_v49, %v4192_v49  ;;  %vm8426_vm2 = vcmp.eq.f32.partialorder %v5429_v22, 1.0  ;;  %v998_v58 = vsub.f32 %v5408_v20, %v997_v9  ;;  %v5480_v59 = vsub.f32 %v4188_v47, %v4188_v47 }
 0x1dd   :  { %891 = vst.msk [vmem:[#allocation3 + $0x38] sm:$0xff] %vm8568_vm0, %v874_v12  ;;  %v5478_v29 = vsel %vm5218_vm11, %v779_v44, 0.0  ;;  %v4187_v30 = vsel %vm8426_vm2, 1.0, %v4803_v36  ;;  %vm1304_vm8 = vcmp.eq.f32.partialorder %v5389_v6, 2.0  ;;  %vm1303_vm0 = vcmp.eq.f32.partialorder %v5399_v35, 2.0 }
 0x1de   :  { %1092 = vmatpush.xpose.msra.mxu3 %v5425_v53  ;;  %v991_v27 = vand.u32 4294901760, %v5425_v53  ;;  %v999_v55 = vand.u32 4294901760, %v998_v58  ;;  %v5503_v42 = vsub.f32 %v4187_v30, %v4187_v30  ;;  %vm8429_vm11 = vcmp.eq.f32.partialorder %v5478_v29, 1.0 }
 0x1df   :  { %4194 = vmatpush.xpose.msk.msra.mxu1 %vm914_vm13, %v4806_v10  ;;  %4258 = vmatpush.xpose.msk.msrb.mxu0 %vm1306_vm7, %v4806_v10  ;;  %v1015_v7 = vand.u32 4294901760, %v5480_v59  ;;  %v4185_v2 = vsel %vm8429_vm11, 1.0, %v4803_v36  ;;  %v1011_v8 = vand.u32 4294901760, %v1010_v23  ;;  %v1027_v11 = vand.u32 4294901760, %v5526_v41 }
 0x1e0   :  { %v992_v60 = vsub.f32 %v5425_v53, %v991_v27  ;;  %v1021_v45 = vand.u32 4294901760, %v5503_v42  ;;  %v5549_v49 = vsub.f32 %v4185_v2, %v4185_v2  ;;  %v773_v30 = vadd.f32 %v5352_v0, %v5279_v1 }
 0x1e1   :  { %v1016_v12 = vsub.f32 %v5480_v59, %v1015_v7  ;;  %v4182_v23 = vsel %vm8435_vm5, 1.0, %v4803_v36 }
 0x1e2   :  { %1095 = vmatpush.xpose.msra.mxu3 %v5408_v20  ;;  %v993_v34 = vand.u32 4294901760, %v992_v60  ;;  %v1022_v44 = vsub.f32 %v5503_v42, %v1021_v45  ;;  %v4183_v60 = vsel %vm8434_vm14, 1.0, %v4803_v36  ;;  %v1033_v58 = vand.u32 4294901760, %v5549_v49 }
 0x1e3   :  { %4195 = vmatpush.xpose.msk.msra.mxu1 %vm913_vm12, %v4806_v10  ;;  %4259 = vmatpush.xpose.msk.msrb.mxu0 %vm1305_vm6, %v4806_v10  ;;  %v1017_v40 = vand.u32 4294901760, %v1016_v12  ;;  %v5622_v12 = vsub.f32 %v4182_v23, %v4182_v23 }
 0x1e4   :  { %994 = vmatpush.xpose.msra.mxu2 %v993_v34  ;;  %v1023_v47 = vand.u32 4294901760, %v1022_v44  ;;  %v1028_v34 = vsub.f32 %v5526_v41, %v1027_v11  ;;  %v1034_v0 = vsub.f32 %v5549_v49, %v1033_v58 }
 0x1e6   :  { %1098 = vmatpush.xpose.msra.mxu3 %v5439_v52  ;;  %v1029_v1 = vand.u32 4294901760, %v1028_v34 }
 0x1e7   :  { %4196 = vmatpush.xpose.msk.msra.mxu1 %vm8427_vm4, %v4806_v10  ;;  %4260 = vmatpush.xpose.msk.msrb.mxu0 %vm1304_vm8, %v4806_v10  ;;  %vm8430_vm4 = vcmp.eq.f32.partialorder %v5478_v29, 2.0 }
 0x1e8   :  { %1000 = vmatpush.xpose.msra.mxu2 %v999_v55 }
 0x1ea   :  { %1101 = vmatpush.xpose.msra.mxu3 %v5458_v19 }
 0x1eb   :  { %4197 = vmatpush.xpose.msk.msra.mxu1 %vm8425_vm9, %v4806_v10  ;;  %4261 = vmatpush.xpose.msk.msrb.mxu0 %vm1303_vm0, %v4806_v10  ;;  %vm8446_vm9 = vcmp.eq.f32.partialorder %v5429_v22, 2.0 }
 0x1ec   :  { %1006 = vmatpush.xpose.msra.mxu2 %v1005_v21  ;;  %v5593_v21 = vsub.f32 %v4183_v60, %v4183_v60 }
 0x1ee   :  { %1104 = vmatpush.xpose.msra.mxu3 %v5480_v59  ;;  %v1045_v17 = vand.u32 4294901760, %v5593_v21 }
 0x1ef   :  { %4198 = vmatpush.xpose.msk.msra.mxu1 %vm8426_vm2, %v4806_v10  ;;  %4262 = vmatpush.xpose.msk.msrb.mxu0 %vm8446_vm9, %v4806_v10  ;;  %vm8431_vm2 = vcmp.eq.f32.partialorder %v5456_v39, 2.0 }
 0x1f0   :  { %1012 = vmatpush.xpose.msra.mxu2 %v1011_v8  ;;  %v1046_v60 = vsub.f32 %v5593_v21, %v1045_v17 }
 0x1f2   :  { %1107 = vmatpush.xpose.msra.mxu3 %v5503_v42 }
 0x1f3   :  { %4199 = vmatpush.xpose.msk.msra.mxu1 %vm8428_vm15, %v4806_v10  ;;  %4263 = vmatpush.xpose.msk.msrb.mxu0 %vm8431_vm2, %v4806_v10  ;;  %vm8569_vm15 = vnez %v8539_v14  ;;  %v1039_v14 = vand.u32 4294901760, %v5567_v57  ;;  %vm8571_vm2 = vnez %v8533_v48 }
 0x1f4   :  { %1018 = vmatpush.xpose.msra.mxu2 %v1017_v40  ;;  %v5590_v4 = vsel %vm8569_vm15, %v5341_v56, 0.0  ;;  %vm8570_vm15 = vcmask 7168   ;;  %v5615_v2 = vsel %vm8571_vm2, %v773_v30, 0.0  ;;  %v1051_v40 = vand.u32 4294901760, %v5622_v12 }
 0x1f5   :  { %v1040_v48 = vsub.f32 %v5567_v57, %v1039_v14 }
 0x1f6   :  { %1110 = vmatpush.xpose.msra.mxu3 %v5526_v41  ;;  %v1052_v30 = vsub.f32 %v5622_v12, %v1051_v40 }
 0x1f7   :  { %4200 = vmatpush.xpose.msk.msra.mxu1 %vm8429_vm11, %v4806_v10  ;;  %4264 = vmatpush.xpose.msk.msrb.mxu0 %vm8430_vm4, %v4806_v10  ;;  %vm8433_vm11 = vcmp.eq.f32.partialorder %v5501_v61, 2.0  ;;  %vm8438_vm4 = vcmp.eq.f32.partialorder %v5590_v4, 1.0  ;;  %v1041_v44 = vand.u32 4294901760, %v1040_v48 }
 0x1f8   :  { %1024 = vmatpush.xpose.msra.mxu2 %v1023_v47  ;;  %v838_v55 = vpop.permute.xlu0 %837 }
 0x1f9   :  { %v876_v33 = vadd.f32 %v838_v55, %v5205_v63 }
 0x1fa   :  { %1113 = vmatpush.xpose.msra.mxu3 %v5549_v49 }
 0x1fb   :  { %893 = vst.msk [vmem:[#allocation3 + $0x48] sm:$0xff] %vm8570_vm15, %v876_v33  ;;  %4201 = vmatpush.xpose.msk.msra.mxu1 %vm8432_vm1, %v4806_v10  ;;  %4265 = vmatpush.xpose.msk.msrb.mxu0 %vm8433_vm11, %v4806_v10  ;;  %v842_v63 = vpop.permute.xlu2 %841  ;;  %vm8572_vm15 = vnez %v8535_v37  ;;  %vm8573_vm1 = vcmask 7168   ;;  %vm8437_vm11 = vcmp.eq.f32.partialorder %v5524_v32, 2.0  ;;  %v4181_v37 = vsel %vm8438_vm4, 1.0, %v4803_v36 }
 0x1fc   :  { %v878_v56 = vadd.f32 %v842_v63, %v5194_v50  ;;  %1030 = vmatpush.xpose.msra.mxu2 %v1029_v1  ;;  %v5620_v8 = vsel %vm8572_vm15, %v5333_v13, 0.0  ;;  %v1035_v50 = vand.u32 4294901760, %v1034_v0  ;;  %v772_v13 = vadd.f32 %v5356_v38, %v5273_v54 }
 0x1fd   :  { %vm8439_vm2 = vcmp.eq.f32.partialorder %v5620_v8, 1.0  ;;  %vm8436_vm15 = vcmp.eq.f32.partialorder %v5547_v51, 2.0  ;;  %v5650_v47 = vsub.f32 %v4181_v37, %v4181_v37  ;;  %v771_v38 = vadd.f32 %v5347_v16, %v5266_v24 }
 0x1fe   :  { %895 = vst.msk [vmem:[#allocation3 + $0x58] sm:$0xff] %vm8573_vm1, %v878_v56  ;;  %1116 = vmatpush.xpose.msra.mxu3 %v5567_v57  ;;  %vm902_vm1 = vcmp.eq.f32.partialorder %v5615_v2, 1.0  ;;  %v4180_v54 = vsel %vm8439_vm2, 1.0, %v4803_v36  ;;  %v1047_v33 = vand.u32 4294901760, %v1046_v60  ;;  %v1053_v1 = vand.u32 4294901760, %v1052_v30 }
 0x1ff   :  { %4202 = vmatpush.xpose.msk.msra.mxu1 %vm8434_vm14, %v4806_v10  ;;  %4266 = vmatpush.xpose.msk.msrb.mxu0 %vm8437_vm11, %v4806_v10  ;;  %vm8574_vm14 = vnez %v8529_v15  ;;  %v4179_v55 = vsel %vm902_vm1, 1.0, %v4803_v36  ;;  %v5675_v23 = vsub.f32 %v4180_v54, %v4180_v54  ;;  %v1057_v24 = vand.u32 4294901760, %v5650_v47 }
 0x200   :  { %1036 = vmatpush.xpose.msra.mxu2 %v1035_v50  ;;  %v5665_v34 = vsel %vm8574_vm14, %v772_v13, 0.0  ;;  %v5689_v16 = vsub.f32 %v4179_v55, %v4179_v55  ;;  %vm1295_vm11 = vcmp.eq.f32.partialorder %v5620_v8, 2.0  ;;  %v4256_v60 = vsel %vm8440_vm10, 1.0, %v4803_v36 }
 0x201   :  { %vm901_vm14 = vcmp.eq.f32.partialorder %v5665_v34, 1.0  ;;  %v1058_v0 = vsub.f32 %v5650_v47, %v1057_v24  ;;  %v1063_v63 = vand.u32 4294901760, %v5675_v23 }
 0x202   :  { %1119 = vmatpush.xpose.msra.mxu3 %v5593_v21  ;;  %v4178_v56 = vsel %vm901_vm14, 1.0, %v4803_v36  ;;  %v1069_v48 = vand.u32 4294901760, %v5689_v16 }
 0x203   :  { %4203 = vmatpush.xpose.msk.msra.mxu1 %vm8435_vm5, %v4806_v10  ;;  %4267 = vmatpush.xpose.msk.msrb.mxu0 %vm8436_vm15, %v4806_v10  ;;  %vm1296_vm5 = vcmp.eq.f32.partialorder %v5590_v4, 2.0  ;;  %vm8575_vm15 = vnez %v8531_v18  ;;  %v1059_v37 = vand.u32 4294901760, %v1058_v0  ;;  %v1064_v13 = vsub.f32 %v5675_v23, %v1063_v63 }
 0x204   :  { %1042 = vmatpush.xpose.msra.mxu2 %v1041_v44  ;;  %v5687_v15 = vsel %vm8575_vm15, %v771_v38, 0.0  ;;  %v5715_v44 = vsub.f32 %v4178_v56, %v4178_v56  ;;  %v1070_v54 = vsub.f32 %v5689_v16, %v1069_v48 }
 0x205   :  { %vm900_vm15 = vcmp.eq.f32.partialorder %v5687_v15, 1.0  ;;  %v1065_v38 = vand.u32 4294901760, %v1064_v13  ;;  %vm1292_vm10 = vcmp.eq.f32.partialorder %v5687_v15, 2.0  ;;  %v4254_v13 = vsel %vm1305_vm6, 1.0, %v4803_v36 }
 0x206   :  { %1122 = vmatpush.xpose.msra.mxu3 %v5622_v12  ;;  %v8444_v55 = vand.u32 4294901760, %v5715_v44  ;;  %v1071_v0 = vand.u32 4294901760, %v1070_v54  ;;  %v5775_v54 = vsub.f32 %v4254_v13, %v4254_v13 }
 0x207   :  { %4204 = vmatpush.xpose.msk.msra.mxu1 %vm8438_vm4, %v4806_v10  ;;  %4268 = vmatpush.xpose.msk.msrb.mxu0 %vm1296_vm5, %v4806_v10  ;;  %vm8576_vm4 = vcmask 7168  }
 0x208   :  { %1048 = vmatpush.xpose.msra.mxu2 %v1047_v33  ;;  %v5737_v33 = vsub.f32 %v4256_v60, %v4256_v60  ;;  %v8445_v13 = vand.u32 4294901760, %v5775_v54 }
 0x20a   :  { %1125 = vmatpush.xpose.msra.mxu3 %v5650_v47 }
 0x20b   :  { %4205 = vmatpush.xpose.msk.msra.mxu1 %vm8439_vm2, %v4806_v10  ;;  %4269 = vmatpush.xpose.msk.msrb.mxu0 %vm1295_vm11, %v4806_v10  ;;  %v840_v18 = vpop.permute.xlu1 %839  ;;  %vm1294_vm2 = vcmp.eq.f32.partialorder %v5615_v2, 2.0 }
 0x20c   :  { %v877_v50 = vadd.f32 %v840_v18, %v5203_v62  ;;  %1054 = vmatpush.xpose.msra.mxu2 %v1053_v1  ;;  %v4177_v62 = vsel %vm900_vm15, 1.0, %v4803_v36  ;;  %v4255_v1 = vsel %vm1306_vm7, 1.0, %v4803_v36  ;;  %v1076_v18 = vsub.f32 %v5715_v44, %v8444_v55 }
 0x20d   :  { %v5734_v30 = vsub.f32 %v4177_v62, %v4177_v62 }
 0x20e   :  { %894 = vst.msk [vmem:[#allocation3 + $0x50] sm:$0xff] %vm8576_vm4, %v877_v50  ;;  %1128 = vmatpush.xpose.msra.mxu3 %v5675_v23  ;;  %vm1293_vm4 = vcmp.eq.f32.partialorder %v5665_v34, 2.0  ;;  %v5754_v50 = vsub.f32 %v4255_v1, %v4255_v1  ;;  %v1077_v62 = vand.u32 4294901760, %v1076_v18  ;;  %v4253_v1 = vsel %vm1304_vm8, 1.0, %v4803_v36 }
 0x20f   :  { %4206 = vmatpush.xpose.msk.msra.mxu1 %vm902_vm1, %v4806_v10  ;;  %4270 = vmatpush.xpose.msk.msrb.mxu0 %vm1294_vm2, %v4806_v10  ;;  %v8443_v56 = vand.u32 4294901760, %v5734_v30  ;;  %v5789_v18 = vsub.f32 %v4253_v1, %v4253_v1 }
 0x210   :  { %1060 = vmatpush.xpose.msra.mxu2 %v1059_v37  ;;  %v1383_v37 = vand.u32 4294901760, %v5737_v33 }
 0x211   :  { %v1082_v60 = vsub.f32 %v5734_v30, %v8443_v56  ;;  %v4251_v56 = vsel %vm8446_vm9, 1.0, %v4803_v36  ;;  %vm8581_vm9 = vcmask 7168  }
 0x212   :  { %1131 = vmatpush.xpose.msra.mxu3 %v5689_v16 }
 0x213   :  { %4207 = vmatpush.xpose.msk.msra.mxu1 %vm901_vm14, %v4806_v10  ;;  %4271 = vmatpush.xpose.msk.msrb.mxu0 %vm1293_vm4, %v4806_v10 }
 0x214   :  { %1066 = vmatpush.xpose.msra.mxu2 %v1065_v38  ;;  %v1389_v38 = vand.u32 4294901760, %v5754_v50 }
 0x216   :  { %1134 = vmatpush.xpose.msra.mxu3 %v5715_v44  ;;  %v1390_v23 = vsub.f32 %v5754_v50, %v1389_v38 }
 0x217   :  { %4208 = vmatpush.xpose.msk.msra.mxu1 %vm900_vm15, %v4806_v10  ;;  %4272 = vmatpush.xpose.msk.msrb.mxu0 %vm1292_vm10, %v4806_v10 }
 0x218   :  { %1072 = vmatpush.xpose.msra.mxu2 %v1071_v0  ;;  %v1083_v0 = vand.u32 4294901760, %v1082_v60  ;;  %v4769_v60 = vld [vmem:[%s8416_s3] sm:$0xff]  ;;  %v1391_v16 = vand.u32 4294901760, %v1390_v23 }
 0x219   :  { %v5804_v1 = vand.u32 4294901760, %v4769_v60 }
 0x21a   :  { %1137 = vmatpush.xpose.msra.mxu3 %v5734_v30 }
 0x21b   :  { %4209 = vmatpush.xpose.msk.msrb.mxu1 %vm915_vm3, %v4806_v10  ;;  %1578 = vmatpush.xpose.msra.mxu0 %v1383_v37 }
 0x21c   :  { %1078 = vmatpush.xpose.msra.mxu2 %v1077_v62  ;;  %v4252_v62 = vsel %vm1303_vm0, 1.0, %v4803_v36 }
 0x21d   :  { %v5810_v3 = vsub.f32 %v4252_v62, %v4252_v62 }
 0x21e   :  { %4225 = vmatpush.xpose.msk.msrb.mxu3 %vm915_vm3, %v4806_v10  ;;  %vm8579_vm3 = vcmp.eq.f32.partialorder %v5456_v39, 2.0 }
 0x21f   :  { %4210 = vmatpush.xpose.msk.msrb.mxu1 %vm914_vm13, %v4806_v10  ;;  %1582 = vmatpush.xpose.msra.mxu0 %v1389_v38  ;;  %v1407_v55 = vand.u32 4294901760, %v5810_v3  ;;  %v8607_v38 = vand.u32 4294901760, %v5775_v54 }
 0x220   :  { %1084 = vmatpush.xpose.msra.mxu2 %v1083_v0  ;;  %v1401_v0 = vand.u32 4294901760, %v5789_v18 }
 0x222   :  { %4226 = vmatpush.xpose.msk.msrb.mxu3 %vm914_vm13, %v4806_v10  ;;  %vm8577_vm13 = vcmp.eq.f32.partialorder %v5389_v6, 1.0 }
 0x223   :  { %4211 = vmatpush.xpose.msk.msrb.mxu1 %vm913_vm12, %v4806_v10  ;;  %1586 = vmatpush.xpose.msra.mxu0 %v8445_v13  ;;  %v4250_v13 = vsel %vm8579_vm3, 1.0, %v4803_v36  ;;  %vm8584_vm3 = vcmask 7168  }
 0x224   :  { %1186 = vmatpush.xpose.msrb.mxu2 %v991_v27  ;;  %v5827_v27 = vsub.f32 %v4251_v56, %v4251_v56  ;;  %v5849_v56 = vsub.f32 %v4250_v13, %v4250_v13 }
 0x225   :  { %1086 = vmatmul.f32.vlgmr.msra.gmra.mxu2 %v5804_v1 }
 0x226   :  { %4227 = vmatpush.xpose.msk.msrb.mxu3 %vm913_vm12, %v4806_v10  ;;  %v844_v53 = vpop.permute.xlu0 %843  ;;  %vm8578_vm12 = vmmov %vm8577_vm13 }
 0x227   :  { %4212 = vmatpush.xpose.msk.msrb.mxu1 %vm8577_vm13, %v4806_v10  ;;  %1590 = vmatpush.xpose.msra.mxu0 %v1401_v0  ;;  %v879_v62 = vadd.f32 %v844_v53, %v5192_v46  ;;  %vm8580_vm13 = vcmp.eq.f32.partialorder %v5399_v35, 1.0  ;;  %v8447_v53 = vand.u32 4294901760, %v5827_v27 }
 0x228   :  { %1190 = vmatpush.xpose.msrb.mxu2 %v997_v9  ;;  %v5847_v9 = vsub.f32 %v4769_v60, %v5804_v1  ;;  %v4770_v60 = vld [vmem:[#allocation3 + $0x68] sm:$0xff] }
 0x229   :  { %896 = vst.msk [vmem:[#allocation3 + $0x60] sm:$0xff] %vm8581_vm9, %v879_v62  ;;  %v848_v46 = vpop.permute.xlu2 %847  ;;  %vm8583_vm9 = vcmp.eq.f32.partialorder %v5478_v29, 2.0 }
 0x22a   :  { %4228 = vmatpush.xpose.msk.msrb.mxu3 %vm8578_vm12, %v4806_v10  ;;  %v881_v20 = vadd.f32 %v848_v46, %v5186_v31  ;;  %vm8582_vm12 = vmmov %vm8580_vm13  ;;  %v4249_v62 = vsel %vm8583_vm9, 1.0, %v4803_v36  ;;  %v5863_v31 = vand.u32 4294901760, %v5847_v9  ;;  %vm8587_vm9 = vcmp.eq.f32.partialorder %v5501_v61, 2.0 }
 0x22b   :  { %4213 = vmatpush.xpose.msk.msrb.mxu1 %vm8580_vm13, %v4806_v10  ;;  %1594 = vmatpush.xpose.msra.mxu0 %v1407_v55  ;;  %vm8585_vm13 = vcmp.eq.f32.partialorder %v5429_v22, 1.0  ;;  %v5872_v13 = vsub.f32 %v4249_v62, %v4249_v62 }
 0x22c   :  { %1194 = vmatpush.xpose.msrb.mxu2 %v1003_v28  ;;  %898 = vst.msk [vmem:[#allocation3 + $0x70] sm:$0xff] %vm8584_vm3, %v881_v20  ;;  %1140 = vmatmul.f32.vlgmr.msra.gmra.mxu3 %v5847_v9  ;;  %v983_v28 = vsub.f32 %v5847_v9, %v5863_v31  ;;  %v1419_v20 = vand.u32 4294901760, %v5849_v56  ;;  %vm8588_vm3 = vcmp.eq.f32.partialorder %v5456_v39, 1.0 }
 0x22d   :  { %v1425_v62 = vand.u32 4294901760, %v5872_v13 }
 0x22e   :  { %4229 = vmatpush.xpose.msk.msrb.mxu3 %vm8582_vm12, %v4806_v10  ;;  %v846_v52 = vpop.permute.xlu1 %845  ;;  %vm8586_vm12 = vmmov %vm8585_vm13  ;;  %v5884_v19 = vand.u32 4294901760, %v983_v28  ;;  %v4245_v28 = vsel %vm1296_vm5, 1.0, %v4803_v36 }
 0x22f   :  { %4214 = vmatpush.xpose.msk.msrb.mxu1 %vm8585_vm13, %v4806_v10  ;;  %1598 = vmatpush.xpose.msra.mxu0 %v8447_v53  ;;  %v880_v46 = vadd.f32 %v4770_v60, %v846_v52  ;;  %v4248_v53 = vsel %vm8587_vm9, 1.0, %v4803_v36  ;;  %vm8589_vm13 = vcmask 7168   ;;  %vm8591_vm9 = vcmp.eq.f32.partialorder %v5524_v32, 2.0 }
 0x230   :  { %1198 = vmatpush.xpose.msrb.mxu2 %v1009_v26  ;;  %985 = vmatmul.f32.vlgmr.msra.gmra.mxu1 %v5884_v19  ;;  %v5893_v26 = vsub.f32 %v4248_v53, %v4248_v53  ;;  %v4247_v52 = vsel %vm8591_vm9, 1.0, %v4803_v36  ;;  %vm8595_vm9 = vcmp.eq.f32.partialorder %v5501_v61, 1.0  ;;  %v5941_v41 = vsub.f32 %v4245_v28, %v4245_v28 }
 0x231   :  { %897 = vst.msk [vmem:[#allocation3 + $0x68] sm:$0xff] %vm8589_vm13, %v880_v46  ;;  %1377 = vmatmul.f32.vlgmr.msrb.gmra.mxu0 %v5884_v19  ;;  %v5909_v59 = vsub.f32 %v4247_v52, %v4247_v52  ;;  %v4244_v60 = vsel %vm1295_vm11, 1.0, %v4803_v36  ;;  %v4243_v46 = vsel %vm1294_vm2, 1.0, %v4803_v36  ;;  %v4242_v52 = vsel %vm1293_vm4, 1.0, %v4803_v36 }
 0x232   :  { %4230 = vmatpush.xpose.msk.msrb.mxu3 %vm8586_vm12, %v4806_v10  ;;  %vm8590_vm12 = vmmov %vm8588_vm3  ;;  %v5957_v49 = vsub.f32 %v4244_v60, %v4244_v60  ;;  %v5973_v57 = vsub.f32 %v4243_v46, %v4243_v46  ;;  %v5989_v28 = vsub.f32 %v4242_v52, %v4242_v52  ;;  %v4241_v46 = vsel %vm1292_vm10, 1.0, %v4803_v36 }
 0x233   :  { %4215 = vmatpush.xpose.msk.msrb.mxu1 %vm8588_vm3, %v4806_v10  ;;  %1602 = vmatpush.xpose.msra.mxu0 %v1419_v20  ;;  %vm8592_vm3 = vcmp.eq.f32.partialorder %v5478_v29, 1.0  ;;  %v6007_v12 = vsub.f32 %v4241_v46, %v4241_v46  ;;  %v1384_v52 = vsub.f32 %v5737_v33, %v1383_v37 }
 0x234   :  { %1202 = vmatpush.xpose.msrb.mxu2 %v1015_v7  ;;  %vm8593_vm13 = vmmov %vm8592_vm3  ;;  %v1431_v7 = vand.u32 4294901760, %v5893_v26  ;;  %v1461_v60 = vand.u32 4294901760, %v5973_v57 }
 0x235   :  { %v1385_v37 = vand.u32 4294901760, %v1384_v52 }
 0x236   :  { %4231 = vmatpush.xpose.msk.msrb.mxu3 %vm8590_vm12, %v4806_v10  ;;  %vm8594_vm12 = vcmp.eq.f32.partialorder %v5547_v51, 2.0 }
 0x237   :  { %4216 = vmatpush.xpose.msk.msrb.mxu1 %vm8592_vm3, %v4806_v10  ;;  %1606 = vmatpush.xpose.msra.mxu0 %v1425_v62  ;;  %v4246_v53 = vsel %vm8594_vm12, 1.0, %v4803_v36  ;;  %vm8596_vm3 = vmmov %vm8595_vm9 }
 0x238   :  { %1206 = vmatpush.xpose.msrb.mxu2 %v1021_v45  ;;  %v5925_v42 = vsub.f32 %v4246_v53, %v4246_v53  ;;  %v1437_v45 = vand.u32 4294901760, %v5909_v59 }
 0x23a   :  { %4232 = vmatpush.xpose.msk.msrb.mxu3 %vm8593_vm13, %v4806_v10  ;;  %vm8597_vm13 = vcmp.eq.f32.partialorder %v5524_v32, 1.0 }
 0x23b   :  { %4217 = vmatpush.xpose.msk.msrb.mxu1 %vm8595_vm9, %v4806_v10  ;;  %1610 = vmatpush.xpose.msra.mxu0 %v1431_v7  ;;  %vm8598_vm12 = vmmov %vm8597_vm13  ;;  %vm8599_vm9 = vcmp.eq.f32.partialorder %v5547_v51, 1.0 }
 0x23c   :  { %1210 = vmatpush.xpose.msrb.mxu2 %v1027_v11  ;;  %v1443_v11 = vand.u32 4294901760, %v5925_v42 }
 0x23e   :  { %4233 = vmatpush.xpose.msk.msrb.mxu3 %vm8596_vm3, %v4806_v10  ;;  %vm8600_vm3 = vmmov %vm8599_vm9 }
 0x23f   :  { %4218 = vmatpush.xpose.msk.msrb.mxu1 %vm8597_vm13, %v4806_v10  ;;  %1614 = vmatpush.xpose.msra.mxu0 %v1437_v45  ;;  %vm8601_vm13 = vcmp.eq.f32.partialorder %v5590_v4, 1.0 }
 0x240   :  { %1214 = vmatpush.xpose.msrb.mxu2 %v1033_v58  ;;  %v1449_v58 = vand.u32 4294901760, %v5941_v41 }
 0x242   :  { %4234 = vmatpush.xpose.msk.msrb.mxu3 %vm8598_vm12, %v4806_v10  ;;  %vm8602_vm12 = vmmov %vm8601_vm13 }
 0x243   :  { %4219 = vmatpush.xpose.msk.msrb.mxu1 %vm8599_vm9, %v4806_v10  ;;  %1618 = vmatpush.xpose.msra.mxu0 %v1443_v11  ;;  %vm8603_vm9 = vcmp.eq.f32.partialorder %v5620_v8, 1.0 }
 0x244   :  { %1218 = vmatpush.xpose.msrb.mxu2 %v1039_v14  ;;  %v1455_v14 = vand.u32 4294901760, %v5957_v49 }
 0x246   :  { %4235 = vmatpush.xpose.msk.msrb.mxu3 %vm8600_vm3, %v4806_v10  ;;  %vm8604_vm3 = vmmov %vm8603_vm9 }
 0x247   :  { %4220 = vmatpush.xpose.msk.msrb.mxu1 %vm8601_vm13, %v4806_v10  ;;  %1622 = vmatpush.xpose.msra.mxu0 %v1449_v58  ;;  %vm8605_vm13 = vcmask 7168  }
 0x248   :  { %1222 = vmatpush.xpose.msrb.mxu2 %v1045_v17  ;;  %v4771_v17 = vld [vmem:[#allocation3 + $0x78] sm:$0xff] }
 0x249   :  { %v850_v21 = vpop.permute.xlu0 %849 }
 0x24a   :  { %4236 = vmatpush.xpose.msk.msrb.mxu3 %vm8602_vm12, %v4806_v10  ;;  %v882_v53 = vadd.f32 %v4771_v17, %v850_v21  ;;  %vm1699_vm12 = vcmp.eq.f32.partialorder %v5403_v5, 3.0  ;;  %v1396_v17 = vsub.f32 %v5775_v54, %v8607_v38 }
 0x24b   :  { %4221 = vmatpush.xpose.msk.msrb.mxu1 %vm8603_vm9, %v4806_v10  ;;  %1626 = vmatpush.xpose.msra.mxu0 %v1455_v14  ;;  %v4320_v47 = vsel %vm1699_vm12, 1.0, %v4803_v36  ;;  %vm8606_vm9 = vcmp.eq.f32.partialorder %v5403_v5, 2.0 }
 0x24c   :  { %1226 = vmatpush.xpose.msrb.mxu2 %v1051_v40  ;;  %899 = vst.msk [vmem:[#allocation3 + $0x78] sm:$0xff] %vm8605_vm13, %v882_v53  ;;  %v1467_v40 = vand.u32 4294901760, %v5989_v28  ;;  %v6034_v21 = vsub.f32 %v4320_v47, %v4320_v47  ;;  %v8608_v53 = vand.u32 4294901760, %v5715_v44  ;;  %v1397_v52 = vand.u32 4294901760, %v1396_v17 }
 0x24d   :  { %v1402_v44 = vsub.f32 %v5789_v18, %v1401_v0  ;;  %vm8448_vm13 = vcmp.eq.f32.partialorder %v5429_v22, 3.0 }
 0x24e   :  { %4237 = vmatpush.xpose.msk.msrb.mxu3 %vm8604_vm3, %v4806_v10  ;;  %vm8449_vm3 = vcmp.eq.f32.partialorder %v5399_v35, 3.0 }
 0x24f   :  { %4222 = vmatpush.xpose.msk.msrb.mxu1 %vm902_vm1, %v4806_v10  ;;  %1630 = vmatpush.xpose.msra.mxu0 %v1461_v60  ;;  %v1403_v0 = vand.u32 4294901760, %v1402_v44 }
 0x250   :  { %1230 = vmatpush.xpose.msrb.mxu2 %v1057_v24  ;;  %v1473_v24 = vand.u32 4294901760, %v6007_v12 }
 0x252   :  { %4238 = vmatpush.xpose.msk.msrb.mxu3 %vm902_vm1, %v4806_v10  ;;  %vm8459_vm1 = vcmp.eq.f32.partialorder %v5377_v43, 3.0 }
 0x253   :  { %4223 = vmatpush.xpose.msk.msrb.mxu1 %vm901_vm14, %v4806_v10  ;;  %1634 = vmatpush.xpose.msra.mxu0 %v1467_v40 }
 0x254   :  { %1234 = vmatpush.xpose.msrb.mxu2 %v1063_v63  ;;  %v4319_v63 = vsel %vm8459_vm1, 1.0, %v4803_v36 }
 0x256   :  { %4239 = vmatpush.xpose.msk.msrb.mxu3 %vm901_vm14, %v4806_v10  ;;  %vm8460_vm14 = vcmp.eq.f32.partialorder %v5384_v25, 3.0 }
 0x257   :  { %4224 = vmatpush.xpose.msk.msrb.mxu1 %vm900_vm15, %v4806_v10  ;;  %1638 = vmatpush.xpose.msra.mxu0 %v1473_v24  ;;  %v4318_v46 = vsel %vm8460_vm14, 1.0, %v4803_v36 }
 0x258   :  { %1238 = vmatpush.xpose.msrb.mxu2 %v1069_v48  ;;  %v6055_v48 = vsub.f32 %v4319_v63, %v4319_v63  ;;  %v6072_v47 = vsub.f32 %v4318_v46, %v4318_v46  ;;  %v1408_v63 = vsub.f32 %v5810_v3, %v1407_v55  ;;  %v8610_v55 = vand.u32 4294901760, %v5827_v27 }
 0x25a   :  { %4240 = vmatpush.xpose.msk.msrb.mxu3 %vm900_vm15, %v4806_v10  ;;  %1179 = vmatmul.f32.vlgmr.msrb.gmra.mxu1 %v5863_v31  ;;  %vm8461_vm15 = vcmp.eq.f32.partialorder %v5389_v6, 3.0  ;;  %v1414_v17 = vsub.f32 %v5827_v27, %v8610_v55 }
 0x25b   :  { %1386 = vmatpush.xpose.msra.mxu1 %v1385_v37  ;;  %1876 = vmatpush.xpose.msrb.mxu0 %v6034_v21  ;;  %v8609_v37 = vand.u32 4294901760, %v5734_v30  ;;  %v4317_v23 = vsel %vm8461_vm15, 1.0, %v4803_v36 }
 0x25c   :  { %1640 = vmatmul.f32.vlgmr.msra.gmra.mxu0 %v5804_v1  ;;  %1242 = vmatpush.xpose.msrb.mxu2 %v8608_v53  ;;  %v6089_v30 = vsub.f32 %v4317_v23, %v4317_v23  ;;  %v4315_v53 = vsel %vm8448_vm13, 1.0, %v4803_v36  ;;  %vm8451_vm13 = vcmp.eq.f32.partialorder %v5478_v29, 3.0 }
 0x25d   :  { %1285 = vmatmul.f32.vlgmr.msrb.gmra.mxu3 %v5804_v1  ;;  %v6117_v46 = vsub.f32 %v4315_v53, %v4315_v53  ;;  %v4313_v23 = vsel %vm8451_vm13, 1.0, %v4803_v36  ;;  %vm8453_vm13 = vcmp.eq.f32.partialorder %v5524_v32, 3.0 }
 0x25e   :  { %4273 = vmatpush.xpose.msk.msra.mxu3 %vm8606_vm9, %v4806_v10  ;;  %vm8450_vm9 = vcmp.eq.f32.partialorder %v5456_v39, 3.0 }
 0x25f   :  { %1392 = vmatpush.xpose.msra.mxu1 %v1391_v16  ;;  %1879 = vmatpush.xpose.msrb.mxu0 %v6055_v48  ;;  %v4316_v16 = vsel %vm8449_vm3, 1.0, %v4803_v36  ;;  %v4314_v44 = vsel %vm8450_vm9, 1.0, %v4803_v36  ;;  %vm8611_vm3 = vcmp.eq.f32.partialorder %v5429_v22, 2.0  ;;  %vm8452_vm9 = vcmp.eq.f32.partialorder %v5501_v61, 3.0 }
 0x260   :  { %1246 = vmatpush.xpose.msrb.mxu2 %v8609_v37  ;;  %v6103_v38 = vsub.f32 %v4316_v16, %v4316_v16  ;;  %v6131_v37 = vsub.f32 %v4314_v44, %v4314_v44 }
 0x262   :  { %4274 = vmatpush.xpose.msk.msra.mxu3 %vm1306_vm7, %v4806_v10 }
 0x263   :  { %1398 = vmatpush.xpose.msra.mxu1 %v1397_v52  ;;  %1882 = vmatpush.xpose.msrb.mxu0 %v6072_v47  ;;  %v1420_v52 = vsub.f32 %v5849_v56, %v1419_v20  ;;  %v1426_v20 = vsub.f32 %v5872_v13, %v1425_v62  ;;  %v1432_v62 = vsub.f32 %v5893_v26, %v1431_v7 }
 0x264   :  { %1484 = vmatpush.xpose.msra.mxu2 %v5737_v33  ;;  %v1409_v33 = vand.u32 4294901760, %v1408_v63  ;;  %v4312_v63 = vsel %vm8452_vm9, 1.0, %v4803_v36  ;;  %v1438_v7 = vsub.f32 %v5909_v59, %v1437_v45  ;;  %vm8454_vm9 = vcmp.eq.f32.partialorder %v5547_v51, 3.0 }
 0x265   :  { %1248 = vmatmul.f32.vlgmr.msrb.gmra.mxu2 %v5804_v1  ;;  %v6159_v16 = vsub.f32 %v4312_v63, %v4312_v63  ;;  %v1444_v45 = vsub.f32 %v5925_v42, %v1443_v11  ;;  %v1450_v11 = vsub.f32 %v5941_v41, %v1449_v58  ;;  %v1456_v58 = vsub.f32 %v5957_v49, %v1455_v14 }
 0x266   :  { %4275 = vmatpush.xpose.msk.msra.mxu3 %vm1305_vm6, %v4806_v10  ;;  %v1462_v14 = vsub.f32 %v5973_v57, %v1461_v60  ;;  %v1468_v60 = vsub.f32 %v5989_v28, %v1467_v40  ;;  %v1474_v40 = vsub.f32 %v6007_v12, %v1473_v24 }
 0x267   :  { %1404 = vmatpush.xpose.msra.mxu1 %v1403_v0  ;;  %1885 = vmatpush.xpose.msrb.mxu0 %v6089_v30  ;;  %v6145_v0 = vsub.f32 %v4313_v23, %v4313_v23 }
 0x268   :  { %1487 = vmatpush.xpose.msra.mxu2 %v5754_v50  ;;  %v1415_v50 = vand.u32 4294901760, %v1414_v17  ;;  %v4310_v17 = vsel %vm8454_vm9, 1.0, %v4803_v36  ;;  %vm1687_vm9 = vcmp.eq.f32.partialorder %v5620_v8, 3.0  ;;  %v1475_v24 = vand.u32 4294901760, %v1474_v40 }
 0x269   :  { %v6187_v53 = vsub.f32 %v4310_v17, %v4310_v17  ;;  %v4308_v44 = vsel %vm1687_vm9, 1.0, %v4803_v36  ;;  %v1823_v40 = vand.u32 4294901760, %v6159_v16 }
 0x26a   :  { %4276 = vmatpush.xpose.msk.msra.mxu3 %vm1304_vm8, %v4806_v10 }
 0x26b   :  { %1410 = vmatpush.xpose.msra.mxu1 %v1409_v33  ;;  %1888 = vmatpush.xpose.msrb.mxu0 %v6103_v38  ;;  %v4311_v33 = vsel %vm8453_vm13, 1.0, %v4803_v36  ;;  %vm8455_vm13 = vcmp.eq.f32.partialorder %v5590_v4, 3.0 }
 0x26c   :  { %1490 = vmatpush.xpose.msra.mxu2 %v5775_v54  ;;  %v1421_v54 = vand.u32 4294901760, %v1420_v52  ;;  %v6173_v55 = vsub.f32 %v4311_v33, %v4311_v33 }
 0x26e   :  { %4277 = vmatpush.xpose.msk.msra.mxu3 %vm1303_vm0, %v4806_v10 }
 0x26f   :  { %1416 = vmatpush.xpose.msra.mxu1 %v1415_v50  ;;  %1891 = vmatpush.xpose.msrb.mxu0 %v6117_v46  ;;  %v4309_v50 = vsel %vm8455_vm13, 1.0, %v4803_v36  ;;  %vm8456_vm13 = vcmp.eq.f32.partialorder %v5615_v2, 3.0 }
 0x270   :  { %1493 = vmatpush.xpose.msra.mxu2 %v5789_v18  ;;  %v1427_v18 = vand.u32 4294901760, %v1426_v20  ;;  %v6201_v52 = vsub.f32 %v4309_v50, %v4309_v50  ;;  %v4307_v20 = vsel %vm8456_vm13, 1.0, %v4803_v36  ;;  %vm8457_vm13 = vcmp.eq.f32.partialorder %v5687_v15, 3.0 }
 0x271   :  { %v6229_v23 = vsub.f32 %v4307_v20, %v4307_v20  ;;  %v1799_v50 = vand.u32 4294901760, %v6103_v38 }
 0x272   :  { %4278 = vmatpush.xpose.msk.msra.mxu3 %vm8611_vm3, %v4806_v10  ;;  %vm8612_vm3 = vcmp.eq.f32.partialorder %v5456_v39, 2.0 }
 0x273   :  { %1422 = vmatpush.xpose.msra.mxu1 %v1421_v54  ;;  %1894 = vmatpush.xpose.msrb.mxu0 %v6131_v37  ;;  %v6215_v54 = vsub.f32 %v4308_v44, %v4308_v44 }
 0x274   :  { %1496 = vmatpush.xpose.msra.mxu2 %v5810_v3  ;;  %v1433_v3 = vand.u32 4294901760, %v1432_v62  ;;  %v1469_v62 = vand.u32 4294901760, %v1468_v60  ;;  %v1817_v60 = vand.u32 4294901760, %v6145_v0 }
 0x276   :  { %4279 = vmatpush.xpose.msk.msra.mxu3 %vm8612_vm3, %v4806_v10  ;;  %vm8613_vm3 = vcmp.eq.f32.partialorder %v5478_v29, 2.0 }
 0x277   :  { %1428 = vmatpush.xpose.msra.mxu1 %v1427_v18  ;;  %1897 = vmatpush.xpose.msrb.mxu0 %v6145_v0 }
 0x278   :  { %1499 = vmatpush.xpose.msra.mxu2 %v5827_v27  ;;  %v1439_v27 = vand.u32 4294901760, %v1438_v7  ;;  %v1781_v7 = vand.u32 4294901760, %v6055_v48 }
 0x27a   :  { %4280 = vmatpush.xpose.msk.msra.mxu3 %vm8613_vm3, %v4806_v10  ;;  %vm8614_vm3 = vcmp.eq.f32.partialorder %v5501_v61, 2.0 }
 0x27b   :  { %1434 = vmatpush.xpose.msra.mxu1 %v1433_v3  ;;  %1900 = vmatpush.xpose.msrb.mxu0 %v6159_v16  ;;  %v4305_v3 = vsel %vm8457_vm13, 1.0, %v4803_v36  ;;  %vm8617_vm13 = vcmp.eq.f32.partialorder %v5403_v5, 2.0 }
 0x27c   :  { %1502 = vmatpush.xpose.msra.mxu2 %v5849_v56  ;;  %v1445_v56 = vand.u32 4294901760, %v1444_v45  ;;  %v6261_v33 = vsub.f32 %v4305_v3, %v4305_v3  ;;  %v1787_v45 = vand.u32 4294901760, %v6072_v47 }
 0x27e   :  { %4281 = vmatpush.xpose.msk.msra.mxu3 %vm8614_vm3, %v4806_v10  ;;  %vm8615_vm3 = vcmp.eq.f32.partialorder %v5524_v32, 2.0  ;;  %v1788_v17 = vsub.f32 %v6072_v47, %v1787_v45 }
 0x27f   :  { %1440 = vmatpush.xpose.msra.mxu1 %v1439_v27  ;;  %1903 = vmatpush.xpose.msrb.mxu0 %v6173_v55  ;;  %v1782_v27 = vsub.f32 %v6055_v48, %v1781_v7 }
 0x280   :  { %1505 = vmatpush.xpose.msra.mxu2 %v5872_v13  ;;  %v1451_v13 = vand.u32 4294901760, %v1450_v11 }
 0x282   :  { %4282 = vmatpush.xpose.msk.msra.mxu3 %vm8615_vm3, %v4806_v10  ;;  %vm8616_vm3 = vcmp.eq.f32.partialorder %v5547_v51, 2.0 }
 0x283   :  { %1446 = vmatpush.xpose.msra.mxu1 %v1445_v56  ;;  %1906 = vmatpush.xpose.msrb.mxu0 %v6187_v53  ;;  %v1793_v56 = vand.u32 4294901760, %v6089_v30 }
 0x284   :  { %1508 = vmatpush.xpose.msra.mxu2 %v5893_v26  ;;  %v1457_v26 = vand.u32 4294901760, %v1456_v58  ;;  %v1805_v58 = vand.u32 4294901760, %v6117_v46 }
 0x285   :  { %v1794_v11 = vsub.f32 %v6089_v30, %v1793_v56 }
 0x286   :  { %4283 = vmatpush.xpose.msk.msra.mxu3 %vm8616_vm3, %v4806_v10  ;;  %vm8458_vm3 = vcmp.eq.f32.partialorder %v5665_v34, 3.0 }
 0x287   :  { %1452 = vmatpush.xpose.msra.mxu1 %v1451_v13  ;;  %1909 = vmatpush.xpose.msrb.mxu0 %v6201_v52  ;;  %v4306_v18 = vsel %vm8458_vm3, 1.0, %v4803_v36  ;;  %vm2091_vm3 = vcmp.eq.f32.partialorder %v5403_v5, 4.0  ;;  %v1800_v13 = vsub.f32 %v6103_v38, %v1799_v50 }
 0x288   :  { %1511 = vmatpush.xpose.msra.mxu2 %v5909_v59  ;;  %v1463_v59 = vand.u32 4294901760, %v1462_v14  ;;  %v6244_v63 = vsub.f32 %v4306_v18, %v4306_v18  ;;  %v1811_v14 = vand.u32 4294901760, %v6131_v37 }
 0x289   :  { %v1801_v44 = vand.u32 4294901760, %v1800_v13 }
 0x28a   :  { %4284 = vmatpush.xpose.msk.msra.mxu3 %vm1296_vm5, %v4806_v10 }
 0x28b   :  { %1458 = vmatpush.xpose.msra.mxu1 %v1457_v26  ;;  %1912 = vmatpush.xpose.msrb.mxu0 %v6215_v54  ;;  %v1806_v26 = vsub.f32 %v6117_v46, %v1805_v58 }
 0x28c   :  { %1514 = vmatpush.xpose.msra.mxu2 %v5925_v42  ;;  %v1775_v42 = vand.u32 4294901760, %v6034_v21 }
 0x28d   :  { %v1807_v20 = vand.u32 4294901760, %v1806_v26 }
 0x28e   :  { %4285 = vmatpush.xpose.msk.msra.mxu3 %vm1295_vm11, %v4806_v10 }
 0x28f   :  { %1464 = vmatpush.xpose.msra.mxu1 %v1463_v59  ;;  %1915 = vmatpush.xpose.msrb.mxu0 %v6229_v23  ;;  %v1812_v59 = vsub.f32 %v6131_v37, %v1811_v14 }
 0x290   :  { %1517 = vmatpush.xpose.msra.mxu2 %v5941_v41  ;;  %v1776_v41 = vsub.f32 %v6034_v21, %v1775_v42 }
 0x291   :  { %v1813_v18 = vand.u32 4294901760, %v1812_v59  ;;  %v1853_v59 = vand.u32 4294901760, %v6229_v23 }
 0x292   :  { %4286 = vmatpush.xpose.msk.msra.mxu3 %vm1294_vm2, %v4806_v10 }
 0x293   :  { %1470 = vmatpush.xpose.msra.mxu1 %v1469_v62  ;;  %1918 = vmatpush.xpose.msrb.mxu0 %v6244_v63  ;;  %v1818_v62 = vsub.f32 %v6145_v0, %v1817_v60 }
 0x294   :  { %1520 = vmatpush.xpose.msra.mxu2 %v5957_v49  ;;  %v1777_v49 = vand.u32 4294901760, %v1776_v41  ;;  %v1824_v41 = vsub.f32 %v6159_v16, %v1823_v40 }
 0x295   :  { %v1819_v3 = vand.u32 4294901760, %v1818_v62  ;;  %v1854_v62 = vsub.f32 %v6229_v23, %v1853_v59 }
 0x296   :  { %4287 = vmatpush.xpose.msk.msra.mxu3 %vm1293_vm4, %v4806_v10 }
 0x297   :  { %1476 = vmatpush.xpose.msra.mxu1 %v1475_v24  ;;  %1921 = vmatpush.xpose.msrb.mxu0 %v6261_v33  ;;  %v1829_v24 = vand.u32 4294901760, %v6173_v55 }
 0x298   :  { %1523 = vmatpush.xpose.msra.mxu2 %v5973_v57  ;;  %v1783_v57 = vand.u32 4294901760, %v1782_v27 }
 0x299   :  { %v1830_v27 = vsub.f32 %v6173_v55, %v1829_v24 }
 0x29a   :  { %4288 = vmatpush.xpose.msk.msra.mxu3 %vm1292_vm10, %v4806_v10  ;;  %1478 = vmatmul.f32.vlgmr.msra.gmra.mxu1 %v5804_v1 }
 0x29b   :  { %4289 = vmatpush.xpose.msk.msrb.mxu1 %vm8617_vm13, %v4806_v10  ;;  %4385 = vmatpush.xpose.msk.msra.mxu0 %vm2091_vm3, %v4806_v10  ;;  %vm2090_vm13 = vcmp.eq.f32.partialorder %v5377_v43, 4.0 }
 0x29c   :  { %1924 = vmatmul.f32.vlgmr.msrb.gmra.mxu0 %v5847_v9  ;;  %1526 = vmatpush.xpose.msra.mxu2 %v5989_v28  ;;  %v1789_v28 = vand.u32 4294901760, %v1788_v17  ;;  %v1831_v17 = vand.u32 4294901760, %v1830_v27  ;;  %v4384_v27 = vsel %vm2091_vm3, 1.0, %v4803_v36 }
 0x29d   :  { %1571 = vmatmul.f32.vlgmr.msra.gmra.mxu3 %v5863_v31 }
 0x29e   :  { %1778 = vmatpush.xpose.msrb.mxu3 %v1777_v49  ;;  %v1825_v49 = vand.u32 4294901760, %v1824_v41  ;;  %v1855_v41 = vand.u32 4294901760, %v1854_v62 }
 0x29f   :  { %4290 = vmatpush.xpose.msk.msrb.mxu1 %vm1306_vm7, %v4806_v10  ;;  %4386 = vmatpush.xpose.msk.msra.mxu0 %vm2090_vm13, %v4806_v10  ;;  %vm2089_vm7 = vcmp.eq.f32.partialorder %v5384_v25, 4.0 }
 0x2a0   :  { %1529 = vmatpush.xpose.msra.mxu2 %v6007_v12  ;;  %v1795_v12 = vand.u32 4294901760, %v1794_v11  ;;  %v1841_v11 = vand.u32 4294901760, %v6201_v52  ;;  %v4382_v62 = vsel %vm2089_vm7, 1.0, %v4803_v36 }
 0x2a2   :  { %1784 = vmatpush.xpose.msrb.mxu3 %v1783_v57  ;;  %v1835_v57 = vand.u32 4294901760, %v6187_v53  ;;  %v1842_v13 = vsub.f32 %v6201_v52, %v1841_v11 }
 0x2a3   :  { %4291 = vmatpush.xpose.msk.msrb.mxu1 %vm1305_vm6, %v4806_v10  ;;  %4387 = vmatpush.xpose.msk.msra.mxu0 %vm2089_vm7, %v4806_v10  ;;  %vm2088_vm6 = vcmp.eq.f32.partialorder %v5389_v6, 4.0 }
 0x2a4   :  { %4321 = vmatpush.xpose.msk.msrb.mxu2 %vm1699_vm12, %v4806_v10  ;;  %v1843_v26 = vand.u32 4294901760, %v1842_v13  ;;  %v4383_v13 = vsel %vm2090_vm13, 1.0, %v4803_v36 }
 0x2a5   :  { %1532 = vmatmul.f32.vlgmr.msra.gmra.mxu2 %v5847_v9 }
 0x2a6   :  { %1790 = vmatpush.xpose.msrb.mxu3 %v1789_v28  ;;  %v1836_v28 = vsub.f32 %v6187_v53, %v1835_v57 }
 0x2a7   :  { %4292 = vmatpush.xpose.msk.msrb.mxu1 %vm1304_vm8, %v4806_v10  ;;  %4388 = vmatpush.xpose.msk.msra.mxu0 %vm2088_vm6, %v4806_v10  ;;  %vm8471_vm8 = vcmp.eq.f32.partialorder %v5399_v35, 4.0 }
 0x2a8   :  { %4322 = vmatpush.xpose.msk.msrb.mxu2 %vm8459_vm1, %v4806_v10  ;;  %vm8462_vm1 = vcmp.eq.f32.partialorder %v5429_v22, 4.0 }
 0x2aa   :  { %1796 = vmatpush.xpose.msrb.mxu3 %v1795_v12  ;;  %v1837_v12 = vand.u32 4294901760, %v1836_v28  ;;  %v6467_v28 = vsub.f32 %v4384_v27, %v4384_v27 }
 0x2ab   :  { %4293 = vmatpush.xpose.msk.msrb.mxu1 %vm1303_vm0, %v4806_v10  ;;  %4389 = vmatpush.xpose.msk.msra.mxu0 %vm8471_vm8, %v4806_v10  ;;  %vm8618_vm0 = vcmp.eq.f32.partialorder %v5429_v22, 2.0 }
 0x2ac   :  { %4323 = vmatpush.xpose.msk.msrb.mxu2 %vm8460_vm14, %v4806_v10  ;;  %vm8463_vm14 = vcmp.eq.f32.partialorder %v5456_v39, 4.0 }
 0x2ae   :  { %1802 = vmatpush.xpose.msrb.mxu3 %v1801_v44  ;;  %v1847_v44 = vand.u32 4294901760, %v6215_v54 }
 0x2af   :  { %4294 = vmatpush.xpose.msk.msrb.mxu1 %vm8618_vm0, %v4806_v10  ;;  %4390 = vmatpush.xpose.msk.msra.mxu0 %vm8462_vm1, %v4806_v10  ;;  %vm8619_vm0 = vcmp.eq.f32.partialorder %v5456_v39, 2.0  ;;  %vm8464_vm1 = vcmp.eq.f32.partialorder %v5478_v29, 4.0 }
 0x2b0   :  { %4324 = vmatpush.xpose.msk.msrb.mxu2 %vm8461_vm15, %v4806_v10  ;;  %vm8620_vm15 = vcmp.eq.f32.partialorder %v5399_v35, 3.0 }
 0x2b2   :  { %1808 = vmatpush.xpose.msrb.mxu3 %v1807_v20  ;;  %v1848_v20 = vsub.f32 %v6215_v54, %v1847_v44 }
 0x2b3   :  { %4295 = vmatpush.xpose.msk.msrb.mxu1 %vm8619_vm0, %v4806_v10  ;;  %4391 = vmatpush.xpose.msk.msra.mxu0 %vm8463_vm14, %v4806_v10  ;;  %vm8621_vm0 = vcmp.eq.f32.partialorder %v5478_v29, 2.0  ;;  %vm8465_vm14 = vcmp.eq.f32.partialorder %v5501_v61, 4.0 }
 0x2b4   :  { %4325 = vmatpush.xpose.msk.msrb.mxu2 %vm8620_vm15, %v4806_v10  ;;  %vm8622_vm15 = vcmp.eq.f32.partialorder %v5429_v22, 3.0 }
 0x2b6   :  { %1814 = vmatpush.xpose.msrb.mxu3 %v1813_v18  ;;  %v1849_v18 = vand.u32 4294901760, %v1848_v20  ;;  %v6485_v20 = vsub.f32 %v4383_v13, %v4383_v13 }
 0x2b7   :  { %4296 = vmatpush.xpose.msk.msrb.mxu1 %vm8621_vm0, %v4806_v10  ;;  %4392 = vmatpush.xpose.msk.msra.mxu0 %vm8464_vm1, %v4806_v10  ;;  %vm8623_vm0 = vcmp.eq.f32.partialorder %v5501_v61, 2.0  ;;  %vm2082_vm1 = vcmp.eq.f32.partialorder %v5524_v32, 4.0 }
 0x2b8   :  { %4326 = vmatpush.xpose.msk.msrb.mxu2 %vm8622_vm15, %v4806_v10  ;;  %vm8624_vm15 = vcmp.eq.f32.partialorder %v5456_v39, 3.0  ;;  %v2173_v27 = vand.u32 4294901760, %v6485_v20 }
 0x2ba   :  { %1820 = vmatpush.xpose.msrb.mxu3 %v1819_v3  ;;  %v1859_v3 = vand.u32 4294901760, %v6244_v63 }
 0x2bb   :  { %4297 = vmatpush.xpose.msk.msrb.mxu1 %vm8623_vm0, %v4806_v10  ;;  %4393 = vmatpush.xpose.msk.msra.mxu0 %vm8465_vm14, %v4806_v10  ;;  %vm8625_vm0 = vcmp.eq.f32.partialorder %v5524_v32, 2.0  ;;  %vm2081_vm14 = vcmp.eq.f32.partialorder %v5547_v51, 4.0 }
 0x2bc   :  { %4327 = vmatpush.xpose.msk.msrb.mxu2 %vm8624_vm15, %v4806_v10  ;;  %vm8626_vm15 = vcmp.eq.f32.partialorder %v5478_v29, 3.0 }
 0x2be   :  { %1826 = vmatpush.xpose.msrb.mxu3 %v1825_v49  ;;  %v1860_v49 = vsub.f32 %v6244_v63, %v1859_v3 }
 0x2bf   :  { %4298 = vmatpush.xpose.msk.msrb.mxu1 %vm8625_vm0, %v4806_v10  ;;  %4394 = vmatpush.xpose.msk.msra.mxu0 %vm2082_vm1, %v4806_v10  ;;  %vm8627_vm0 = vcmp.eq.f32.partialorder %v5547_v51, 2.0 }
 0x2c0   :  { %4328 = vmatpush.xpose.msk.msrb.mxu2 %vm8626_vm15, %v4806_v10  ;;  %vm8628_vm15 = vcmp.eq.f32.partialorder %v5501_v61, 3.0 }
 0x2c2   :  { %1832 = vmatpush.xpose.msrb.mxu3 %v1831_v17  ;;  %v8466_v17 = vand.u32 4294901760, %v6261_v33 }
 0x2c3   :  { %4299 = vmatpush.xpose.msk.msrb.mxu1 %vm8627_vm0, %v4806_v10  ;;  %4395 = vmatpush.xpose.msk.msra.mxu0 %vm2081_vm14, %v4806_v10  ;;  %vm2080_vm0 = vcmp.eq.f32.partialorder %v5590_v4, 4.0 }
 0x2c4   :  { %4329 = vmatpush.xpose.msk.msrb.mxu2 %vm8628_vm15, %v4806_v10  ;;  %vm8629_vm15 = vcmp.eq.f32.partialorder %v5524_v32, 3.0 }
 0x2c6   :  { %1838 = vmatpush.xpose.msrb.mxu3 %v1837_v12  ;;  %v1861_v12 = vand.u32 4294901760, %v1860_v49  ;;  %v6507_v49 = vsub.f32 %v4382_v62, %v4382_v62  ;;  %v4380_v62 = vsel %vm8471_vm8, 1.0, %v4803_v36 }
 0x2c7   :  { %4300 = vmatpush.xpose.msk.msrb.mxu1 %vm1296_vm5, %v4806_v10  ;;  %4396 = vmatpush.xpose.msk.msra.mxu0 %vm2080_vm0, %v4806_v10  ;;  %vm2079_vm5 = vcmp.eq.f32.partialorder %v5620_v8, 4.0 }
 0x2c8   :  { %4330 = vmatpush.xpose.msk.msrb.mxu2 %vm8629_vm15, %v4806_v10  ;;  %vm8630_vm15 = vcmp.eq.f32.partialorder %v5547_v51, 3.0 }
 0x2ca   :  { %1844 = vmatpush.xpose.msrb.mxu3 %v1843_v26  ;;  %v1866_v26 = vsub.f32 %v6261_v33, %v8466_v17 }
 0x2cb   :  { %4301 = vmatpush.xpose.msk.msrb.mxu1 %vm1295_vm11, %v4806_v10  ;;  %4397 = vmatpush.xpose.msk.msra.mxu0 %vm2079_vm5, %v4806_v10  ;;  %vm2078_vm11 = vcmp.eq.f32.partialorder %v5615_v2, 4.0 }
 0x2cc   :  { %4331 = vmatpush.xpose.msk.msrb.mxu2 %vm8630_vm15, %v4806_v10  ;;  %vm8631_vm15 = vcmp.eq.f32.partialorder %v5590_v4, 3.0 }
 0x2ce   :  { %1850 = vmatpush.xpose.msrb.mxu3 %v1849_v18  ;;  %v2167_v18 = vand.u32 4294901760, %v6467_v28 }
 0x2cf   :  { %4302 = vmatpush.xpose.msk.msrb.mxu1 %vm1294_vm2, %v4806_v10  ;;  %4398 = vmatpush.xpose.msk.msra.mxu0 %vm2078_vm11, %v4806_v10  ;;  %vm2077_vm2 = vcmp.eq.f32.partialorder %v5665_v34, 4.0 }
 0x2d0   :  { %4332 = vmatpush.xpose.msk.msrb.mxu2 %vm8631_vm15, %v4806_v10  ;;  %vm8632_vm15 = vcmp.eq.f32.partialorder %v5615_v2, 3.0 }
 0x2d2   :  { %1856 = vmatpush.xpose.msrb.mxu3 %v1855_v41  ;;  %v1867_v41 = vand.u32 4294901760, %v1866_v26  ;;  %v2179_v26 = vand.u32 4294901760, %v6507_v49 }
 0x2d3   :  { %4303 = vmatpush.xpose.msk.msrb.mxu1 %vm1293_vm4, %v4806_v10  ;;  %4399 = vmatpush.xpose.msk.msra.mxu0 %vm2077_vm2, %v4806_v10  ;;  %vm2076_vm4 = vcmp.eq.f32.partialorder %v5687_v15, 4.0 }
 0x2d4   :  { %4333 = vmatpush.xpose.msk.msrb.mxu2 %vm1687_vm9, %v4806_v10  ;;  %v2180_v23 = vsub.f32 %v6507_v49, %v2179_v26 }
 0x2d6   :  { %1862 = vmatpush.xpose.msrb.mxu3 %v1861_v12  ;;  %v4381_v12 = vsel %vm2088_vm6, 1.0, %v4803_v36 }
 0x2d7   :  { %4304 = vmatpush.xpose.msk.msrb.mxu1 %vm1292_vm10, %v4806_v10  ;;  %4400 = vmatpush.xpose.msk.msra.mxu0 %vm2076_vm4, %v4806_v10  ;;  %vm8633_vm10 = vcmp.eq.f32.partialorder %v5665_v34, 3.0  ;;  %v6526_v13 = vsub.f32 %v4381_v12, %v4381_v12 }
 0x2d8   :  { %4334 = vmatpush.xpose.msk.msrb.mxu2 %vm8632_vm15, %v4806_v10  ;;  %vm8634_vm15 = vcmp.eq.f32.partialorder %v5377_v43, 3.0 }
 0x2d9   :  { %v2185_v12 = vand.u32 4294901760, %v6526_v13 }
 0x2da   :  { %1677 = vmatmul.f32.vlgmr.msrb.gmra.mxu1 %v5804_v1  ;;  %1868 = vmatpush.xpose.msrb.mxu3 %v1867_v41  ;;  %v6545_v41 = vsub.f32 %v4380_v62, %v4380_v62 }
 0x2db   :  { %4337 = vmatpush.xpose.msk.msra.mxu1 %vm1699_vm12, %v4806_v10  ;;  %2362 = vmatpush.xpose.msrb.mxu0 %v2167_v18  ;;  %v2186_v63 = vsub.f32 %v6526_v13, %v2185_v12 }
 0x2dc   :  { %2161 = vmatmul.f32.vlgmr.msra.gmra.mxu0 %v5884_v19  ;;  %4335 = vmatpush.xpose.msk.msrb.mxu2 %vm8633_vm10, %v4806_v10  ;;  %vm8636_vm10 = vcmp.eq.f32.partialorder %v5687_v15, 3.0 }
 0x2dd   :  { %1870 = vmatmul.f32.vlgmr.msrb.gmra.mxu3 %v5804_v1 }
 0x2de   :  { %4353 = vmatpush.xpose.msk.msra.mxu3 %vm1699_vm12, %v4806_v10  ;;  %vm8635_vm12 = vmmov %vm8634_vm15 }
 0x2df   :  { %4338 = vmatpush.xpose.msk.msra.mxu1 %vm8634_vm15, %v4806_v10  ;;  %2366 = vmatpush.xpose.msrb.mxu0 %v2173_v27  ;;  %vm8637_vm15 = vcmp.eq.f32.partialorder %v5384_v25, 3.0 }
 0x2e0   :  { %4336 = vmatpush.xpose.msk.msrb.mxu2 %vm8636_vm10, %v4806_v10  ;;  %vm8639_vm10 = vcmp.eq.f32.partialorder %v5429_v22, 4.0 }
 0x2e1   :  { %v4379_v17 = vsel %vm8639_vm10, 1.0, %v4803_v36  ;;  %vm8642_vm10 = vcmp.eq.f32.partialorder %v5456_v39, 4.0 }
 0x2e2   :  { %4354 = vmatpush.xpose.msk.msra.mxu3 %vm8635_vm12, %v4806_v10  ;;  %vm8638_vm12 = vmmov %vm8637_vm15  ;;  %v6562_v21 = vsub.f32 %v4379_v17, %v4379_v17  ;;  %v4378_v62 = vsel %vm8642_vm10, 1.0, %v4803_v36  ;;  %vm8645_vm10 = vcmp.eq.f32.partialorder %v5478_v29, 4.0 }
 0x2e3   :  { %4339 = vmatpush.xpose.msk.msra.mxu1 %vm8637_vm15, %v4806_v10  ;;  %2370 = vmatpush.xpose.msrb.mxu0 %v2179_v26  ;;  %vm8640_vm15 = vcmp.eq.f32.partialorder %v5389_v6, 3.0  ;;  %v6578_v48 = vsub.f32 %v4378_v62, %v4378_v62  ;;  %v4377_v17 = vsel %vm8645_vm10, 1.0, %v4803_v36  ;;  %vm8648_vm10 = vcmp.eq.f32.partialorder %v5501_v61, 4.0 }
 0x2e4   :  { %1970 = vmatpush.xpose.msra.mxu2 %v1775_v42  ;;  %v2191_v42 = vand.u32 4294901760, %v6545_v41  ;;  %v6594_v47 = vsub.f32 %v4377_v17, %v4377_v17  ;;  %v4376_v62 = vsel %vm8648_vm10, 1.0, %v4803_v36  ;;  %v4375_v17 = vsel %vm2082_vm1, 1.0, %v4803_v36 }
 0x2e5   :  { %1769 = vmatmul.f32.vlgmr.msrb.gmra.mxu2 %v5884_v19  ;;  %v6610_v30 = vsub.f32 %v4376_v62, %v4376_v62  ;;  %vm8651_vm10 = vcmp.eq.f32.partialorder %v5478_v29, 3.0  ;;  %v6626_v38 = vsub.f32 %v4375_v17, %v4375_v17  ;;  %v4374_v62 = vsel %vm2081_vm14, 1.0, %v4803_v36 }
 0x2e6   :  { %4355 = vmatpush.xpose.msk.msra.mxu3 %vm8638_vm12, %v4806_v10  ;;  %vm8641_vm12 = vmmov %vm8640_vm15  ;;  %v6642_v46 = vsub.f32 %v4374_v62, %v4374_v62  ;;  %v4373_v17 = vsel %vm2080_vm0, 1.0, %v4803_v36  ;;  %v4372_v62 = vsel %vm2079_vm5, 1.0, %v4803_v36  ;;  %v2181_v26 = vand.u32 4294901760, %v2180_v23 }
 0x2e7   :  { %4340 = vmatpush.xpose.msk.msra.mxu1 %vm8640_vm15, %v4806_v10  ;;  %2374 = vmatpush.xpose.msrb.mxu0 %v2185_v12  ;;  %vm8643_vm15 = vcmp.eq.f32.partialorder %v5399_v35, 3.0  ;;  %v6658_v37 = vsub.f32 %v4373_v17, %v4373_v17  ;;  %v6674_v0 = vsub.f32 %v4372_v62, %v4372_v62  ;;  %v4371_v17 = vsel %vm2078_vm11, 1.0, %v4803_v36 }
 0x2e8   :  { %1974 = vmatpush.xpose.msra.mxu2 %v1781_v7  ;;  %v2197_v7 = vand.u32 4294901760, %v6562_v21  ;;  %v6690_v16 = vsub.f32 %v4371_v17, %v4371_v17  ;;  %v4370_v62 = vsel %vm2077_vm2, 1.0, %v4803_v36  ;;  %v4369_v17 = vsel %vm2076_vm4, 1.0, %v4803_v36 }
 0x2e9   :  { %v6706_v55 = vsub.f32 %v4370_v62, %v4370_v62  ;;  %v6722_v53 = vsub.f32 %v4369_v17, %v4369_v17  ;;  %v2168_v62 = vsub.f32 %v6467_v28, %v2167_v18  ;;  %v2174_v17 = vsub.f32 %v6485_v20, %v2173_v27 }
 0x2ea   :  { %4356 = vmatpush.xpose.msk.msra.mxu3 %vm8641_vm12, %v4806_v10  ;;  %vm8644_vm12 = vmmov %vm8643_vm15  ;;  %v2187_v12 = vand.u32 4294901760, %v2186_v63 }
 0x2eb   :  { %4341 = vmatpush.xpose.msk.msra.mxu1 %vm8643_vm15, %v4806_v10  ;;  %2378 = vmatpush.xpose.msrb.mxu0 %v2191_v42  ;;  %vm8646_vm15 = vcmp.eq.f32.partialorder %v5429_v22, 3.0  ;;  %v2169_v18 = vand.u32 4294901760, %v2168_v62  ;;  %v2175_v27 = vand.u32 4294901760, %v2174_v17 }
 0x2ec   :  { %1978 = vmatpush.xpose.msra.mxu2 %v1787_v45  ;;  %v2203_v45 = vand.u32 4294901760, %v6578_v48 }
 0x2ee   :  { %4357 = vmatpush.xpose.msk.msra.mxu3 %vm8644_vm12, %v4806_v10  ;;  %vm8647_vm12 = vmmov %vm8646_vm15 }
 0x2ef   :  { %4342 = vmatpush.xpose.msk.msra.mxu1 %vm8646_vm15, %v4806_v10  ;;  %2382 = vmatpush.xpose.msrb.mxu0 %v2197_v7  ;;  %vm8649_vm15 = vcmp.eq.f32.partialorder %v5456_v39, 3.0 }
 0x2f0   :  { %1982 = vmatpush.xpose.msra.mxu2 %v1793_v56  ;;  %v2209_v56 = vand.u32 4294901760, %v6594_v47 }
 0x2f2   :  { %4358 = vmatpush.xpose.msk.msra.mxu3 %vm8647_vm12, %v4806_v10  ;;  %vm8650_vm12 = vmmov %vm8649_vm15 }
 0x2f3   :  { %4343 = vmatpush.xpose.msk.msra.mxu1 %vm8649_vm15, %v4806_v10  ;;  %2386 = vmatpush.xpose.msrb.mxu0 %v2203_v45  ;;  %vm8652_vm15 = vmmov %vm8651_vm10 }
 0x2f4   :  { %1986 = vmatpush.xpose.msra.mxu2 %v1799_v50  ;;  %v2215_v50 = vand.u32 4294901760, %v6610_v30 }
 0x2f6   :  { %4359 = vmatpush.xpose.msk.msra.mxu3 %vm8650_vm12, %v4806_v10  ;;  %vm8653_vm12 = vcmp.eq.f32.partialorder %v5501_v61, 3.0 }
 0x2f7   :  { %4344 = vmatpush.xpose.msk.msra.mxu1 %vm8651_vm10, %v4806_v10  ;;  %2390 = vmatpush.xpose.msrb.mxu0 %v2209_v56  ;;  %vm8654_vm10 = vmmov %vm8653_vm12 }
 0x2f8   :  { %1990 = vmatpush.xpose.msra.mxu2 %v1805_v58  ;;  %v2221_v58 = vand.u32 4294901760, %v6626_v38 }
 0x2fa   :  { %4360 = vmatpush.xpose.msk.msra.mxu3 %vm8652_vm15, %v4806_v10  ;;  %vm8655_vm15 = vcmp.eq.f32.partialorder %v5524_v32, 3.0 }
 0x2fb   :  { %4345 = vmatpush.xpose.msk.msra.mxu1 %vm8653_vm12, %v4806_v10  ;;  %2394 = vmatpush.xpose.msrb.mxu0 %v2215_v50  ;;  %vm8656_vm12 = vmmov %vm8655_vm15 }
 0x2fc   :  { %1994 = vmatpush.xpose.msra.mxu2 %v1811_v14  ;;  %v2227_v14 = vand.u32 4294901760, %v6642_v46 }
 0x2fe   :  { %4361 = vmatpush.xpose.msk.msra.mxu3 %vm8654_vm10, %v4806_v10  ;;  %vm8657_vm10 = vcmp.eq.f32.partialorder %v5547_v51, 3.0 }
 0x2ff   :  { %4346 = vmatpush.xpose.msk.msra.mxu1 %vm8655_vm15, %v4806_v10  ;;  %2398 = vmatpush.xpose.msrb.mxu0 %v2221_v58  ;;  %vm8658_vm15 = vmmov %vm8657_vm10 }
 0x300   :  { %1998 = vmatpush.xpose.msra.mxu2 %v1817_v60  ;;  %v2233_v60 = vand.u32 4294901760, %v6658_v37 }
 0x302   :  { %4362 = vmatpush.xpose.msk.msra.mxu3 %vm8656_vm12, %v4806_v10  ;;  %vm8659_vm12 = vcmp.eq.f32.partialorder %v5590_v4, 3.0 }
 0x303   :  { %4347 = vmatpush.xpose.msk.msra.mxu1 %vm8657_vm10, %v4806_v10  ;;  %2402 = vmatpush.xpose.msrb.mxu0 %v2227_v14  ;;  %vm8660_vm10 = vmmov %vm8659_vm12 }
 0x304   :  { %2002 = vmatpush.xpose.msra.mxu2 %v1823_v40  ;;  %v2239_v40 = vand.u32 4294901760, %v6674_v0 }
 0x306   :  { %4363 = vmatpush.xpose.msk.msra.mxu3 %vm8658_vm15, %v4806_v10  ;;  %vm8661_vm15 = vcmp.eq.f32.partialorder %v5615_v2, 3.0 }
 0x307   :  { %4348 = vmatpush.xpose.msk.msra.mxu1 %vm8659_vm12, %v4806_v10  ;;  %2406 = vmatpush.xpose.msrb.mxu0 %v2233_v60  ;;  %vm8483_vm12 = vcmp.eq.f32.partialorder %v5403_v5, 5.0 }
 0x308   :  { %2006 = vmatpush.xpose.msra.mxu2 %v1829_v24  ;;  %v2245_v24 = vand.u32 4294901760, %v6690_v16  ;;  %v4448_v52 = vsel %vm8483_vm12, 1.0, %v4803_v36 }
 0x309   :  { %v6755_v54 = vsub.f32 %v4448_v52, %v4448_v52 }
 0x30a   :  { %4364 = vmatpush.xpose.msk.msra.mxu3 %vm8660_vm10, %v4806_v10  ;;  %vm8663_vm10 = vcmp.eq.f32.partialorder %v5665_v34, 3.0 }
 0x30b   :  { %4349 = vmatpush.xpose.msk.msra.mxu1 %vm1687_vm9, %v4806_v10  ;;  %2410 = vmatpush.xpose.msrb.mxu0 %v2239_v40 }
 0x30c   :  { %2010 = vmatpush.xpose.msra.mxu2 %v1835_v57  ;;  %v2251_v57 = vand.u32 4294901760, %v6706_v55 }
 0x30e   :  { %4365 = vmatpush.xpose.msk.msra.mxu3 %vm1687_vm9, %v4806_v10  ;;  %vm8662_vm9 = vmmov %vm8661_vm15 }
 0x30f   :  { %4350 = vmatpush.xpose.msk.msra.mxu1 %vm8661_vm15, %v4806_v10  ;;  %2414 = vmatpush.xpose.msrb.mxu0 %v2245_v24  ;;  %vm8664_vm15 = vmmov %vm8663_vm10 }
 0x310   :  { %2014 = vmatpush.xpose.msra.mxu2 %v1841_v11  ;;  %v2257_v11 = vand.u32 4294901760, %v6722_v53 }
 0x312   :  { %4366 = vmatpush.xpose.msk.msra.mxu3 %vm8662_vm9, %v4806_v10  ;;  %vm8475_vm9 = vcmp.eq.f32.partialorder %v5377_v43, 5.0 }
 0x313   :  { %4351 = vmatpush.xpose.msk.msra.mxu1 %vm8663_vm10, %v4806_v10  ;;  %2418 = vmatpush.xpose.msrb.mxu0 %v2251_v57  ;;  %vm8665_vm10 = vcmp.eq.f32.partialorder %v5687_v15, 3.0 }
 0x314   :  { %2018 = vmatpush.xpose.msra.mxu2 %v1847_v44  ;;  %v4447_v44 = vsel %vm8475_vm9, 1.0, %v4803_v36  ;;  %vm8672_vm9 = vcmp.eq.f32.partialorder %v5501_v61, 4.0 }
 0x316   :  { %4367 = vmatpush.xpose.msk.msra.mxu3 %vm8664_vm15, %v4806_v10  ;;  %vm8666_vm15 = vmmov %vm8665_vm10 }
 0x317   :  { %4352 = vmatpush.xpose.msk.msra.mxu1 %vm8665_vm10, %v4806_v10  ;;  %2422 = vmatpush.xpose.msrb.mxu0 %v2257_v11  ;;  %vm8467_vm10 = vcmp.eq.f32.partialorder %v5384_v25, 5.0 }
 0x318   :  { %2022 = vmatpush.xpose.msra.mxu2 %v1853_v59  ;;  %v6774_v59 = vsub.f32 %v4447_v44, %v4447_v44  ;;  %v4446_v62 = vsel %vm8467_vm10, 1.0, %v4803_v36  ;;  %v1087_v44 = vpop.f32.mrf.mxu2  ;;  %vm8469_vm10 = vcmp.eq.f32.partialorder %v5399_v35, 5.0 }
 0x319   :  { %v6791_v52 = vsub.f32 %v4446_v62, %v4446_v62  ;;  %v1141_v62 = vpop.f32.mrf.mxu3 }
 0x31a   :  { %4368 = vmatpush.xpose.msk.msra.mxu3 %vm8666_vm15, %v4806_v10  ;;  %1963 = vmatmul.f32.vlgmr.msra.gmra.mxu1 %v5863_v31  ;;  %vm8468_vm15 = vcmp.eq.f32.partialorder %v5389_v6, 5.0 }
 0x31b   :  { %2170 = vmatpush.xpose.msrb.mxu1 %v2169_v18  ;;  %2660 = vmatpush.xpose.msra.mxu0 %v6755_v54  ;;  %v8667_v18 = vand.u32 4294901760, %v6261_v33  ;;  %v4445_v17 = vsel %vm8468_vm15, 1.0, %v4803_v36  ;;  %v2192_v33 = vsub.f32 %v6545_v41, %v2191_v42  ;;  %vm8470_vm15 = vcmp.eq.f32.partialorder %v5429_v22, 5.0 }
 0x31c   :  { %2424 = vmatmul.f32.vlgmr.msrb.gmra.mxu0 %v5804_v1  ;;  %2026 = vmatpush.xpose.msra.mxu2 %v1859_v3  ;;  %v986_v3 = vpop.f32.mrf.mxu1 }
 0x31d   :  { %2069 = vmatmul.f32.vlgmr.msra.gmra.mxu3 %v5804_v1  ;;  %v1088_v23 = vadd.f32 %v1087_v44, %v986_v3  ;;  %v2193_v42 = vand.u32 4294901760, %v2192_v33 }
 0x31e   :  { %4401 = vmatpush.xpose.msk.msrb.mxu3 %vm2091_vm3, %v4806_v10 }
 0x31f   :  { %2176 = vmatpush.xpose.msrb.mxu1 %v2175_v27  ;;  %2663 = vmatpush.xpose.msra.mxu0 %v6774_v59  ;;  %v6808_v27 = vsub.f32 %v4445_v17, %v4445_v17  ;;  %v1142_v3 = vadd.f32 %v1141_v62, %v1088_v23  ;;  %v2204_v17 = vsub.f32 %v6578_v48, %v2203_v45 }
 0x320   :  { %2030 = vmatpush.xpose.msra.mxu2 %v8667_v18  ;;  %v4443_v18 = vsel %vm8470_vm15, 1.0, %v4803_v36  ;;  %v1249_v44 = vpop.f32.mrf.mxu2  ;;  %vm8473_vm15 = vcmp.eq.f32.partialorder %v5478_v29, 5.0 }
 0x321   :  { %v2205_v45 = vand.u32 4294901760, %v2204_v17  ;;  %v1286_v62 = vpop.f32.mrf.mxu3 }
 0x322   :  { %4402 = vmatpush.xpose.msk.msrb.mxu3 %vm2090_vm13, %v4806_v10 }
 0x323   :  { %2182 = vmatpush.xpose.msrb.mxu1 %v2181_v26  ;;  %2666 = vmatpush.xpose.msra.mxu0 %v6791_v52  ;;  %v2198_v26 = vsub.f32 %v6562_v21, %v2197_v7 }
 0x324   :  { %2268 = vmatpush.xpose.msrb.mxu2 %v6467_v28  ;;  %v4444_v28 = vsel %vm8469_vm10, 1.0, %v4803_v36  ;;  %vm8472_vm10 = vcmp.eq.f32.partialorder %v5456_v39, 5.0 }
 0x325   :  { %2032 = vmatmul.f32.vlgmr.msra.gmra.mxu2 %v5804_v1  ;;  %v6822_v63 = vsub.f32 %v4444_v28, %v4444_v28  ;;  %v2199_v7 = vand.u32 4294901760, %v2198_v26  ;;  %v2210_v28 = vsub.f32 %v6594_v47, %v2209_v56 }
 0x326   :  { %4403 = vmatpush.xpose.msk.msrb.mxu3 %vm2089_vm7, %v4806_v10 }
 0x327   :  { %2188 = vmatpush.xpose.msrb.mxu1 %v2187_v12  ;;  %2669 = vmatpush.xpose.msra.mxu0 %v6808_v27  ;;  %v6836_v12 = vsub.f32 %v4443_v18, %v4443_v18  ;;  %v2211_v56 = vand.u32 4294901760, %v2210_v28 }
 0x328   :  { %2271 = vmatpush.xpose.msrb.mxu2 %v6485_v20  ;;  %v1180_v20 = vpop.f32.mrf.mxu1 }
 0x329   :  { %v1181_v33 = vadd.f32 %v1180_v20, %v1142_v3  ;;  %v2216_v3 = vsub.f32 %v6610_v30, %v2215_v50  ;;  %v2222_v50 = vsub.f32 %v6626_v38, %v2221_v58 }
 0x32a   :  { %4404 = vmatpush.xpose.msk.msrb.mxu3 %vm2088_vm6, %v4806_v10 }
 0x32b   :  { %2194 = vmatpush.xpose.msrb.mxu1 %v2193_v42  ;;  %2672 = vmatpush.xpose.msra.mxu0 %v6822_v63  ;;  %v1250_v23 = vadd.f32 %v1249_v44, %v1181_v33  ;;  %v2217_v20 = vand.u32 4294901760, %v2216_v3 }
 0x32c   :  { %2274 = vmatpush.xpose.msrb.mxu2 %v6507_v49  ;;  %v4442_v49 = vsel %vm8472_vm10, 1.0, %v4803_v36  ;;  %vm8474_vm10 = vcmp.eq.f32.partialorder %v5501_v61, 5.0 }
 0x32d   :  { %v6850_v42 = vsub.f32 %v4442_v49, %v4442_v49  ;;  %v6858_v26 = vadd.f32 %v1286_v62, %v1250_v23  ;;  %v2223_v23 = vand.u32 4294901760, %v2222_v50 }
 0x32e   :  { %4405 = vmatpush.xpose.msk.msrb.mxu3 %vm8471_vm8, %v4806_v10  ;;  %vm8668_vm8 = vcmp.eq.f32.partialorder %v5429_v22, 4.0 }
 0x32f   :  { %2200 = vmatpush.xpose.msrb.mxu1 %v2199_v7  ;;  %2675 = vmatpush.xpose.msra.mxu0 %v6836_v12  ;;  %v6883_v7 = vld [vmem:[%s8414_s1] sm:$0xff] }
 0x330   :  { %2277 = vmatpush.xpose.msrb.mxu2 %v6526_v13  ;;  %v4441_v13 = vsel %vm8473_vm15, 1.0, %v4803_v36  ;;  %vm2474_vm15 = vcmp.eq.f32.partialorder %v5524_v32, 5.0  ;;  %v4045_v58 = vsub.f32 %v6858_v26, %v6883_v7 }
 0x331   :  { %v6866_v18 = vsub.f32 %v4441_v13, %v4441_v13  ;;  %v4439_v33 = vsel %vm2474_vm15, 1.0, %v4803_v36 }
 0x332   :  { %4406 = vmatpush.xpose.msk.msrb.mxu3 %vm8668_vm8, %v4806_v10  ;;  %vm8669_vm8 = vcmp.eq.f32.partialorder %v5456_v39, 4.0  ;;  %v6907_v62 = vsub.f32 %v4439_v33, %v4439_v33  ;;  %v1479_v33 = vpop.f32.mrf.mxu1 }
 0x333   :  { %2206 = vmatpush.xpose.msrb.mxu1 %v2205_v45  ;;  %2678 = vmatpush.xpose.msra.mxu0 %v6850_v42  ;;  %v2228_v45 = vsub.f32 %v6642_v46, %v2227_v14 }
 0x334   :  { %2280 = vmatpush.xpose.msrb.mxu2 %v6545_v41  ;;  %v4440_v41 = vsel %vm8474_vm10, 1.0, %v4803_v36  ;;  %vm4041_vm10 = vcmp.gt.f32.partialorder %v6858_v26, 0.5 }
 0x335   :  { %v6886_v17 = vsub.f32 %v4440_v41, %v4440_v41  ;;  %v2229_v14 = vand.u32 4294901760, %v2228_v45 }
 0x336   :  { %4407 = vmatpush.xpose.msk.msrb.mxu3 %vm8669_vm8, %v4806_v10  ;;  %vm8670_vm8 = vcmp.eq.f32.partialorder %v5478_v29, 4.0 }
 0x337   :  { %2212 = vmatpush.xpose.msrb.mxu1 %v2211_v56  ;;  %2681 = vmatpush.xpose.msra.mxu0 %v6866_v18  ;;  %v2234_v56 = vsub.f32 %v6658_v37, %v2233_v60  ;;  %v2240_v60 = vsub.f32 %v6674_v0, %v2239_v40  ;;  %v2246_v40 = vsub.f32 %v6690_v16, %v2245_v24 }
 0x338   :  { %2283 = vmatpush.xpose.msrb.mxu2 %v6562_v21  ;;  %v8671_v21 = vmov 0  }
 0x339   :  { %v4042_v44 = vsel %vm4041_vm10, 1, %v8671_v21  ;;  %v2247_v24 = vand.u32 4294901760, %v2246_v40 }
 0x33a   :  { %4408 = vmatpush.xpose.msk.msrb.mxu3 %vm8670_vm8, %v4806_v10  ;;  %v4043_v49 = vperm.slane %v4042_v44, 7  ;;  %vm8476_vm8 = vcmp.eq.f32.partialorder %v5547_v51, 5.0 }
 0x33b   :  { %2218 = vmatpush.xpose.msrb.mxu1 %v2217_v20  ;;  %2684 = vmatpush.xpose.msra.mxu0 %v6886_v17  ;;  %v4438_v13 = vsel %vm8476_vm8, 1.0, %v4803_v36  ;;  %vm8478_vm8 = vcmp.eq.f32.partialorder %v5620_v8, 5.0 }
 0x33c   :  { %2286 = vmatpush.xpose.msrb.mxu2 %v6578_v48  ;;  %vm6903_vm10 = vcmp.eq.s32.totalorder %v4043_v49, 1  ;;  %v6923_v3 = vsub.f32 %v4438_v13, %v4438_v13  ;;  %v4436_v50 = vsel %vm8478_vm8, 1.0, %v4803_v36  ;;  %vm8481_vm8 = vcmp.eq.f32.partialorder %v5665_v34, 5.0 }
 0x33d   :  { %v4046_v48 = vsel %vm6903_vm10, %v4045_v58, 0.0  ;;  %v6951_v44 = vsub.f32 %v4436_v50, %v4436_v50  ;;  %v2252_v58 = vsub.f32 %v6706_v55, %v2251_v57 }
 0x33e   :  { %4409 = vmatpush.xpose.msk.msrb.mxu3 %vm8672_vm9, %v4806_v10  ;;  %4047 = vst [vmem:[#allocation4] sm:$0xff] %v4046_v48  ;;  %vm8477_vm9 = vcmp.eq.f32.partialorder %v5590_v4, 5.0  ;;  %v1533_v48 = vpop.f32.mrf.mxu2 }
 0x33f   :  { %2224 = vmatpush.xpose.msrb.mxu1 %v2223_v23  ;;  %2687 = vmatpush.xpose.msra.mxu0 %v6907_v62  ;;  %v4437_v41 = vsel %vm8477_vm9, 1.0, %v4803_v36  ;;  %vm8479_vm9 = vcmp.eq.f32.partialorder %v5615_v2, 5.0  ;;  %v2253_v57 = vand.u32 4294901760, %v2252_v58 }
 0x340   :  { %2289 = vmatpush.xpose.msrb.mxu2 %v6594_v47  ;;  %v2235_v47 = vand.u32 4294901760, %v2234_v56  ;;  %v6937_v20 = vsub.f32 %v4437_v41, %v4437_v41  ;;  %v4435_v49 = vsel %vm8479_vm9, 1.0, %v4803_v36  ;;  %vm8480_vm9 = vcmp.eq.f32.partialorder %v5687_v15, 5.0 }
 0x341   :  { %v6965_v45 = vsub.f32 %v4435_v49, %v4435_v49  ;;  %v2559_v56 = vand.u32 4294901760, %v6755_v54 }
 0x342   :  { %4410 = vmatpush.xpose.msk.msrb.mxu3 %vm2082_vm1, %v4806_v10 }
 0x343   :  { %2230 = vmatpush.xpose.msrb.mxu1 %v2229_v14  ;;  %2690 = vmatpush.xpose.msra.mxu0 %v6923_v3  ;;  %v2258_v14 = vsub.f32 %v6722_v53, %v2257_v11  ;;  %v2560_v50 = vsub.f32 %v6755_v54, %v2559_v56 }
 0x344   :  { %2292 = vmatpush.xpose.msrb.mxu2 %v6610_v30  ;;  %v2241_v30 = vand.u32 4294901760, %v2240_v60 }
 0x345   :  { %v2259_v60 = vand.u32 4294901760, %v2258_v14  ;;  %v2561_v49 = vand.u32 4294901760, %v2560_v50  ;;  %v2589_v50 = vand.u32 4294901760, %v6836_v12 }
 0x346   :  { %4411 = vmatpush.xpose.msk.msrb.mxu3 %vm2081_vm14, %v4806_v10 }
 0x347   :  { %2236 = vmatpush.xpose.msrb.mxu1 %v2235_v47  ;;  %2693 = vmatpush.xpose.msra.mxu0 %v6937_v20  ;;  %v1572_v47 = vpop.f32.mrf.mxu3 }
 0x348   :  { %2295 = vmatpush.xpose.msrb.mxu2 %v6626_v38  ;;  %v1378_v38 = vpop.f32.mrf.mxu0 }
 0x349   :  { %v1480_v23 = vadd.f32 %v1479_v33, %v1378_v38 }
 0x34a   :  { %4412 = vmatpush.xpose.msk.msrb.mxu3 %vm2080_vm0, %v4806_v10 }
 0x34b   :  { %2242 = vmatpush.xpose.msrb.mxu1 %v2241_v30  ;;  %2696 = vmatpush.xpose.msra.mxu0 %v6951_v44  ;;  %v1534_v13 = vadd.f32 %v1533_v48, %v1480_v23  ;;  %v2565_v30 = vand.u32 4294901760, %v6774_v59 }
 0x34c   :  { %2298 = vmatpush.xpose.msrb.mxu2 %v6642_v46  ;;  %v4434_v46 = vsel %vm8481_vm8, 1.0, %v4803_v36 }
 0x34d   :  { %v6980_v41 = vsub.f32 %v4434_v46, %v4434_v46  ;;  %v1573_v11 = vadd.f32 %v1572_v47, %v1534_v13  ;;  %v2566_v38 = vsub.f32 %v6774_v59, %v2565_v30  ;;  %v2577_v46 = vand.u32 4294901760, %v6808_v27 }
 0x34e   :  { %4413 = vmatpush.xpose.msk.msrb.mxu3 %vm2079_vm5, %v4806_v10  ;;  %v2583_v47 = vand.u32 4294901760, %v6822_v63 }
 0x34f   :  { %2248 = vmatpush.xpose.msrb.mxu1 %v2247_v24  ;;  %2699 = vmatpush.xpose.msra.mxu0 %v6965_v45  ;;  %v2571_v24 = vand.u32 4294901760, %v6791_v52  ;;  %v2567_v23 = vand.u32 4294901760, %v2566_v38  ;;  %v2578_v14 = vsub.f32 %v6808_v27, %v2577_v46  ;;  %v2595_v38 = vand.u32 4294901760, %v6850_v42 }
 0x350   :  { %2301 = vmatpush.xpose.msrb.mxu2 %v6658_v37  ;;  %v4433_v37 = vsel %vm8480_vm9, 1.0, %v4803_v36  ;;  %v1641_v33 = vpop.f32.mrf.mxu0  ;;  %vm2875_vm9 = vcmp.eq.f32.partialorder %v5403_v5, 6.0 }
 0x351   :  { %v6994_v40 = vsub.f32 %v4433_v37, %v4433_v37  ;;  %v2572_v48 = vsub.f32 %v6791_v52, %v2571_v24 }
 0x352   :  { %4414 = vmatpush.xpose.msk.msrb.mxu3 %vm2078_vm11, %v4806_v10 }
 0x353   :  { %2254 = vmatpush.xpose.msrb.mxu1 %v2253_v57  ;;  %2702 = vmatpush.xpose.msra.mxu0 %v6980_v41  ;;  %v2573_v13 = vand.u32 4294901760, %v2572_v48 }
 0x354   :  { %2304 = vmatpush.xpose.msrb.mxu2 %v6674_v0  ;;  %v1642_v0 = vadd.f32 %v1641_v33, %v1573_v11  ;;  %v2584_v11 = vsub.f32 %v6822_v63, %v2583_v47 }
 0x356   :  { %4415 = vmatpush.xpose.msk.msrb.mxu3 %vm2077_vm2, %v4806_v10 }
 0x357   :  { %2260 = vmatpush.xpose.msrb.mxu1 %v2259_v60  ;;  %2705 = vmatpush.xpose.msra.mxu0 %v6994_v40  ;;  %v2579_v60 = vand.u32 4294901760, %v2578_v14 }
 0x358   :  { %2307 = vmatpush.xpose.msrb.mxu2 %v6690_v16  ;;  %v1678_v16 = vpop.f32.mrf.mxu1 }
 0x359   :  { %v1679_v58 = vadd.f32 %v1678_v16, %v1642_v0  ;;  %v2585_v0 = vand.u32 4294901760, %v2584_v11  ;;  %v8496_v11 = vand.u32 4294901760, %v6923_v3 }
 0x35a   :  { %4416 = vmatpush.xpose.msk.msrb.mxu3 %vm2076_vm4, %v4806_v10  ;;  %2262 = vmatmul.f32.vlgmr.msrb.gmra.mxu1 %v5804_v1 }
 0x35b   :  { %4417 = vmatpush.xpose.msk.msra.mxu1 %vm2091_vm3, %v4806_v10  ;;  %4513 = vmatpush.xpose.msk.msrb.mxu0 %vm2875_vm9, %v4806_v10  ;;  %vm2874_vm3 = vcmp.eq.f32.partialorder %v5377_v43, 6.0  ;;  %vm4049_vm8 = vcmp.gt.f32.partialorder %v1679_v58, 0.5 }
 0x35c   :  { %2708 = vmatmul.f32.vlgmr.msra.gmra.mxu0 %v5847_v9  ;;  %2310 = vmatpush.xpose.msrb.mxu2 %v6706_v55  ;;  %v4050_v55 = vsel %vm4049_vm8, 1, %v8671_v21 }
 0x35d   :  { %2355 = vmatmul.f32.vlgmr.msrb.gmra.mxu3 %v5863_v31  ;;  %v4051_v57 = vperm.slane %v4050_v55, 7 }
 0x35e   :  { %2562 = vmatpush.xpose.msra.mxu3 %v2561_v49  ;;  %v2590_v49 = vsub.f32 %v6836_v12, %v2589_v50 }
 0x35f   :  { %4418 = vmatpush.xpose.msk.msra.mxu1 %vm2090_vm13, %v4806_v10  ;;  %4514 = vmatpush.xpose.msk.msrb.mxu0 %vm2874_vm3, %v4806_v10  ;;  %vm8490_vm13 = vcmp.eq.f32.partialorder %v5384_v25, 6.0  ;;  %vm4052_vm8 = vcmp.eq.s32.totalorder %v4051_v57, 1  ;;  %v2607_v57 = vand.u32 4294901760, %v6886_v17 }
 0x360   :  { %2313 = vmatpush.xpose.msrb.mxu2 %v6722_v53  ;;  %v4053_v53 = vsel %vm4052_vm8, %v1679_v58, %v6858_v26  ;;  %vm8675_vm8 = vcmp.eq.f32.partialorder %v5377_v43, 5.0  ;;  %v2591_v16 = vand.u32 4294901760, %v2590_v49  ;;  %v2596_v58 = vsub.f32 %v6850_v42, %v2595_v38 }
 0x361   :  { %v4054_v37 = vsub.f32 %v4053_v53, %v6883_v7  ;;  %v2608_v14 = vsub.f32 %v6886_v17, %v2607_v57  ;;  %v2613_v53 = vand.u32 4294901760, %v6907_v62  ;;  %v8495_v49 = vand.u32 4294901760, %v6937_v20 }
 0x362   :  { %2568 = vmatpush.xpose.msra.mxu3 %v2567_v23  ;;  %v2601_v23 = vand.u32 4294901760, %v6866_v18  ;;  %v2597_v48 = vand.u32 4294901760, %v2596_v58 }
 0x363   :  { %4419 = vmatpush.xpose.msk.msra.mxu1 %vm2089_vm7, %v4806_v10  ;;  %4515 = vmatpush.xpose.msk.msrb.mxu0 %vm8490_vm13, %v4806_v10  ;;  %vm8482_vm7 = vcmp.eq.f32.partialorder %v5389_v6, 6.0  ;;  %v4055_v33 = vsel %vm6903_vm10, %v4054_v37, 0.0  ;;  %v2609_v37 = vand.u32 4294901760, %v2608_v14  ;;  %v2626_v58 = vsub.f32 %v6937_v20, %v8495_v49 }
 0x364   :  { %4449 = vmatpush.xpose.msk.msra.mxu2 %vm8483_vm12, %v4806_v10  ;;  %4056 = vst [vmem:[#allocation4 + $0x8] sm:$0xff] %v4055_v33  ;;  %vm8485_vm12 = vcmp.eq.f32.partialorder %v5429_v22, 6.0  ;;  %v2602_v55 = vsub.f32 %v6866_v18, %v2601_v23  ;;  %v8491_v14 = vand.u32 4294901760, %v6965_v45 }
 0x365   :  { %2316 = vmatmul.f32.vlgmr.msrb.gmra.mxu2 %v5847_v9 }
 0x366   :  { %2574 = vmatpush.xpose.msra.mxu3 %v2573_v13  ;;  %v2603_v13 = vand.u32 4294901760, %v2602_v55  ;;  %v2627_v55 = vand.u32 4294901760, %v2626_v58  ;;  %v8488_v58 = vand.u32 4294901760, %v6994_v40 }
 0x367   :  { %4420 = vmatpush.xpose.msk.msra.mxu1 %vm2088_vm6, %v4806_v10  ;;  %4516 = vmatpush.xpose.msk.msrb.mxu0 %vm8482_vm7, %v4806_v10  ;;  %vm8484_vm6 = vcmp.eq.f32.partialorder %v5399_v35, 6.0  ;;  %vm8676_vm7 = vcmp.eq.f32.partialorder %v5399_v35, 4.0 }
 0x368   :  { %4450 = vmatpush.xpose.msk.msra.mxu2 %vm8675_vm8, %v4806_v10  ;;  %vm8677_vm8 = vcmp.eq.f32.partialorder %v5384_v25, 5.0 }
 0x36a   :  { %2580 = vmatpush.xpose.msra.mxu3 %v2579_v60  ;;  %v2614_v60 = vsub.f32 %v6907_v62, %v2613_v53  ;;  %v8722_v62 = vand.u32 4294901760, %v6923_v3 }
 0x36b   :  { %4421 = vmatpush.xpose.msk.msra.mxu1 %vm8676_vm7, %v4806_v10  ;;  %4517 = vmatpush.xpose.msk.msrb.mxu0 %vm8484_vm6, %v4806_v10  ;;  %vm8678_vm7 = vcmp.eq.f32.partialorder %v5429_v22, 4.0  ;;  %vm8486_vm6 = vcmp.eq.f32.partialorder %v5456_v39, 6.0 }
 0x36c   :  { %4451 = vmatpush.xpose.msk.msra.mxu2 %vm8677_vm8, %v4806_v10  ;;  %vm8679_vm8 = vcmp.eq.f32.partialorder %v5389_v6, 5.0  ;;  %v2615_v33 = vand.u32 4294901760, %v2614_v60  ;;  %v2638_v60 = vsub.f32 %v6965_v45, %v8491_v14 }
 0x36e   :  { %2586 = vmatpush.xpose.msra.mxu3 %v2585_v0  ;;  %v2620_v0 = vsub.f32 %v6923_v3, %v8496_v11  ;;  %v8725_v3 = vand.u32 4294901760, %v6937_v20  ;;  %v8729_v20 = vand.u32 4294901760, %v6951_v44 }
 0x36f   :  { %4422 = vmatpush.xpose.msk.msra.mxu1 %vm8678_vm7, %v4806_v10  ;;  %4518 = vmatpush.xpose.msk.msrb.mxu0 %vm8485_vm12, %v4806_v10  ;;  %vm8680_vm7 = vcmp.eq.f32.partialorder %v5456_v39, 4.0  ;;  %vm8487_vm12 = vcmp.eq.f32.partialorder %v5478_v29, 6.0 }
 0x370   :  { %4452 = vmatpush.xpose.msk.msra.mxu2 %vm8679_vm8, %v4806_v10  ;;  %vm8681_vm8 = vcmp.eq.f32.partialorder %v5399_v35, 5.0 }
 0x372   :  { %2592 = vmatpush.xpose.msra.mxu3 %v2591_v16  ;;  %v2621_v16 = vand.u32 4294901760, %v2620_v0  ;;  %v2639_v0 = vand.u32 4294901760, %v2638_v60  ;;  %v2650_v60 = vsub.f32 %v6994_v40, %v8488_v58 }
 0x373   :  { %4423 = vmatpush.xpose.msk.msra.mxu1 %vm8680_vm7, %v4806_v10  ;;  %4519 = vmatpush.xpose.msk.msrb.mxu0 %vm8486_vm6, %v4806_v10  ;;  %vm8682_vm7 = vcmp.eq.f32.partialorder %v5478_v29, 4.0  ;;  %vm2867_vm6 = vcmp.eq.f32.partialorder %v5501_v61, 6.0 }
 0x374   :  { %4453 = vmatpush.xpose.msk.msra.mxu2 %vm8681_vm8, %v4806_v10  ;;  %vm8683_vm8 = vcmp.eq.f32.partialorder %v5429_v22, 5.0  ;;  %v2651_v58 = vand.u32 4294901760, %v2650_v60 }
 0x376   :  { %2598 = vmatpush.xpose.msra.mxu3 %v2597_v48  ;;  %v8492_v48 = vand.u32 4294901760, %v6951_v44 }
 0x377   :  { %4424 = vmatpush.xpose.msk.msra.mxu1 %vm8682_vm7, %v4806_v10  ;;  %4520 = vmatpush.xpose.msk.msrb.mxu0 %vm8487_vm12, %v4806_v10  ;;  %vm8684_vm7 = vcmp.eq.f32.partialorder %v5501_v61, 4.0  ;;  %vm2866_vm12 = vcmp.eq.f32.partialorder %v5524_v32, 6.0 }
 0x378   :  { %4454 = vmatpush.xpose.msk.msra.mxu2 %vm8683_vm8, %v4806_v10  ;;  %vm8685_vm8 = vcmp.eq.f32.partialorder %v5456_v39, 5.0 }
 0x37a   :  { %2604 = vmatpush.xpose.msra.mxu3 %v2603_v13  ;;  %v2632_v13 = vsub.f32 %v6951_v44, %v8492_v48  ;;  %v1770_v48 = vpop.f32.mrf.mxu2 }
 0x37b   :  { %4425 = vmatpush.xpose.msk.msra.mxu1 %vm8684_vm7, %v4806_v10  ;;  %4521 = vmatpush.xpose.msk.msrb.mxu0 %vm2867_vm6, %v4806_v10  ;;  %vm8686_vm7 = vcmp.eq.f32.partialorder %v5478_v29, 5.0 }
 0x37c   :  { %4455 = vmatpush.xpose.msk.msra.mxu2 %vm8685_vm8, %v4806_v10  ;;  %vm2865_vm8 = vcmp.eq.f32.partialorder %v5547_v51, 6.0 }
 0x37e   :  { %2610 = vmatpush.xpose.msra.mxu3 %v2609_v37  ;;  %v2633_v37 = vand.u32 4294901760, %v2632_v13 }
 0x37f   :  { %4426 = vmatpush.xpose.msk.msra.mxu1 %vm2082_vm1, %v4806_v10  ;;  %4522 = vmatpush.xpose.msk.msrb.mxu0 %vm2866_vm12, %v4806_v10  ;;  %vm8687_vm1 = vcmp.eq.f32.partialorder %v5501_v61, 5.0 }
 0x380   :  { %4456 = vmatpush.xpose.msk.msra.mxu2 %vm8686_vm7, %v4806_v10  ;;  %vm2864_vm7 = vcmp.eq.f32.partialorder %v5590_v4, 6.0 }
 0x382   :  { %2616 = vmatpush.xpose.msra.mxu3 %v2615_v33  ;;  %v8489_v33 = vand.u32 4294901760, %v6980_v41 }
 0x383   :  { %4427 = vmatpush.xpose.msk.msra.mxu1 %vm2081_vm14, %v4806_v10  ;;  %4523 = vmatpush.xpose.msk.msrb.mxu0 %vm2865_vm8, %v4806_v10  ;;  %vm2863_vm14 = vcmp.eq.f32.partialorder %v5620_v8, 6.0 }
 0x384   :  { %4457 = vmatpush.xpose.msk.msra.mxu2 %vm8687_vm1, %v4806_v10  ;;  %vm2862_vm1 = vcmp.eq.f32.partialorder %v5615_v2, 6.0 }
 0x386   :  { %2622 = vmatpush.xpose.msra.mxu3 %v2621_v16  ;;  %v2644_v16 = vsub.f32 %v6980_v41, %v8489_v33  ;;  %v4510_v33 = vsel %vm8490_vm13, 1.0, %v4803_v36  ;;  %vm8696_vm13 = vcmp.eq.f32.partialorder %v5377_v43, 5.0 }
 0x387   :  { %4428 = vmatpush.xpose.msk.msra.mxu1 %vm2080_vm0, %v4806_v10  ;;  %4524 = vmatpush.xpose.msk.msrb.mxu0 %vm2864_vm7, %v4806_v10  ;;  %vm8688_vm0 = vcmp.eq.f32.partialorder %v5547_v51, 5.0 }
 0x388   :  { %4458 = vmatpush.xpose.msk.msra.mxu2 %vm2474_vm15, %v4806_v10 }
 0x38a   :  { %2628 = vmatpush.xpose.msra.mxu3 %v2627_v55  ;;  %v4512_v55 = vsel %vm2875_vm9, 1.0, %v4803_v36 }
 0x38b   :  { %4429 = vmatpush.xpose.msk.msra.mxu1 %vm2079_vm5, %v4806_v10  ;;  %4525 = vmatpush.xpose.msk.msrb.mxu0 %vm2863_vm14, %v4806_v10  ;;  %vm8689_vm5 = vcmp.eq.f32.partialorder %v5590_v4, 5.0  ;;  %v7206_v13 = vsub.f32 %v4512_v55, %v4512_v55 }
 0x38c   :  { %4459 = vmatpush.xpose.msk.msra.mxu2 %vm8688_vm0, %v4806_v10  ;;  %vm8690_vm0 = vcmp.eq.f32.partialorder %v5620_v8, 5.0 }
 0x38e   :  { %2634 = vmatpush.xpose.msra.mxu3 %v2633_v37  ;;  %v2645_v37 = vand.u32 4294901760, %v2644_v16  ;;  %v8493_v16 = vand.u32 4294901760, %v7206_v13 }
 0x38f   :  { %4430 = vmatpush.xpose.msk.msra.mxu1 %vm2078_vm11, %v4806_v10  ;;  %4526 = vmatpush.xpose.msk.msrb.mxu0 %vm2862_vm1, %v4806_v10  ;;  %vm2861_vm11 = vcmp.eq.f32.partialorder %v5665_v34, 6.0 }
 0x390   :  { %4460 = vmatpush.xpose.msk.msra.mxu2 %vm8689_vm5, %v4806_v10  ;;  %vm8691_vm5 = vcmp.eq.f32.partialorder %v5615_v2, 5.0 }
 0x392   :  { %2640 = vmatpush.xpose.msra.mxu3 %v2639_v0  ;;  %v4511_v0 = vsel %vm2874_vm3, 1.0, %v4803_v36 }
 0x393   :  { %4431 = vmatpush.xpose.msk.msra.mxu1 %vm2077_vm2, %v4806_v10  ;;  %4527 = vmatpush.xpose.msk.msrb.mxu0 %vm2861_vm11, %v4806_v10  ;;  %vm8512_vm2 = vcmp.eq.f32.partialorder %v5687_v15, 6.0  ;;  %v7224_v55 = vsub.f32 %v4511_v0, %v4511_v0 }
 0x394   :  { %4461 = vmatpush.xpose.msk.msra.mxu2 %vm8690_vm0, %v4806_v10  ;;  %vm8692_vm0 = vcmp.eq.f32.partialorder %v5403_v5, 5.0 }
 0x395   :  { %v8494_v60 = vand.u32 4294901760, %v7224_v55  ;;  %v8732_v44 = vand.u32 4294901760, %v7224_v55 }
 0x396   :  { %2646 = vmatpush.xpose.msra.mxu3 %v2645_v37  ;;  %v7248_v37 = vsub.f32 %v4510_v33, %v4510_v33  ;;  %v1871_v33 = vpop.f32.mrf.mxu3 }
 0x397   :  { %4432 = vmatpush.xpose.msk.msra.mxu1 %vm2076_vm4, %v4806_v10  ;;  %4528 = vmatpush.xpose.msk.msrb.mxu0 %vm8512_vm2, %v4806_v10  ;;  %vm8693_vm4 = vmmov %vm8692_vm0 }
 0x398   :  { %4462 = vmatpush.xpose.msk.msra.mxu2 %vm8691_vm5, %v4806_v10  ;;  %vm8694_vm5 = vcmp.eq.f32.partialorder %v5389_v6, 6.0  ;;  %v8497_v14 = vand.u32 4294901760, %v7248_v37 }
 0x399   :  { %v4509_v0 = vsel %vm8694_vm5, 1.0, %v4803_v36  ;;  %vm8698_vm5 = vcmp.eq.f32.partialorder %v5399_v35, 6.0 }
 0x39a   :  { %2652 = vmatpush.xpose.msra.mxu3 %v2651_v58  ;;  %2461 = vmatmul.f32.vlgmr.msra.gmra.mxu1 %v5804_v1  ;;  %v7267_v58 = vsub.f32 %v4509_v0, %v4509_v0  ;;  %v1925_v0 = vpop.f32.mrf.mxu0 }
 0x39b   :  { %4465 = vmatpush.xpose.msk.msrb.mxu1 %vm8692_vm0, %v4806_v10  ;;  %3146 = vmatpush.xpose.msra.mxu0 %v8493_v16  ;;  %vm8695_vm0 = vcmp.eq.f32.partialorder %v5665_v34, 5.0  ;;  %v4508_v16 = vsel %vm8698_vm5, 1.0, %v4803_v36  ;;  %vm8702_vm5 = vcmp.eq.f32.partialorder %v5429_v22, 6.0 }
 0x39c   :  { %2945 = vmatmul.f32.vlgmr.msrb.gmra.mxu0 %v5884_v19  ;;  %4463 = vmatpush.xpose.msk.msra.mxu2 %vm8695_vm0, %v4806_v10  ;;  %vm8700_vm0 = vcmp.eq.f32.partialorder %v5384_v25, 5.0  ;;  %v7286_v49 = vsub.f32 %v4508_v16, %v4508_v16  ;;  %v2969_v11 = vand.u32 4294901760, %v7267_v58 }
 0x39d   :  { %2654 = vmatmul.f32.vlgmr.msra.gmra.mxu3 %v5804_v1 }
 0x39e   :  { %4481 = vmatpush.xpose.msk.msrb.mxu3 %vm8693_vm4, %v4806_v10  ;;  %vm8697_vm4 = vmmov %vm8696_vm13 }
 0x39f   :  { %4466 = vmatpush.xpose.msk.msrb.mxu1 %vm8696_vm13, %v4806_v10  ;;  %3150 = vmatpush.xpose.msra.mxu0 %v8494_v60  ;;  %vm8699_vm13 = vcmp.eq.f32.partialorder %v5687_v15, 5.0  ;;  %v1872_v60 = vadd.f32 %v1871_v33, %v1770_v48  ;;  %v4507_v48 = vsel %vm8702_vm5, 1.0, %v4803_v36  ;;  %v2975_v33 = vand.u32 4294901760, %v7286_v49 }
 0x3a0   :  { %4464 = vmatpush.xpose.msk.msra.mxu2 %vm8699_vm13, %v4806_v10  ;;  %vm8703_vm13 = vcmp.eq.f32.partialorder %v5389_v6, 5.0  ;;  %v7303_v16 = vsub.f32 %v4507_v48, %v4507_v48  ;;  %vm8706_vm5 = vcmp.eq.f32.partialorder %v5399_v35, 5.0  ;;  %v2070_v48 = vpop.f32.mrf.mxu3 }
 0x3a1   :  { %v1926_v54 = vadd.f32 %v1925_v0, %v1872_v60 }
 0x3a2   :  { %4482 = vmatpush.xpose.msk.msrb.mxu3 %vm8697_vm4, %v4806_v10  ;;  %vm8701_vm4 = vmmov %vm8700_vm0  ;;  %v2981_v0 = vand.u32 4294901760, %v7303_v16 }
 0x3a3   :  { %4467 = vmatpush.xpose.msk.msrb.mxu1 %vm8700_vm0, %v4806_v10  ;;  %3154 = vmatpush.xpose.msra.mxu0 %v8497_v14  ;;  %vm8704_vm0 = vmmov %vm8703_vm13 }
 0x3a4   :  { %2754 = vmatpush.xpose.msrb.mxu2 %v2559_v56  ;;  %v1964_v56 = vpop.f32.mrf.mxu1 }
 0x3a5   :  { %2553 = vmatmul.f32.vlgmr.msra.gmra.mxu2 %v5884_v19  ;;  %v1965_v60 = vadd.f32 %v1964_v56, %v1926_v54 }
 0x3a6   :  { %4483 = vmatpush.xpose.msk.msrb.mxu3 %vm8701_vm4, %v4806_v10  ;;  %vm8705_vm4 = vcmp.eq.f32.partialorder %v5456_v39, 6.0 }
 0x3a7   :  { %4468 = vmatpush.xpose.msk.msrb.mxu1 %vm8703_vm13, %v4806_v10  ;;  %3158 = vmatpush.xpose.msra.mxu0 %v2969_v11  ;;  %v4506_v14 = vsel %vm8705_vm4, 1.0, %v4803_v36  ;;  %vm8707_vm13 = vmmov %vm8706_vm5  ;;  %vm8709_vm4 = vcmp.eq.f32.partialorder %v5429_v22, 5.0 }
 0x3a8   :  { %2758 = vmatpush.xpose.msrb.mxu2 %v2565_v30  ;;  %v7319_v59 = vsub.f32 %v4506_v14, %v4506_v14  ;;  %v2033_v30 = vpop.f32.mrf.mxu2 }
 0x3a9   :  { %v2034_v56 = vadd.f32 %v2033_v30, %v1965_v60  ;;  %v4504_v60 = vsel %vm2867_vm6, 1.0, %v4803_v36 }
 0x3aa   :  { %4484 = vmatpush.xpose.msk.msrb.mxu3 %vm8704_vm0, %v4806_v10  ;;  %vm8708_vm0 = vcmp.eq.f32.partialorder %v5478_v29, 6.0  ;;  %v2987_v14 = vand.u32 4294901760, %v7319_v59  ;;  %v7352_v30 = vsub.f32 %v4504_v60, %v4504_v60 }
 0x3ab   :  { %4469 = vmatpush.xpose.msk.msrb.mxu1 %vm8706_vm5, %v4806_v10  ;;  %3162 = vmatpush.xpose.msra.mxu0 %v2975_v33  ;;  %v4505_v54 = vsel %vm8708_vm0, 1.0, %v4803_v36  ;;  %v2071_v52 = vadd.f32 %v2070_v48, %v2034_v56  ;;  %vm8710_vm5 = vmmov %vm8709_vm4  ;;  %vm8711_vm0 = vcmp.eq.f32.partialorder %v5456_v39, 5.0 }
 0x3ac   :  { %2762 = vmatpush.xpose.msrb.mxu2 %v2571_v24  ;;  %v7335_v24 = vsub.f32 %v4505_v54, %v4505_v54  ;;  %v4503_v54 = vsel %vm2866_vm12, 1.0, %v4803_v36  ;;  %v2999_v60 = vand.u32 4294901760, %v7352_v30 }
 0x3ad   :  { %v7370_v56 = vsub.f32 %v4503_v54, %v4503_v54  ;;  %v4499_v54 = vsel %vm2862_vm1, 1.0, %v4803_v36 }
 0x3ae   :  { %4485 = vmatpush.xpose.msk.msrb.mxu3 %vm8707_vm13, %v4806_v10  ;;  %vm4058_vm13 = vcmp.gt.f32.partialorder %v2071_v52, 0.5  ;;  %v2993_v48 = vand.u32 4294901760, %v7335_v24  ;;  %v7436_v17 = vsub.f32 %v4499_v54, %v4499_v54 }
 0x3af   :  { %4470 = vmatpush.xpose.msk.msrb.mxu1 %vm8709_vm4, %v4806_v10  ;;  %3166 = vmatpush.xpose.msra.mxu0 %v2981_v0  ;;  %v4059_v27 = vsel %vm4058_vm13, 1, %v8671_v21  ;;  %vm8712_vm4 = vmmov %vm8711_vm0  ;;  %vm8713_vm13 = vcmp.eq.f32.partialorder %v5478_v29, 5.0 }
 0x3b0   :  { %2766 = vmatpush.xpose.msrb.mxu2 %v2577_v46  ;;  %v4060_v46 = vperm.slane %v4059_v27, 7 }
 0x3b2   :  { %4486 = vmatpush.xpose.msk.msrb.mxu3 %vm8710_vm5, %v4806_v10  ;;  %vm4061_vm5 = vcmp.eq.s32.totalorder %v4060_v46, 1  ;;  %v4500_v46 = vsel %vm2863_vm14, 1.0, %v4803_v36 }
 0x3b3   :  { %4471 = vmatpush.xpose.msk.msrb.mxu1 %vm8711_vm0, %v4806_v10  ;;  %3170 = vmatpush.xpose.msra.mxu0 %v2987_v14  ;;  %v4062_v63 = vsel %vm4061_vm5, %v2071_v52, %v6858_v26  ;;  %vm8714_vm0 = vmmov %vm8713_vm13  ;;  %v4502_v52 = vsel %vm2865_vm8, 1.0, %v4803_v36  ;;  %v7420_v18 = vsub.f32 %v4500_v46, %v4500_v46  ;;  %v8728_v46 = vand.u32 4294901760, %v7206_v13 }
 0x3b4   :  { %2770 = vmatpush.xpose.msrb.mxu2 %v2583_v47  ;;  %v4063_v47 = vsub.f32 %v4062_v63, %v6883_v7  ;;  %v7388_v12 = vsub.f32 %v4502_v52, %v4502_v52  ;;  %v3005_v7 = vand.u32 4294901760, %v7370_v56  ;;  %v4498_v63 = vsel %vm2861_vm11, 1.0, %v4803_v36 }
 0x3b5   :  { %v4497_v52 = vsel %vm8512_vm2, 1.0, %v4803_v36  ;;  %v2952_v54 = vsub.f32 %v7206_v13, %v8728_v46  ;;  %v2958_v46 = vsub.f32 %v7224_v55, %v8732_v44  ;;  %v8736_v44 = vand.u32 4294901760, %v6980_v41 }
 0x3b6   :  { %4487 = vmatpush.xpose.msk.msrb.mxu3 %vm8712_vm4, %v4806_v10  ;;  %v4064_v27 = vsel %vm6903_vm10, %v4063_v47, 0.0  ;;  %vm8715_vm4 = vcmp.eq.f32.partialorder %v5501_v61, 5.0  ;;  %v3029_v47 = vand.u32 4294901760, %v7436_v17  ;;  %v2970_v41 = vsub.f32 %v7267_v58, %v2969_v11 }
 0x3b7   :  { %4472 = vmatpush.xpose.msk.msrb.mxu1 %vm8713_vm13, %v4806_v10  ;;  %3174 = vmatpush.xpose.msra.mxu0 %v2993_v48  ;;  %4065 = vst [vmem:[#allocation4 + $0x10] sm:$0xff] %v4064_v27  ;;  %vm8716_vm5 = vmmov %vm8715_vm4  ;;  %vm8717_vm13 = vcmp.eq.f32.partialorder %v5547_v51, 5.0  ;;  %v7469_v27 = vsub.f32 %v4497_v52, %v4497_v52  ;;  %v2953_v52 = vand.u32 4294901760, %v2952_v54 }
 0x3b8   :  { %2774 = vmatpush.xpose.msrb.mxu2 %v2589_v50  ;;  %v4501_v50 = vsel %vm2864_vm7, 1.0, %v4803_v36  ;;  %v2971_v11 = vand.u32 4294901760, %v2970_v41 }
 0x3b9   :  { %v7404_v42 = vsub.f32 %v4501_v50, %v4501_v50 }
 0x3ba   :  { %4488 = vmatpush.xpose.msk.msrb.mxu3 %vm8714_vm0, %v4806_v10  ;;  %vm8719_vm0 = vcmp.eq.f32.partialorder %v5590_v4, 5.0 }
 0x3bb   :  { %4473 = vmatpush.xpose.msk.msrb.mxu1 %vm8715_vm4, %v4806_v10  ;;  %3178 = vmatpush.xpose.msra.mxu0 %v2999_v60  ;;  %vm8720_vm4 = vmmov %vm8719_vm0 }
 0x3bc   :  { %2778 = vmatpush.xpose.msrb.mxu2 %v2595_v38  ;;  %v3011_v38 = vand.u32 4294901760, %v7388_v12 }
 0x3be   :  { %4489 = vmatpush.xpose.msk.msrb.mxu3 %vm8716_vm5, %v4806_v10  ;;  %vm8721_vm5 = vcmp.eq.f32.partialorder %v5620_v8, 5.0 }
 0x3bf   :  { %4474 = vmatpush.xpose.msk.msrb.mxu1 %vm2474_vm15, %v4806_v10  ;;  %3182 = vmatpush.xpose.msra.mxu0 %v3005_v7 }
 0x3c0   :  { %2782 = vmatpush.xpose.msrb.mxu2 %v2601_v23  ;;  %v3017_v23 = vand.u32 4294901760, %v7404_v42 }
 0x3c2   :  { %4490 = vmatpush.xpose.msk.msrb.mxu3 %vm2474_vm15, %v4806_v10  ;;  %vm8718_vm15 = vmmov %vm8717_vm13 }
 0x3c3   :  { %4475 = vmatpush.xpose.msk.msrb.mxu1 %vm8717_vm13, %v4806_v10  ;;  %3186 = vmatpush.xpose.msra.mxu0 %v3011_v38  ;;  %vm8723_vm13 = vmmov %vm8721_vm5 }
 0x3c4   :  { %2786 = vmatpush.xpose.msrb.mxu2 %v2607_v57  ;;  %v3023_v57 = vand.u32 4294901760, %v7420_v18 }
 0x3c6   :  { %4491 = vmatpush.xpose.msk.msrb.mxu3 %vm8718_vm15, %v4806_v10  ;;  %vm8724_vm15 = vcmp.eq.f32.partialorder %v5615_v2, 5.0 }
 0x3c7   :  { %4476 = vmatpush.xpose.msk.msrb.mxu1 %vm8719_vm0, %v4806_v10  ;;  %3190 = vmatpush.xpose.msra.mxu0 %v3017_v23  ;;  %vm8726_vm0 = vmmov %vm8724_vm15 }
 0x3c8   :  { %2790 = vmatpush.xpose.msrb.mxu2 %v2613_v53  ;;  %v7452_v53 = vsub.f32 %v4498_v63, %v4498_v63 }
 0x3ca   :  { %4492 = vmatpush.xpose.msk.msrb.mxu3 %vm8720_vm4, %v4806_v10  ;;  %vm3267_vm4 = vcmp.eq.f32.partialorder %v5403_v5, 7.0  ;;  %v8498_v50 = vand.u32 4294901760, %v7452_v53 }
 0x3cb   :  { %4477 = vmatpush.xpose.msk.msrb.mxu1 %vm8721_vm5, %v4806_v10  ;;  %3194 = vmatpush.xpose.msra.mxu0 %v3023_v57  ;;  %vm8727_vm5 = vcmp.eq.f32.partialorder %v5665_v34, 5.0  ;;  %v4576_v63 = vsel %vm3267_vm4, 1.0, %v4803_v36 }
 0x3cc   :  { %2794 = vmatpush.xpose.msrb.mxu2 %v8722_v62  ;;  %v3041_v62 = vand.u32 4294901760, %v7469_v27 }
 0x3ce   :  { %4493 = vmatpush.xpose.msk.msrb.mxu3 %vm8723_vm13, %v4806_v10  ;;  %vm8730_vm13 = vmmov %vm8727_vm5 }
 0x3cf   :  { %4478 = vmatpush.xpose.msk.msrb.mxu1 %vm8724_vm15, %v4806_v10  ;;  %3198 = vmatpush.xpose.msra.mxu0 %v3029_v47  ;;  %vm8514_vm15 = vcmp.eq.f32.partialorder %v5377_v43, 7.0 }
 0x3d0   :  { %2798 = vmatpush.xpose.msrb.mxu2 %v8725_v3  ;;  %v7493_v3 = vsub.f32 %v4576_v63, %v4576_v63  ;;  %v8735_v63 = vand.u32 4294901760, %v7248_v37 }
 0x3d2   :  { %4494 = vmatpush.xpose.msk.msrb.mxu3 %vm8726_vm0, %v4806_v10  ;;  %vm8731_vm0 = vcmp.eq.f32.partialorder %v5687_v15, 5.0 }
 0x3d3   :  { %4479 = vmatpush.xpose.msk.msrb.mxu1 %vm8727_vm5, %v4806_v10  ;;  %3202 = vmatpush.xpose.msra.mxu0 %v8498_v50  ;;  %v4575_v50 = vsel %vm8514_vm15, 1.0, %v4803_v36  ;;  %vm8499_vm5 = vcmp.eq.f32.partialorder %v5384_v25, 7.0 }
 0x3d4   :  { %2802 = vmatpush.xpose.msrb.mxu2 %v8729_v20  ;;  %v8733_v20 = vand.u32 4294901760, %v6965_v45  ;;  %v2959_v45 = vand.u32 4294901760, %v2958_v46  ;;  %v7514_v54 = vsub.f32 %v4575_v50, %v4575_v50 }
 0x3d6   :  { %4495 = vmatpush.xpose.msk.msrb.mxu3 %vm8730_vm13, %v4806_v10  ;;  %vm8734_vm13 = vmmov %vm8731_vm0 }
 0x3d7   :  { %4480 = vmatpush.xpose.msk.msrb.mxu1 %vm8731_vm0, %v4806_v10  ;;  %3206 = vmatpush.xpose.msra.mxu0 %v3041_v62  ;;  %vm8500_vm0 = vcmp.eq.f32.partialorder %v5389_v6, 7.0 }
 0x3d8   :  { %2806 = vmatpush.xpose.msrb.mxu2 %v8733_v20  ;;  %v4574_v20 = vsel %vm8499_vm5, 1.0, %v4803_v36  ;;  %vm8738_vm5 = vcmp.eq.f32.partialorder %v5384_v25, 6.0 }
 0x3d9   :  { %v7531_v46 = vsub.f32 %v4574_v20, %v4574_v20 }
 0x3da   :  { %4496 = vmatpush.xpose.msk.msrb.mxu3 %vm8734_vm13, %v4806_v10  ;;  %2747 = vmatmul.f32.vlgmr.msrb.gmra.mxu1 %v5863_v31  ;;  %vm8501_vm13 = vcmp.eq.f32.partialorder %v5399_v35, 7.0 }
 0x3db   :  { %2954 = vmatpush.xpose.msra.mxu1 %v2953_v52  ;;  %3444 = vmatpush.xpose.msrb.mxu0 %v7493_v3  ;;  %v2964_v52 = vsub.f32 %v7248_v37, %v8735_v63  ;;  %v8737_v63 = vand.u32 4294901760, %v6994_v40 }
 0x3dc   :  { %3208 = vmatmul.f32.vlgmr.msra.gmra.mxu0 %v5804_v1  ;;  %2810 = vmatpush.xpose.msrb.mxu2 %v8736_v44  ;;  %v4572_v44 = vsel %vm8501_vm13, 1.0, %v4803_v36  ;;  %vm8503_vm13 = vcmp.eq.f32.partialorder %v5456_v39, 7.0 }
 0x3dd   :  { %2853 = vmatmul.f32.vlgmr.msrb.gmra.mxu3 %v5804_v1  ;;  %v2965_v50 = vand.u32 4294901760, %v2964_v52  ;;  %v2976_v52 = vsub.f32 %v7286_v49, %v2975_v33  ;;  %v7562_v20 = vsub.f32 %v4572_v44, %v4572_v44  ;;  %v2982_v33 = vsub.f32 %v7303_v16, %v2981_v0 }
 0x3de   :  { %4529 = vmatpush.xpose.msk.msra.mxu3 %vm2875_vm9, %v4806_v10  ;;  %v2988_v0 = vsub.f32 %v7319_v59, %v2987_v14  ;;  %v2994_v14 = vsub.f32 %v7335_v24, %v2993_v48  ;;  %v3000_v48 = vsub.f32 %v7352_v30, %v2999_v60  ;;  %v3006_v60 = vsub.f32 %v7370_v56, %v3005_v7 }
 0x3df   :  { %2960 = vmatpush.xpose.msra.mxu1 %v2959_v45  ;;  %3447 = vmatpush.xpose.msrb.mxu0 %v7514_v54  ;;  %v4573_v45 = vsel %vm8500_vm0, 1.0, %v4803_v36  ;;  %vm8502_vm0 = vcmp.eq.f32.partialorder %v5429_v22, 7.0  ;;  %v3012_v7 = vsub.f32 %v7388_v12, %v3011_v38  ;;  %v3018_v38 = vsub.f32 %v7404_v42, %v3017_v23 }
 0x3e0   :  { %2814 = vmatpush.xpose.msrb.mxu2 %v8737_v63  ;;  %v7548_v40 = vsub.f32 %v4573_v45, %v4573_v45  ;;  %v4570_v63 = vsel %vm8503_vm13, 1.0, %v4803_v36  ;;  %vm8505_vm13 = vcmp.eq.f32.partialorder %v5501_v61, 7.0  ;;  %v3024_v23 = vsub.f32 %v7420_v18, %v3023_v57 }
 0x3e1   :  { %v7590_v45 = vsub.f32 %v4570_v63, %v4570_v63  ;;  %v4568_v44 = vsel %vm8505_vm13, 1.0, %v4803_v36  ;;  %vm8506_vm13 = vcmp.eq.f32.partialorder %v5547_v51, 7.0  ;;  %v3030_v57 = vsub.f32 %v7436_v17, %v3029_v47 }
 0x3e2   :  { %4530 = vmatpush.xpose.msk.msra.mxu3 %vm2874_vm3, %v4806_v10  ;;  %v8744_v47 = vand.u32 4294901760, %v7452_v53 }
 0x3e3   :  { %2966 = vmatpush.xpose.msra.mxu1 %v2965_v50  ;;  %3450 = vmatpush.xpose.msrb.mxu0 %v7531_v46  ;;  %v4571_v50 = vsel %vm8502_vm0, 1.0, %v4803_v36  ;;  %vm8504_vm0 = vcmp.eq.f32.partialorder %v5478_v29, 7.0 }
 0x3e4   :  { %3052 = vmatpush.xpose.msra.mxu2 %v7206_v13  ;;  %v2977_v13 = vand.u32 4294901760, %v2976_v52  ;;  %v7576_v41 = vsub.f32 %v4571_v50, %v4571_v50 }
 0x3e5   :  { %2816 = vmatmul.f32.vlgmr.msrb.gmra.mxu2 %v5804_v1 }
 0x3e6   :  { %4531 = vmatpush.xpose.msk.msra.mxu3 %vm8738_vm5, %v4806_v10  ;;  %vm8739_vm5 = vcmp.eq.f32.partialorder %v5389_v6, 6.0 }
 0x3e7   :  { %2972 = vmatpush.xpose.msra.mxu1 %v2971_v11  ;;  %3453 = vmatpush.xpose.msrb.mxu0 %v7548_v40  ;;  %v4569_v11 = vsel %vm8504_vm0, 1.0, %v4803_v36  ;;  %vm3258_vm0 = vcmp.eq.f32.partialorder %v5524_v32, 7.0 }
 0x3e8   :  { %3055 = vmatpush.xpose.msra.mxu2 %v7224_v55  ;;  %v2983_v55 = vand.u32 4294901760, %v2982_v33  ;;  %v7604_v52 = vsub.f32 %v4569_v11, %v4569_v11  ;;  %v4567_v33 = vsel %vm3258_vm0, 1.0, %v4803_v36 }
 0x3e9   :  { %v7632_v50 = vsub.f32 %v4567_v33, %v4567_v33 }
 0x3ea   :  { %4532 = vmatpush.xpose.msk.msra.mxu3 %vm8739_vm5, %v4806_v10  ;;  %vm8740_vm5 = vcmp.eq.f32.partialorder %v5399_v35, 6.0 }
 0x3eb   :  { %2978 = vmatpush.xpose.msra.mxu1 %v2977_v13  ;;  %3456 = vmatpush.xpose.msrb.mxu0 %v7562_v20  ;;  %v7618_v13 = vsub.f32 %v4568_v44, %v4568_v44  ;;  %v3031_v44 = vand.u32 4294901760, %v3030_v57 }
 0x3ec   :  { %3058 = vmatpush.xpose.msra.mxu2 %v7248_v37  ;;  %v2989_v37 = vand.u32 4294901760, %v2988_v0 }
 0x3ee   :  { %4533 = vmatpush.xpose.msk.msra.mxu3 %vm8740_vm5, %v4806_v10  ;;  %vm8741_vm5 = vcmp.eq.f32.partialorder %v5429_v22, 6.0 }
 0x3ef   :  { %2984 = vmatpush.xpose.msra.mxu1 %v2983_v55  ;;  %3459 = vmatpush.xpose.msrb.mxu0 %v7576_v41  ;;  %v4566_v55 = vsel %vm8506_vm13, 1.0, %v4803_v36  ;;  %vm8508_vm13 = vcmp.eq.f32.partialorder %v5620_v8, 7.0 }
 0x3f0   :  { %3061 = vmatpush.xpose.msra.mxu2 %v7267_v58  ;;  %v2995_v58 = vand.u32 4294901760, %v2994_v14  ;;  %v7646_v0 = vsub.f32 %v4566_v55, %v4566_v55  ;;  %v4564_v14 = vsel %vm8508_vm13, 1.0, %v4803_v36  ;;  %vm8511_vm13 = vcmp.eq.f32.partialorder %v5665_v34, 7.0 }
 0x3f1   :  { %v7674_v11 = vsub.f32 %v4564_v14, %v4564_v14  ;;  %v3349_v14 = vand.u32 4294901760, %v7514_v54 }
 0x3f2   :  { %4534 = vmatpush.xpose.msk.msra.mxu3 %vm8741_vm5, %v4806_v10  ;;  %vm8742_vm5 = vcmp.eq.f32.partialorder %v5456_v39, 6.0 }
 0x3f3   :  { %2990 = vmatpush.xpose.msra.mxu1 %v2989_v37  ;;  %3462 = vmatpush.xpose.msrb.mxu0 %v7590_v45 }
 0x3f4   :  { %3064 = vmatpush.xpose.msra.mxu2 %v7286_v49  ;;  %v3001_v49 = vand.u32 4294901760, %v3000_v48  ;;  %v2263_v48 = vpop.f32.mrf.mxu1 }
 0x3f6   :  { %4535 = vmatpush.xpose.msk.msra.mxu3 %vm8742_vm5, %v4806_v10  ;;  %vm8743_vm5 = vcmp.eq.f32.partialorder %v5478_v29, 6.0 }
 0x3f7   :  { %2996 = vmatpush.xpose.msra.mxu1 %v2995_v58  ;;  %3465 = vmatpush.xpose.msrb.mxu0 %v7604_v52 }
 0x3f8   :  { %3067 = vmatpush.xpose.msra.mxu2 %v7303_v16  ;;  %v3007_v16 = vand.u32 4294901760, %v3006_v60  ;;  %v3036_v60 = vsub.f32 %v7452_v53, %v8744_v47 }
 0x3fa   :  { %4536 = vmatpush.xpose.msk.msra.mxu3 %vm8743_vm5, %v4806_v10  ;;  %vm8507_vm5 = vcmp.eq.f32.partialorder %v5590_v4, 7.0  ;;  %v3037_v55 = vand.u32 4294901760, %v3036_v60 }
 0x3fb   :  { %3002 = vmatpush.xpose.msra.mxu1 %v3001_v49  ;;  %3468 = vmatpush.xpose.msrb.mxu0 %v7618_v13  ;;  %v4565_v63 = vsel %vm8507_vm5, 1.0, %v4803_v36  ;;  %vm8509_vm5 = vcmp.eq.f32.partialorder %v5615_v2, 7.0 }
 0x3fc   :  { %3070 = vmatpush.xpose.msra.mxu2 %v7319_v59  ;;  %v3013_v59 = vand.u32 4294901760, %v3012_v7  ;;  %v7660_v37 = vsub.f32 %v4565_v63, %v4565_v63  ;;  %v4563_v58 = vsel %vm8509_vm5, 1.0, %v4803_v36  ;;  %v2317_v7 = vpop.f32.mrf.mxu2  ;;  %vm8510_vm5 = vcmp.eq.f32.partialorder %v5687_v15, 7.0 }
 0x3fd   :  { %v7688_v49 = vsub.f32 %v4563_v58, %v4563_v58  ;;  %v3042_v63 = vsub.f32 %v7469_v27, %v3041_v62 }
 0x3fe   :  { %4537 = vmatpush.xpose.msk.msra.mxu3 %vm2867_vm6, %v4806_v10 }
 0x3ff   :  { %3008 = vmatpush.xpose.msra.mxu1 %v3007_v16  ;;  %3471 = vmatpush.xpose.msrb.mxu0 %v7632_v50  ;;  %v4562_v16 = vsel %vm8511_vm13, 1.0, %v4803_v36  ;;  %v3043_v62 = vand.u32 4294901760, %v3042_v63 }
 0x400   :  { %3073 = vmatpush.xpose.msra.mxu2 %v7335_v24  ;;  %v3019_v24 = vand.u32 4294901760, %v3018_v38 }
 0x402   :  { %4538 = vmatpush.xpose.msk.msra.mxu3 %vm2866_vm12, %v4806_v10 }
 0x403   :  { %3014 = vmatpush.xpose.msra.mxu1 %v3013_v59  ;;  %3474 = vmatpush.xpose.msrb.mxu0 %v7646_v0  ;;  %v7703_v59 = vsub.f32 %v4562_v16, %v4562_v16 }
 0x404   :  { %3076 = vmatpush.xpose.msra.mxu2 %v7352_v30  ;;  %v3025_v30 = vand.u32 4294901760, %v3024_v23  ;;  %v2356_v23 = vpop.f32.mrf.mxu3 }
 0x406   :  { %4539 = vmatpush.xpose.msk.msra.mxu3 %vm2865_vm8, %v4806_v10 }
 0x407   :  { %3020 = vmatpush.xpose.msra.mxu1 %v3019_v24  ;;  %3477 = vmatpush.xpose.msrb.mxu0 %v7660_v37  ;;  %v4561_v24 = vsel %vm8510_vm5, 1.0, %v4803_v36  ;;  %vm8518_vm5 = vcmp.eq.f32.partialorder %v5403_v5, 8.0 }
 0x408   :  { %3079 = vmatpush.xpose.msra.mxu2 %v7370_v56  ;;  %v2162_v56 = vpop.f32.mrf.mxu0 }
 0x409   :  { %v2264_v33 = vadd.f32 %v2263_v48, %v2162_v56  ;;  %v3350_v48 = vsub.f32 %v7514_v54, %v3349_v14  ;;  %v3355_v56 = vand.u32 4294901760, %v7531_v46 }
 0x40a   :  { %4540 = vmatpush.xpose.msk.msra.mxu3 %vm2864_vm7, %v4806_v10 }
 0x40b   :  { %3026 = vmatpush.xpose.msra.mxu1 %v3025_v30  ;;  %3480 = vmatpush.xpose.msrb.mxu0 %v7674_v11  ;;  %v2318_v38 = vadd.f32 %v2317_v7, %v2264_v33  ;;  %v7720_v30 = vsub.f32 %v4561_v24, %v4561_v24  ;;  %v3351_v47 = vand.u32 4294901760, %v3350_v48  ;;  %v3356_v60 = vsub.f32 %v7531_v46, %v3355_v56 }
 0x40c   :  { %3082 = vmatpush.xpose.msra.mxu2 %v7388_v12  ;;  %v3343_v12 = vand.u32 4294901760, %v7493_v3  ;;  %v3361_v33 = vand.u32 4294901760, %v7548_v40 }
 0x40d   :  { %v2357_v57 = vadd.f32 %v2356_v23, %v2318_v38 }
 0x40e   :  { %4541 = vmatpush.xpose.msk.msra.mxu3 %vm2863_vm14, %v4806_v10  ;;  %v3362_v38 = vsub.f32 %v7548_v40, %v3361_v33 }
 0x40f   :  { %3032 = vmatpush.xpose.msra.mxu1 %v3031_v44  ;;  %3483 = vmatpush.xpose.msrb.mxu0 %v7688_v49 }
 0x410   :  { %3085 = vmatpush.xpose.msra.mxu2 %v7404_v42  ;;  %v3344_v42 = vsub.f32 %v7493_v3, %v3343_v12  ;;  %v2425_v58 = vpop.f32.mrf.mxu0  ;;  %v3363_v23 = vand.u32 4294901760, %v3362_v38 }
 0x412   :  { %4542 = vmatpush.xpose.msk.msra.mxu3 %vm2862_vm1, %v4806_v10 }
 0x413   :  { %3038 = vmatpush.xpose.msra.mxu1 %v3037_v55  ;;  %3486 = vmatpush.xpose.msrb.mxu0 %v7703_v59  ;;  %v3357_v55 = vand.u32 4294901760, %v3356_v60  ;;  %v3385_v60 = vand.u32 4294901760, %v7604_v52 }
 0x414   :  { %3088 = vmatpush.xpose.msra.mxu2 %v7420_v18  ;;  %v3345_v18 = vand.u32 4294901760, %v3344_v42 }
 0x416   :  { %4543 = vmatpush.xpose.msk.msra.mxu3 %vm2861_vm11, %v4806_v10 }
 0x417   :  { %3044 = vmatpush.xpose.msra.mxu1 %v3043_v62  ;;  %3489 = vmatpush.xpose.msrb.mxu0 %v7720_v30  ;;  %v2462_v44 = vpop.f32.mrf.mxu1  ;;  %v7782_v62 = vld [vmem:[%s8414_s1] sm:$0xff]  ;;  %s4807_s1 = smov [#allocation4]  }
 0x418   :  { %3091 = vmatpush.xpose.msra.mxu2 %v7436_v17  ;;  %v2426_v17 = vadd.f32 %v2425_v58, %v2357_v57  ;;  %s4115_s23 = sshll.u32 %s4807_s1, 4  ;;  %s4116_s23 = int_to_ptr.vmem [resolvable:$true] %s4115_s23 }
 0x41a   :  { %4544 = vmatpush.xpose.msk.msra.mxu3 %vm8512_vm2, %v4806_v10  ;;  %3046 = vmatmul.f32.vlgmr.msra.gmra.mxu1 %v5804_v1  ;;  %v2463_v16 = vadd.f32 %v2462_v44, %v2426_v17  ;;  %vm8521_vm2 = vcmp.eq.f32.partialorder %v5384_v25, 8.0  ;;  %v3379_v17 = vand.u32 4294901760, %v7590_v45 }
 0x41b   :  { %4545 = vmatpush.xpose.msk.msrb.mxu1 %vm2875_vm9, %v4806_v10  ;;  %4641 = vmatpush.xpose.msk.msra.mxu0 %vm8518_vm5, %v4806_v10  ;;  %vm8513_vm9 = vcmp.eq.f32.partialorder %v5377_v43, 8.0 }
 0x41c   :  { %3492 = vmatmul.f32.vlgmr.msrb.gmra.mxu0 %v5847_v9  ;;  %3094 = vmatpush.xpose.msra.mxu2 %v7452_v53  ;;  %vm4067_vm13 = vcmp.gt.f32.partialorder %v2463_v16, 0.5  ;;  %v3367_v53 = vand.u32 4294901760, %v7562_v20 }
 0x41d   :  { %3139 = vmatmul.f32.vlgmr.msra.gmra.mxu3 %v5863_v31  ;;  %v4068_v7 = vsel %vm4067_vm13, 1, %v8671_v21 }
 0x41e   :  { %3346 = vmatpush.xpose.msrb.mxu3 %v3345_v18  ;;  %v4069_v63 = vperm.slane %v4068_v7, 7  ;;  %v3368_v42 = vsub.f32 %v7562_v20, %v3367_v53  ;;  %v3386_v7 = vsub.f32 %v7604_v52, %v3385_v60 }
 0x41f   :  { %4546 = vmatpush.xpose.msk.msrb.mxu1 %vm2874_vm3, %v4806_v10  ;;  %4642 = vmatpush.xpose.msk.msra.mxu0 %vm8513_vm9, %v4806_v10  ;;  %vm8745_vm3 = vcmp.eq.f32.partialorder %v5384_v25, 6.0  ;;  %vm8515_vm9 = vcmp.eq.f32.partialorder %v5389_v6, 8.0 }
 0x420   :  { %3097 = vmatpush.xpose.msra.mxu2 %v7469_v27  ;;  %vm4070_vm13 = vcmp.eq.s32.totalorder %v4069_v63, 1  ;;  %v3373_v27 = vand.u32 4294901760, %v7576_v41  ;;  %v3369_v18 = vand.u32 4294901760, %v3368_v42  ;;  %v3387_v38 = vand.u32 4294901760, %v3386_v7 }
 0x421   :  { %v4071_v24 = vsel %vm4070_vm13, %v2463_v16, %v6858_v26  ;;  %vm8747_vm13 = vcmp.eq.f32.partialorder %v5399_v35, 6.0 }
 0x422   :  { %3352 = vmatpush.xpose.msrb.mxu3 %v3351_v47  ;;  %v4072_v57 = vsub.f32 %v4071_v24, %v7782_v62  ;;  %v3374_v48 = vsub.f32 %v7576_v41, %v3373_v27  ;;  %v3380_v47 = vsub.f32 %v7590_v45, %v3379_v17  ;;  %v3397_v24 = vand.u32 4294901760, %v7632_v50 }
 0x423   :  { %4547 = vmatpush.xpose.msk.msrb.mxu1 %vm8745_vm3, %v4806_v10  ;;  %4643 = vmatpush.xpose.msk.msra.mxu0 %vm8521_vm2, %v4806_v10  ;;  %vm8746_vm3 = vcmp.eq.f32.partialorder %v5389_v6, 6.0 }
 0x424   :  { %4577 = vmatpush.xpose.msk.msrb.mxu2 %vm3267_vm4, %v4806_v10  ;;  %v4073_v58 = vsel %vm6903_vm10, %v4072_v57, 0.0  ;;  %v3375_v44 = vand.u32 4294901760, %v3374_v48  ;;  %v3381_v16 = vand.u32 4294901760, %v3380_v47  ;;  %v3398_v42 = vsub.f32 %v7632_v50, %v3397_v24 }
 0x425   :  { %3100 = vmatmul.f32.vlgmr.msra.gmra.mxu2 %v5847_v9  ;;  %4074 = vst [vmem:[#allocation4 + $0x18] sm:$0xff] %v4073_v58  ;;  %v8527_v57 = vand.u32 4294901760, %v7646_v0  ;;  %v8526_v48 = vand.u32 4294901760, %v7660_v37  ;;  %v8790_v50 = vand.u32 4294901760, %v7646_v0 }
 0x426   :  { %3358 = vmatpush.xpose.msrb.mxu3 %v3357_v55  ;;  %v3391_v55 = vand.u32 4294901760, %v7618_v13  ;;  %v3399_v58 = vand.u32 4294901760, %v3398_v42 }
 0x427   :  { %4548 = vmatpush.xpose.msk.msrb.mxu1 %vm8746_vm3, %v4806_v10  ;;  %4644 = vmatpush.xpose.msk.msra.mxu0 %vm8515_vm9, %v4806_v10  ;;  %vm8516_vm3 = vcmp.eq.f32.partialorder %v5399_v35, 8.0  ;;  %vm8517_vm9 = vcmp.eq.f32.partialorder %v5429_v22, 8.0  ;;  %v3410_v47 = vsub.f32 %v7660_v37, %v8526_v48 }
 0x428   :  { %4578 = vmatpush.xpose.msk.msrb.mxu2 %vm8514_vm15, %v4806_v10  ;;  %vm8748_vm15 = vcmp.eq.f32.partialorder %v5384_v25, 7.0  ;;  %v3392_v63 = vsub.f32 %v7618_v13, %v3391_v55 }
 0x429   :  { %v3411_v7 = vand.u32 4294901760, %v3410_v47  ;;  %v4640_v47 = vsel %vm8518_vm5, 1.0, %v4803_v36  ;;  %vm8760_vm5 = vcmp.eq.f32.partialorder %v5377_v43, 8.0 }
 0x42a   :  { %3364 = vmatpush.xpose.msrb.mxu3 %v3363_v23  ;;  %v3393_v23 = vand.u32 4294901760, %v3392_v63  ;;  %v8522_v63 = vand.u32 4294901760, %v7688_v49 }
 0x42b   :  { %4549 = vmatpush.xpose.msk.msrb.mxu1 %vm8747_vm13, %v4806_v10  ;;  %4645 = vmatpush.xpose.msk.msra.mxu0 %vm8516_vm3, %v4806_v10  ;;  %vm8749_vm13 = vcmp.eq.f32.partialorder %v5429_v22, 6.0  ;;  %vm3653_vm3 = vcmp.eq.f32.partialorder %v5456_v39, 8.0 }
 0x42c   :  { %4579 = vmatpush.xpose.msk.msrb.mxu2 %vm8748_vm15, %v4806_v10  ;;  %vm8750_vm15 = vcmp.eq.f32.partialorder %v5389_v6, 7.0  ;;  %v3422_v42 = vsub.f32 %v7688_v49, %v8522_v63 }
 0x42e   :  { %3370 = vmatpush.xpose.msrb.mxu3 %v3369_v18  ;;  %v3404_v18 = vsub.f32 %v7646_v0, %v8527_v57  ;;  %v8793_v0 = vand.u32 4294901760, %v7660_v37  ;;  %v8797_v37 = vand.u32 4294901760, %v7674_v11 }
 0x42f   :  { %4550 = vmatpush.xpose.msk.msrb.mxu1 %vm8749_vm13, %v4806_v10  ;;  %4646 = vmatpush.xpose.msk.msra.mxu0 %vm8517_vm9, %v4806_v10  ;;  %vm8751_vm13 = vcmp.eq.f32.partialorder %v5456_v39, 6.0  ;;  %vm3652_vm9 = vcmp.eq.f32.partialorder %v5478_v29, 8.0 }
 0x430   :  { %4580 = vmatpush.xpose.msk.msrb.mxu2 %vm8750_vm15, %v4806_v10  ;;  %vm8752_vm15 = vcmp.eq.f32.partialorder %v5399_v35, 7.0 }
 0x432   :  { %3376 = vmatpush.xpose.msrb.mxu3 %v3375_v44  ;;  %v3405_v44 = vand.u32 4294901760, %v3404_v18  ;;  %v3423_v18 = vand.u32 4294901760, %v3422_v42  ;;  %v4639_v42 = vsel %vm8760_vm5, 1.0, %v4803_v36  ;;  %vm3644_vm5 = vcmp.eq.f32.partialorder %v5687_v15, 8.0 }
 0x433   :  { %4551 = vmatpush.xpose.msk.msrb.mxu1 %vm8751_vm13, %v4806_v10  ;;  %4647 = vmatpush.xpose.msk.msra.mxu0 %vm3653_vm3, %v4806_v10  ;;  %vm8753_vm13 = vcmp.eq.f32.partialorder %v5478_v29, 6.0 }
 0x434   :  { %4581 = vmatpush.xpose.msk.msrb.mxu2 %vm8752_vm15, %v4806_v10  ;;  %vm8754_vm15 = vcmp.eq.f32.partialorder %v5429_v22, 7.0 }
 0x436   :  { %3382 = vmatpush.xpose.msrb.mxu3 %v3381_v16  ;;  %v8523_v16 = vand.u32 4294901760, %v7674_v11 }
 0x437   :  { %4552 = vmatpush.xpose.msk.msrb.mxu1 %vm8753_vm13, %v4806_v10  ;;  %4648 = vmatpush.xpose.msk.msra.mxu0 %vm3652_vm9, %v4806_v10  ;;  %vm3651_vm13 = vcmp.eq.f32.partialorder %v5501_v61, 8.0 }
 0x438   :  { %4582 = vmatpush.xpose.msk.msrb.mxu2 %vm8754_vm15, %v4806_v10  ;;  %vm8755_vm15 = vcmp.eq.f32.partialorder %v5456_v39, 7.0 }
 0x43a   :  { %3388 = vmatpush.xpose.msrb.mxu3 %v3387_v38  ;;  %v3416_v38 = vsub.f32 %v7674_v11, %v8523_v16  ;;  %v2554_v16 = vpop.f32.mrf.mxu2  ;;  %v8801_v11 = vand.u32 4294901760, %v7688_v49  ;;  %v8804_v49 = vand.u32 4294901760, %v7703_v59 }
 0x43b   :  { %4553 = vmatpush.xpose.msk.msrb.mxu1 %vm2867_vm6, %v4806_v10  ;;  %4649 = vmatpush.xpose.msk.msra.mxu0 %vm3651_vm13, %v4806_v10  ;;  %vm3650_vm6 = vcmp.eq.f32.partialorder %v5524_v32, 8.0 }
 0x43c   :  { %4583 = vmatpush.xpose.msk.msrb.mxu2 %vm8755_vm15, %v4806_v10  ;;  %vm8756_vm15 = vcmp.eq.f32.partialorder %v5478_v29, 7.0 }
 0x43e   :  { %3394 = vmatpush.xpose.msrb.mxu3 %v3393_v23  ;;  %v3417_v23 = vand.u32 4294901760, %v3416_v38  ;;  %v7936_v38 = vsub.f32 %v4640_v47, %v4640_v47  ;;  %v7954_v47 = vsub.f32 %v4639_v42, %v4639_v42 }
 0x43f   :  { %4554 = vmatpush.xpose.msk.msrb.mxu1 %vm2866_vm12, %v4806_v10  ;;  %4650 = vmatpush.xpose.msk.msra.mxu0 %vm3650_vm6, %v4806_v10  ;;  %vm3649_vm12 = vcmp.eq.f32.partialorder %v5547_v51, 8.0 }
 0x440   :  { %4584 = vmatpush.xpose.msk.msrb.mxu2 %vm8756_vm15, %v4806_v10  ;;  %vm8757_vm15 = vcmp.eq.f32.partialorder %v5501_v61, 7.0 }
 0x442   :  { %3400 = vmatpush.xpose.msrb.mxu3 %v3399_v58  ;;  %v8519_v58 = vand.u32 4294901760, %v7703_v59 }
 0x443   :  { %4555 = vmatpush.xpose.msk.msrb.mxu1 %vm2865_vm8, %v4806_v10  ;;  %4651 = vmatpush.xpose.msk.msra.mxu0 %vm3649_vm12, %v4806_v10  ;;  %vm3648_vm8 = vcmp.eq.f32.partialorder %v5590_v4, 8.0 }
 0x444   :  { %4585 = vmatpush.xpose.msk.msrb.mxu2 %vm8757_vm15, %v4806_v10  ;;  %vm8758_vm15 = vcmp.eq.f32.partialorder %v5547_v51, 7.0 }
 0x446   :  { %3406 = vmatpush.xpose.msrb.mxu3 %v3405_v44  ;;  %v3428_v44 = vsub.f32 %v7703_v59, %v8519_v58  ;;  %v4638_v58 = vsel %vm8521_vm2, 1.0, %v4803_v36  ;;  %vm8766_vm2 = vcmp.eq.f32.partialorder %v5377_v43, 7.0 }
 0x447   :  { %4556 = vmatpush.xpose.msk.msrb.mxu1 %vm2864_vm7, %v4806_v10  ;;  %4652 = vmatpush.xpose.msk.msra.mxu0 %vm3648_vm8, %v4806_v10  ;;  %vm3647_vm7 = vcmp.eq.f32.partialorder %v5620_v8, 8.0  ;;  %v7976_v42 = vsub.f32 %v4638_v58, %v4638_v58  ;;  %v2655_v58 = vpop.f32.mrf.mxu3 }
 0x448   :  { %4586 = vmatpush.xpose.msk.msrb.mxu2 %vm3258_vm0, %v4806_v10 }
 0x449   :  { %v3747_v63 = vand.u32 4294901760, %v7976_v42 }
 0x44a   :  { %3412 = vmatpush.xpose.msrb.mxu3 %v3411_v7  ;;  %v8520_v7 = vand.u32 4294901760, %v7720_v30 }
 0x44b   :  { %4557 = vmatpush.xpose.msk.msrb.mxu1 %vm2863_vm14, %v4806_v10  ;;  %4653 = vmatpush.xpose.msk.msra.mxu0 %vm3647_vm7, %v4806_v10  ;;  %vm3646_vm14 = vcmp.eq.f32.partialorder %v5615_v2, 8.0 }
 0x44c   :  { %4587 = vmatpush.xpose.msk.msrb.mxu2 %vm8758_vm15, %v4806_v10  ;;  %vm8759_vm15 = vcmp.eq.f32.partialorder %v5590_v4, 7.0 }
 0x44e   :  { %3418 = vmatpush.xpose.msrb.mxu3 %v3417_v23  ;;  %v3429_v23 = vand.u32 4294901760, %v3428_v44  ;;  %v8524_v44 = vand.u32 4294901760, %v7936_v38 }
 0x44f   :  { %4558 = vmatpush.xpose.msk.msrb.mxu1 %vm2862_vm1, %v4806_v10  ;;  %4654 = vmatpush.xpose.msk.msra.mxu0 %vm3646_vm14, %v4806_v10  ;;  %vm3645_vm1 = vcmp.eq.f32.partialorder %v5665_v34, 8.0 }
 0x450   :  { %4588 = vmatpush.xpose.msk.msrb.mxu2 %vm8759_vm15, %v4806_v10  ;;  %vm8761_vm15 = vcmp.eq.f32.partialorder %v5620_v8, 7.0 }
 0x452   :  { %3424 = vmatpush.xpose.msrb.mxu3 %v3423_v18  ;;  %v3434_v18 = vsub.f32 %v7720_v30, %v8520_v7  ;;  %v8525_v7 = vand.u32 4294901760, %v7954_v47 }
 0x453   :  { %4559 = vmatpush.xpose.msk.msrb.mxu1 %vm2861_vm11, %v4806_v10  ;;  %4655 = vmatpush.xpose.msk.msra.mxu0 %vm3645_vm1, %v4806_v10  ;;  %vm8762_vm11 = vcmp.eq.f32.partialorder %v5687_v15, 6.0 }
 0x454   :  { %4589 = vmatpush.xpose.msk.msrb.mxu2 %vm8761_vm15, %v4806_v10  ;;  %vm8763_vm15 = vcmp.eq.f32.partialorder %v5615_v2, 7.0 }
 0x456   :  { %3430 = vmatpush.xpose.msrb.mxu3 %v3429_v23  ;;  %v3435_v23 = vand.u32 4294901760, %v3434_v18 }
 0x457   :  { %4560 = vmatpush.xpose.msk.msrb.mxu1 %vm8762_vm11, %v4806_v10  ;;  %4656 = vmatpush.xpose.msk.msra.mxu0 %vm3644_vm5, %v4806_v10  ;;  %vm8764_vm11 = vcmp.eq.f32.partialorder %v5389_v6, 8.0  ;;  %v2748_v3 = vpop.f32.mrf.mxu1 }
 0x458   :  { %4590 = vmatpush.xpose.msk.msrb.mxu2 %vm8763_vm15, %v4806_v10  ;;  %v4637_v18 = vsel %vm8764_vm11, 1.0, %v4803_v36  ;;  %vm8765_vm15 = vcmp.eq.f32.partialorder %v5665_v34, 7.0  ;;  %vm8768_vm11 = vcmp.eq.f32.partialorder %v5399_v35, 8.0 }
 0x45a   :  { %3245 = vmatmul.f32.vlgmr.msrb.gmra.mxu1 %v5804_v1  ;;  %3436 = vmatpush.xpose.msrb.mxu3 %v3435_v23  ;;  %v7995_v23 = vsub.f32 %v4637_v18, %v4637_v18  ;;  %v2709_v18 = vpop.f32.mrf.mxu0 }
 0x45b   :  { %4593 = vmatpush.xpose.msk.msra.mxu1 %vm3267_vm4, %v4806_v10  ;;  %3930 = vmatpush.xpose.msrb.mxu0 %v8524_v44  ;;  %v4636_v44 = vsel %vm8768_vm11, 1.0, %v4803_v36  ;;  %vm8772_vm11 = vcmp.eq.f32.partialorder %v5429_v22, 8.0 }
 0x45c   :  { %3729 = vmatmul.f32.vlgmr.msra.gmra.mxu0 %v5884_v19  ;;  %4591 = vmatpush.xpose.msk.msrb.mxu2 %vm8765_vm15, %v4806_v10  ;;  %vm8770_vm15 = vcmp.eq.f32.partialorder %v5384_v25, 7.0  ;;  %v8014_v48 = vsub.f32 %v4636_v44, %v4636_v44  ;;  %v3753_v57 = vand.u32 4294901760, %v7995_v23 }
 0x45d   :  { %3438 = vmatmul.f32.vlgmr.msrb.gmra.mxu3 %v5804_v1 }
 0x45e   :  { %4609 = vmatpush.xpose.msk.msra.mxu3 %vm3267_vm4, %v4806_v10  ;;  %vm8767_vm4 = vmmov %vm8766_vm2 }
 0x45f   :  { %4594 = vmatpush.xpose.msk.msra.mxu1 %vm8766_vm2, %v4806_v10  ;;  %3934 = vmatpush.xpose.msrb.mxu0 %v8525_v7  ;;  %vm8769_vm2 = vcmp.eq.f32.partialorder %v5687_v15, 7.0  ;;  %v2656_v7 = vadd.f32 %v2655_v58, %v2554_v16  ;;  %v4635_v16 = vsel %vm8772_vm11, 1.0, %v4803_v36 }
 0x460   :  { %4592 = vmatpush.xpose.msk.msrb.mxu2 %vm8769_vm2, %v4806_v10  ;;  %vm8773_vm2 = vcmp.eq.f32.partialorder %v5389_v6, 7.0 }
 0x461   :  { %v2710_v58 = vadd.f32 %v2709_v18, %v2656_v7  ;;  %v4634_v7 = vsel %vm3653_vm3, 1.0, %v4803_v36 }
 0x462   :  { %4610 = vmatpush.xpose.msk.msra.mxu3 %vm8767_vm4, %v4806_v10  ;;  %vm8771_vm4 = vmmov %vm8770_vm15  ;;  %v8047_v54 = vsub.f32 %v4634_v7, %v4634_v7 }
 0x463   :  { %4595 = vmatpush.xpose.msk.msra.mxu1 %vm8770_vm15, %v4806_v10  ;;  %3938 = vmatpush.xpose.msrb.mxu0 %v3747_v63  ;;  %vm8774_vm15 = vmmov %vm8773_vm2  ;;  %v2749_v44 = vadd.f32 %v2748_v3, %v2710_v58  ;;  %v4633_v58 = vsel %vm3652_vm9, 1.0, %v4803_v36 }
 0x464   :  { %3538 = vmatpush.xpose.msra.mxu2 %v3343_v12  ;;  %v8031_v12 = vsub.f32 %v4635_v16, %v4635_v16  ;;  %v2854_v16 = vpop.f32.mrf.mxu3  ;;  %v3771_v7 = vand.u32 4294901760, %v8047_v54 }
 0x465   :  { %3337 = vmatmul.f32.vlgmr.msrb.gmra.mxu2 %v5884_v19  ;;  %v3759_v19 = vand.u32 4294901760, %v8014_v48 }
 0x466   :  { %4611 = vmatpush.xpose.msk.msra.mxu3 %vm8771_vm4, %v4806_v10  ;;  %vm8775_vm4 = vcmp.eq.f32.partialorder %v5399_v35, 7.0  ;;  %v3765_v18 = vand.u32 4294901760, %v8031_v12 }
 0x467   :  { %4596 = vmatpush.xpose.msk.msra.mxu1 %vm8773_vm2, %v4806_v10  ;;  %3942 = vmatpush.xpose.msrb.mxu0 %v3753_v57  ;;  %vm8776_vm11 = vmmov %vm8775_vm4  ;;  %vm8777_vm2 = vcmp.eq.f32.partialorder %v5429_v22, 7.0 }
 0x468   :  { %3542 = vmatpush.xpose.msra.mxu2 %v3349_v14  ;;  %v2817_v14 = vpop.f32.mrf.mxu2 }
 0x469   :  { %v2818_v3 = vadd.f32 %v2817_v14, %v2749_v44  ;;  %v4632_v44 = vsel %vm3651_vm13, 1.0, %v4803_v36 }
 0x46a   :  { %4612 = vmatpush.xpose.msk.msra.mxu3 %vm8774_vm15, %v4806_v10  ;;  %vm8778_vm15 = vmmov %vm8777_vm2 }
 0x46b   :  { %4597 = vmatpush.xpose.msk.msra.mxu1 %vm8775_vm4, %v4806_v10  ;;  %3946 = vmatpush.xpose.msrb.mxu0 %v3759_v19  ;;  %v2855_v46 = vadd.f32 %v2854_v16, %v2818_v3 }
 0x46c   :  { %3546 = vmatpush.xpose.msra.mxu2 %v3355_v56  ;;  %v8063_v56 = vsub.f32 %v4633_v58, %v4633_v58  ;;  %v4631_v58 = vsel %vm3650_vm6, 1.0, %v4803_v36 }
 0x46d   :  { %vm4076_vm4 = vcmp.gt.f32.partialorder %v2855_v46, 0.5 }
 0x46e   :  { %4613 = vmatpush.xpose.msk.msra.mxu3 %vm8776_vm11, %v4806_v10  ;;  %v4077_v14 = vsel %vm4076_vm4, 1, %v8671_v21  ;;  %vm8779_vm11 = vcmp.eq.f32.partialorder %v5456_v39, 7.0  ;;  %v3777_v16 = vand.u32 4294901760, %v8063_v56  ;;  %vm8781_vm4 = vcmp.eq.f32.partialorder %v5478_v29, 7.0 }
 0x46f   :  { %4598 = vmatpush.xpose.msk.msra.mxu1 %vm8777_vm2, %v4806_v10  ;;  %3950 = vmatpush.xpose.msrb.mxu0 %v3765_v18  ;;  %v4078_v40 = vperm.slane %v4077_v14, 7  ;;  %vm8780_vm2 = vmmov %vm8779_vm11 }
 0x470   :  { %3550 = vmatpush.xpose.msra.mxu2 %v3361_v33  ;;  %v8080_v33 = vsub.f32 %v4632_v44, %v4632_v44  ;;  %v4630_v44 = vsel %vm3649_vm12, 1.0, %v4803_v36 }
 0x471   :  { %v8116_v41 = vsub.f32 %v4630_v44, %v4630_v44 }
 0x472   :  { %4614 = vmatpush.xpose.msk.msra.mxu3 %vm8778_vm15, %v4806_v10  ;;  %vm4079_vm15 = vcmp.eq.s32.totalorder %v4078_v40, 1  ;;  %v4629_v40 = vsel %vm3648_vm8, 1.0, %v4803_v36 }
 0x473   :  { %4599 = vmatpush.xpose.msk.msra.mxu1 %vm8779_vm11, %v4806_v10  ;;  %3954 = vmatpush.xpose.msrb.mxu0 %v3771_v7  ;;  %v4080_v3 = vsel %vm4079_vm15, %v2855_v46, %v6858_v26  ;;  %vm8782_vm11 = vmmov %vm8781_vm4  ;;  %v3783_v46 = vand.u32 4294901760, %v8080_v33  ;;  %v8132_v45 = vsub.f32 %v4629_v40, %v4629_v40 }
 0x474   :  { %3554 = vmatpush.xpose.msra.mxu2 %v3367_v53  ;;  %v4081_v20 = vsub.f32 %v4080_v3, %v7782_v62  ;;  %v8098_v53 = vsub.f32 %v4631_v58, %v4631_v58  ;;  %v4628_v58 = vsel %vm3647_vm7, 1.0, %v4803_v36  ;;  %v4627_v3 = vsel %vm3646_vm14, 1.0, %v4803_v36 }
 0x475   :  { %v8148_v52 = vsub.f32 %v4628_v58, %v4628_v58  ;;  %v8164_v13 = vsub.f32 %v4627_v3, %v4627_v3 }
 0x476   :  { %4615 = vmatpush.xpose.msk.msra.mxu3 %vm8780_vm2, %v4806_v10  ;;  %v4082_v14 = vsel %vm6903_vm10, %v4081_v20, 0.0  ;;  %vm8783_vm2 = vcmp.eq.f32.partialorder %v5501_v61, 7.0  ;;  %v4626_v20 = vsel %vm3645_vm1, 1.0, %v4803_v36 }
 0x477   :  { %4600 = vmatpush.xpose.msk.msra.mxu1 %vm8781_vm4, %v4806_v10  ;;  %3958 = vmatpush.xpose.msrb.mxu0 %v3777_v16  ;;  %4083 = vst [vmem:[#allocation4 + $0x20] sm:$0xff] %v4082_v14  ;;  %vm8784_vm15 = vmmov %vm8783_vm2  ;;  %vm8785_vm4 = vcmp.eq.f32.partialorder %v5547_v51, 7.0  ;;  %v3813_v44 = vand.u32 4294901760, %v8164_v13  ;;  %v4625_v14 = vsel %vm3644_vm5, 1.0, %v4803_v36  ;;  %v8795_v36 = vand.u32 4294901760, %v7936_v38 }
 0x478   :  { %3558 = vmatpush.xpose.msra.mxu2 %v3373_v27  ;;  %v3789_v27 = vand.u32 4294901760, %v8098_v53  ;;  %v8196_v40 = vsub.f32 %v4625_v14, %v4625_v14  ;;  %v8799_v14 = vand.u32 4294901760, %v7954_v47 }
 0x479   :  { %v3736_v3 = vsub.f32 %v7936_v38, %v8795_v36 }
 0x47a   :  { %4616 = vmatpush.xpose.msk.msra.mxu3 %vm8782_vm11, %v4806_v10  ;;  %vm8787_vm11 = vcmp.eq.f32.partialorder %v5590_v4, 7.0 }
 0x47b   :  { %4601 = vmatpush.xpose.msk.msra.mxu1 %vm8783_vm2, %v4806_v10  ;;  %3962 = vmatpush.xpose.msrb.mxu0 %v3783_v46  ;;  %vm8788_vm2 = vmmov %vm8787_vm11 }
 0x47c   :  { %3562 = vmatpush.xpose.msra.mxu2 %v3379_v17  ;;  %v3795_v17 = vand.u32 4294901760, %v8116_v41 }
 0x47e   :  { %4617 = vmatpush.xpose.msk.msra.mxu3 %vm8784_vm15, %v4806_v10  ;;  %vm8789_vm15 = vcmp.eq.f32.partialorder %v5620_v8, 7.0 }
 0x47f   :  { %4602 = vmatpush.xpose.msk.msra.mxu1 %vm3258_vm0, %v4806_v10  ;;  %3966 = vmatpush.xpose.msrb.mxu0 %v3789_v27 }
 0x480   :  { %3566 = vmatpush.xpose.msra.mxu2 %v3385_v60  ;;  %v3801_v60 = vand.u32 4294901760, %v8132_v45 }
 0x482   :  { %4618 = vmatpush.xpose.msk.msra.mxu3 %vm3258_vm0, %v4806_v10  ;;  %vm8786_vm0 = vmmov %vm8785_vm4 }
 0x483   :  { %4603 = vmatpush.xpose.msk.msra.mxu1 %vm8785_vm4, %v4806_v10  ;;  %3970 = vmatpush.xpose.msrb.mxu0 %v3795_v17  ;;  %vm8791_vm4 = vmmov %vm8789_vm15 }
 0x484   :  { %3570 = vmatpush.xpose.msra.mxu2 %v3391_v55  ;;  %v3807_v55 = vand.u32 4294901760, %v8148_v52 }
 0x486   :  { %4619 = vmatpush.xpose.msk.msra.mxu3 %vm8786_vm0, %v4806_v10  ;;  %vm8792_vm0 = vcmp.eq.f32.partialorder %v5615_v2, 7.0 }
 0x487   :  { %4604 = vmatpush.xpose.msk.msra.mxu1 %vm8787_vm11, %v4806_v10  ;;  %3974 = vmatpush.xpose.msrb.mxu0 %v3801_v60  ;;  %vm8794_vm11 = vmmov %vm8792_vm0 }
 0x488   :  { %3574 = vmatpush.xpose.msra.mxu2 %v3397_v24  ;;  %v8180_v24 = vsub.f32 %v4626_v20, %v4626_v20  ;;  %v3825_v20 = vand.u32 4294901760, %v8196_v40 }
 0x48a   :  { %4620 = vmatpush.xpose.msk.msra.mxu3 %vm8788_vm2, %v4806_v10  ;;  %v3819_v58 = vand.u32 4294901760, %v8180_v24  ;;  %vm8796_vm2 = vcmp.eq.f32.partialorder %v5665_v34, 7.0 }
 0x48b   :  { %4605 = vmatpush.xpose.msk.msra.mxu1 %vm8789_vm15, %v4806_v10  ;;  %3978 = vmatpush.xpose.msrb.mxu0 %v3807_v55  ;;  %vm8798_vm15 = vmmov %vm8796_vm2 }
 0x48c   :  { %3578 = vmatpush.xpose.msra.mxu2 %v8790_v50  ;;  %v3737_v50 = vand.u32 4294901760, %v3736_v3  ;;  %v3748_v3 = vsub.f32 %v7976_v42, %v3747_v63  ;;  %v8806_v63 = vand.u32 4294901760, %v7720_v30 }
 0x48e   :  { %4621 = vmatpush.xpose.msk.msra.mxu3 %vm8791_vm4, %v4806_v10  ;;  %vm8800_vm4 = vcmp.eq.f32.partialorder %v5687_v15, 7.0 }
 0x48f   :  { %4606 = vmatpush.xpose.msk.msra.mxu1 %vm8792_vm0, %v4806_v10  ;;  %3982 = vmatpush.xpose.msrb.mxu0 %v3813_v44  ;;  %vm8802_vm0 = vmmov %vm8800_vm4 }
 0x490   :  { %3582 = vmatpush.xpose.msra.mxu2 %v8793_v0  ;;  %v3742_v0 = vsub.f32 %v7954_v47, %v8799_v14  ;;  %v3760_v14 = vsub.f32 %v8014_v48, %v3759_v19 }
 0x492   :  { %4622 = vmatpush.xpose.msk.msra.mxu3 %vm8794_vm11, %v4806_v10  ;;  %vm8803_vm11 = vcmp.eq.f32.partialorder %v5403_v5, 8.0  ;;  %v3743_v36 = vand.u32 4294901760, %v3742_v0  ;;  %v3761_v30 = vand.u32 4294901760, %v3760_v14  ;;  %v2946_v0 = vpop.f32.mrf.mxu0 }
 0x493   :  { %4607 = vmatpush.xpose.msk.msra.mxu1 %vm8796_vm2, %v4806_v10  ;;  %3986 = vmatpush.xpose.msrb.mxu0 %v3819_v58  ;;  %vm8805_vm2 = vcmp.eq.f32.partialorder %v5377_v43, 8.0 }
 0x494   :  { %3586 = vmatpush.xpose.msra.mxu2 %v8797_v37  ;;  %v3749_v37 = vand.u32 4294901760, %v3748_v3  ;;  %v3826_v3 = vsub.f32 %v8196_v40, %v3825_v20 }
 0x496   :  { %4623 = vmatpush.xpose.msk.msra.mxu3 %vm8798_vm15, %v4806_v10  ;;  %vm8807_vm15 = vcmp.eq.f32.partialorder %v5384_v25, 8.0 }
 0x497   :  { %4608 = vmatpush.xpose.msk.msra.mxu1 %vm8800_vm4, %v4806_v10  ;;  %3990 = vmatpush.xpose.msrb.mxu0 %v3825_v20  ;;  %vm8808_vm4 = vcmp.eq.f32.partialorder %v5389_v6, 8.0 }
 0x498   :  { %3590 = vmatpush.xpose.msra.mxu2 %v8801_v11 }
 0x49a   :  { %4624 = vmatpush.xpose.msk.msra.mxu3 %vm8802_vm0, %v4806_v10  ;;  %3531 = vmatmul.f32.vlgmr.msra.gmra.mxu1 %v5863_v31  ;;  %vm8809_vm0 = vcmp.eq.f32.partialorder %v5399_v35, 8.0 }
 0x49b   :  { %3738 = vmatpush.xpose.msrb.mxu1 %v3737_v50  ;;  %3992 = vmatmul.f32.vlgmr.msrb.gmra.mxu0 %v5804_v1  ;;  %v3754_v50 = vsub.f32 %v7995_v23, %v3753_v57  ;;  %v3766_v57 = vsub.f32 %v8031_v12, %v3765_v18 }
 0x49c   :  { %3594 = vmatpush.xpose.msra.mxu2 %v8804_v49 }
 0x49d   :  { %3637 = vmatmul.f32.vlgmr.msra.gmra.mxu3 %v5804_v1  ;;  %v3755_v59 = vand.u32 4294901760, %v3754_v50 }
 0x49e   :  { %4657 = vmatpush.xpose.msk.msrb.mxu3 %vm8803_vm11, %v4806_v10  ;;  %vm8810_vm11 = vcmp.eq.f32.partialorder %v5429_v22, 8.0 }
 0x49f   :  { %3744 = vmatpush.xpose.msrb.mxu1 %v3743_v36 }
 0x4a0   :  { %3598 = vmatpush.xpose.msra.mxu2 %v8806_v63  ;;  %v3140_v49 = vpop.f32.mrf.mxu3 }
 0x4a2   :  { %4658 = vmatpush.xpose.msk.msrb.mxu3 %vm8805_vm2, %v4806_v10  ;;  %vm8811_vm2 = vcmp.eq.f32.partialorder %v5403_v5, 8.0 }
 0x4a3   :  { %3750 = vmatpush.xpose.msrb.mxu1 %v3749_v37  ;;  %3600 = vmatmul.f32.vlgmr.msra.gmra.mxu2 %v5804_v1  ;;  %v3209_v37 = vpop.f32.mrf.mxu0 }
 0x4a4   :  { %3836 = vmatpush.xpose.msrb.mxu2 %v7936_v38  ;;  %v3767_v38 = vand.u32 4294901760, %v3766_v57 }
 0x4a6   :  { %4659 = vmatpush.xpose.msk.msrb.mxu3 %vm8807_vm15, %v4806_v10  ;;  %vm8812_vm15 = vcmp.eq.f32.partialorder %v5377_v43, 8.0 }
 0x4a7   :  { %3756 = vmatpush.xpose.msrb.mxu1 %v3755_v59 }
 0x4a8   :  { %3839 = vmatpush.xpose.msrb.mxu2 %v7954_v47  ;;  %v3772_v47 = vsub.f32 %v8047_v54, %v3771_v7  ;;  %v3101_v36 = vpop.f32.mrf.mxu2 }
 0x4aa   :  { %4660 = vmatpush.xpose.msk.msrb.mxu3 %vm8808_vm4, %v4806_v10  ;;  %v3773_v19 = vand.u32 4294901760, %v3772_v47 }
 0x4ab   :  { %3762 = vmatpush.xpose.msrb.mxu1 %v3761_v30 }
 0x4ac   :  { %3842 = vmatpush.xpose.msrb.mxu2 %v7976_v42  ;;  %v3778_v42 = vsub.f32 %v8063_v56, %v3777_v16 }
 0x4ae   :  { %4661 = vmatpush.xpose.msk.msrb.mxu3 %vm8809_vm0, %v4806_v10  ;;  %v3779_v18 = vand.u32 4294901760, %v3778_v42  ;;  %vm8813_vm0 = vcmp.eq.f32.partialorder %v5384_v25, 8.0 }
 0x4af   :  { %3768 = vmatpush.xpose.msrb.mxu1 %v3767_v38 }
 0x4b0   :  { %3845 = vmatpush.xpose.msrb.mxu2 %v7995_v23  ;;  %v3784_v23 = vsub.f32 %v8080_v33, %v3783_v46 }
 0x4b2   :  { %4662 = vmatpush.xpose.msk.msrb.mxu3 %vm8810_vm11, %v4806_v10  ;;  %v3785_v7 = vand.u32 4294901760, %v3784_v23 }
 0x4b3   :  { %3774 = vmatpush.xpose.msrb.mxu1 %v3773_v19 }
 0x4b4   :  { %3848 = vmatpush.xpose.msrb.mxu2 %v8014_v48  ;;  %v3790_v48 = vsub.f32 %v8098_v53, %v3789_v27 }
 0x4b6   :  { %4663 = vmatpush.xpose.msk.msrb.mxu3 %vm3653_vm3, %v4806_v10  ;;  %v3791_v16 = vand.u32 4294901760, %v3790_v48 }
 0x4b7   :  { %3780 = vmatpush.xpose.msrb.mxu1 %v3779_v18 }
 0x4b8   :  { %3851 = vmatpush.xpose.msrb.mxu2 %v8031_v12  ;;  %v3796_v12 = vsub.f32 %v8116_v41, %v3795_v17 }
 0x4ba   :  { %4664 = vmatpush.xpose.msk.msrb.mxu3 %vm3652_vm9, %v4806_v10  ;;  %v3797_v46 = vand.u32 4294901760, %v3796_v12 }
 0x4bb   :  { %3786 = vmatpush.xpose.msrb.mxu1 %v3785_v7 }
 0x4bc   :  { %3854 = vmatpush.xpose.msrb.mxu2 %v8047_v54  ;;  %v3802_v54 = vsub.f32 %v8132_v45, %v3801_v60  ;;  %v3047_v60 = vpop.f32.mrf.mxu1 }
 0x4bd   :  { %v3048_v11 = vadd.f32 %v3047_v60, %v2946_v0 }
 0x4be   :  { %4665 = vmatpush.xpose.msk.msrb.mxu3 %vm3651_vm13, %v4806_v10  ;;  %v3803_v27 = vand.u32 4294901760, %v3802_v54 }
 0x4bf   :  { %3792 = vmatpush.xpose.msrb.mxu1 %v3791_v16 }
 0x4c0   :  { %3857 = vmatpush.xpose.msrb.mxu2 %v8063_v56  ;;  %v3808_v56 = vsub.f32 %v8148_v52, %v3807_v55 }
 0x4c2   :  { %4666 = vmatpush.xpose.msk.msrb.mxu3 %vm3650_vm6, %v4806_v10  ;;  %v3809_v17 = vand.u32 4294901760, %v3808_v56 }
 0x4c3   :  { %3798 = vmatpush.xpose.msrb.mxu1 %v3797_v46 }
 0x4c4   :  { %3860 = vmatpush.xpose.msrb.mxu2 %v8080_v33  ;;  %v3814_v33 = vsub.f32 %v8164_v13, %v3813_v44  ;;  %v3102_v44 = vadd.f32 %v3101_v36, %v3048_v11 }
 0x4c6   :  { %4667 = vmatpush.xpose.msk.msrb.mxu3 %vm3649_vm12, %v4806_v10  ;;  %v3815_v55 = vand.u32 4294901760, %v3814_v33 }
 0x4c7   :  { %3804 = vmatpush.xpose.msrb.mxu1 %v3803_v27 }
 0x4c8   :  { %3863 = vmatpush.xpose.msrb.mxu2 %v8098_v53  ;;  %v3820_v53 = vsub.f32 %v8180_v24, %v3819_v58  ;;  %v3827_v58 = vand.u32 4294901760, %v3826_v3 }
 0x4ca   :  { %4668 = vmatpush.xpose.msk.msrb.mxu3 %vm3648_vm8, %v4806_v10 }
 0x4cb   :  { %3810 = vmatpush.xpose.msrb.mxu1 %v3809_v17 }
 0x4cc   :  { %3866 = vmatpush.xpose.msrb.mxu2 %v8116_v41  ;;  %v3821_v41 = vand.u32 4294901760, %v3820_v53 }
 0x4ce   :  { %4669 = vmatpush.xpose.msk.msrb.mxu3 %vm3647_vm7, %v4806_v10 }
 0x4cf   :  { %3816 = vmatpush.xpose.msrb.mxu1 %v3815_v55 }
 0x4d0   :  { %3869 = vmatpush.xpose.msrb.mxu2 %v8132_v45  ;;  %v3141_v45 = vadd.f32 %v3140_v49, %v3102_v44 }
 0x4d2   :  { %4670 = vmatpush.xpose.msk.msrb.mxu3 %vm3646_vm14, %v4806_v10  ;;  %v3210_v20 = vadd.f32 %v3209_v37, %v3141_v45 }
 0x4d3   :  { %3822 = vmatpush.xpose.msrb.mxu1 %v3821_v41 }
 0x4d4   :  { %3872 = vmatpush.xpose.msrb.mxu2 %v8148_v52 }
 0x4d6   :  { %4671 = vmatpush.xpose.msk.msrb.mxu3 %vm3645_vm1, %v4806_v10 }
 0x4d7   :  { %3828 = vmatpush.xpose.msrb.mxu1 %v3827_v58  ;;  %v3246_v52 = vpop.f32.mrf.mxu1 }
 0x4d8   :  { %3875 = vmatpush.xpose.msrb.mxu2 %v8164_v13  ;;  %v3247_v50 = vadd.f32 %v3246_v52, %v3210_v20 }
 0x4da   :  { %4672 = vmatpush.xpose.msk.msrb.mxu3 %vm3644_vm5, %v4806_v10  ;;  %3830 = vmatmul.f32.vlgmr.msrb.gmra.mxu1 %v5804_v1  ;;  %vm4085_vm4 = vcmp.gt.f32.partialorder %v3247_v50, 0.5 }
 0x4db   :  { %4673 = vmatpush.xpose.msk.msra.mxu1 %vm8811_vm2, %v4806_v10  ;;  %v4086_v5 = vsel %vm4085_vm4, 1, %v8671_v21  ;;  %vm8814_vm2 = vcmp.eq.f32.partialorder %v5389_v6, 8.0  ;;  %vm8816_vm4 = vcmp.eq.f32.partialorder %v5429_v22, 8.0  ;;  %v3493_v22 = vpop.f32.mrf.mxu0 }
 0x4dc   :  { %3878 = vmatpush.xpose.msrb.mxu2 %v8180_v24  ;;  %v4087_v13 = vperm.slane %v4086_v5, 7 }
 0x4dd   :  { %3923 = vmatmul.f32.vlgmr.msrb.gmra.mxu3 %v5863_v31 }
 0x4de   :  { %vm4088_vm11 = vcmp.eq.s32.totalorder %v4087_v13, 1 }
 0x4df   :  { %4674 = vmatpush.xpose.msk.msra.mxu1 %vm8812_vm15, %v4806_v10  ;;  %v4089_v43 = vsel %vm4088_vm11, %v3247_v50, %v6858_v26  ;;  %vm8815_vm15 = vcmp.eq.f32.partialorder %v5399_v35, 8.0 }
 0x4e0   :  { %3881 = vmatpush.xpose.msrb.mxu2 %v8196_v40  ;;  %v4090_v31 = vsub.f32 %v4089_v43, %v7782_v62  ;;  %v3439_v25 = vpop.f32.mrf.mxu3 }
 0x4e2   :  { %v4091_v24 = vsel %vm6903_vm10, %v4090_v31, 0.0 }
 0x4e3   :  { %4675 = vmatpush.xpose.msk.msra.mxu1 %vm8813_vm0, %v4806_v10  ;;  %3884 = vmatmul.f32.vlgmr.msrb.gmra.mxu2 %v5847_v9  ;;  %4092 = vst [vmem:[#allocation4 + $0x28] sm:$0xff] %v4091_v24  ;;  %v3730_v40 = vpop.f32.mrf.mxu0 }
 0x4e7   :  { %4676 = vmatpush.xpose.msk.msra.mxu1 %vm8814_vm2, %v4806_v10 }
 0x4e8   :  { %v3338_v6 = vpop.f32.mrf.mxu2 }
 0x4e9   :  { %v3440_v35 = vadd.f32 %v3439_v25, %v3338_v6 }
 0x4eb   :  { %4677 = vmatpush.xpose.msk.msra.mxu1 %vm8815_vm15, %v4806_v10  ;;  %v3494_v39 = vadd.f32 %v3493_v22, %v3440_v35 }
 0x4ef   :  { %4678 = vmatpush.xpose.msk.msra.mxu1 %vm8816_vm4, %v4806_v10 }
 0x4f3   :  { %4679 = vmatpush.xpose.msk.msra.mxu1 %vm3653_vm3, %v4806_v10 }
 0x4f7   :  { %4680 = vmatpush.xpose.msk.msra.mxu1 %vm3652_vm9, %v4806_v10 }
 0x4fb   :  { %4681 = vmatpush.xpose.msk.msra.mxu1 %vm3651_vm13, %v4806_v10 }
 0x4ff   :  { %4682 = vmatpush.xpose.msk.msra.mxu1 %vm3650_vm6, %v4806_v10 }
 0x503   :  { %4683 = vmatpush.xpose.msk.msra.mxu1 %vm3649_vm12, %v4806_v10 }
 0x507   :  { %4684 = vmatpush.xpose.msk.msra.mxu1 %vm3648_vm8, %v4806_v10 }
 0x50b   :  { %4685 = vmatpush.xpose.msk.msra.mxu1 %vm3647_vm7, %v4806_v10 }
 0x50f   :  { %4686 = vmatpush.xpose.msk.msra.mxu1 %vm3646_vm14, %v4806_v10 }
 0x513   :  { %4687 = vmatpush.xpose.msk.msra.mxu1 %vm3645_vm1, %v4806_v10 }
 0x517   :  { %4688 = vmatpush.xpose.msk.msra.mxu1 %vm3644_vm5, %v4806_v10  ;;  %v3532_v29 = vpop.f32.mrf.mxu1 }
 0x518   :  { %v3533_v61 = vadd.f32 %v3532_v29, %v3494_v39  ;;  %v3993_v38 = vpop.f32.mrf.mxu0 }
 0x51a   :  { %4029 = vmatmul.f32.vlgmr.msra.gmra.mxu1 %v5804_v1 }
 0x520   :  { %v3638_v51 = vpop.f32.mrf.mxu3 }
 0x526   :  { %v3601_v32 = vpop.f32.mrf.mxu2 }
 0x527   :  { %v3602_v4 = vadd.f32 %v3601_v32, %v3533_v61 }
 0x529   :  { %v3639_v2 = vadd.f32 %v3638_v51, %v3602_v4 }
 0x52b   :  { %vm4094_vm9 = vcmp.gt.f32.partialorder %v3639_v2, 0.5 }
 0x52c   :  { %v4095_v8 = vsel %vm4094_vm9, 1, %v8671_v21 }
 0x52d   :  { %v4096_v34 = vperm.slane %v4095_v8, 7 }
 0x52f   :  { %vm4097_vm3 = vcmp.eq.s32.totalorder %v4096_v34, 1 }
 0x530   :  { %v4098_v10 = vsel %vm4097_vm3, %v3639_v2, %v6858_v26 }
 0x531   :  { %v4099_v15 = vsub.f32 %v4098_v10, %v7782_v62 }
 0x533   :  { %v4100_v1 = vsel %vm6903_vm10, %v4099_v15, 0.0 }
 0x534   :  { %4101 = vst [vmem:[#allocation4 + $0x30] sm:$0xff] %v4100_v1 }
 0x557   :  { %v3831_v9 = vpop.f32.mrf.mxu1 }
 0x558   :  { %v3832_v63 = vadd.f32 %v3831_v9, %v3730_v40 }
 0x560   :  { %v3924_v30 = vpop.f32.mrf.mxu3 }
 0x566   :  { %v3885_v59 = vpop.f32.mrf.mxu2 }
 0x567   :  { %v3886_v14 = vadd.f32 %v3885_v59, %v3832_v63 }
 0x569   :  { %v3925_v57 = vadd.f32 %v3924_v30, %v3886_v14 }
 0x56b   :  { %v3994_v47 = vadd.f32 %v3993_v38, %v3925_v57 }
 0x597   :  { %v4030_v19 = vpop.f32.mrf.mxu1 }
 0x598   :  { %v4031_v42 = vadd.f32 %v4030_v19, %v3994_v47 }
 0x59a   :  { %vm4103_vm13 = vcmp.gt.f32.partialorder %v4031_v42, 0.5 }
 0x59b   :  { %v4104_v18 = vsel %vm4103_vm13, 1, %v8671_v21 }
 0x59c   :  { %v4105_v23 = vperm.slane %v4104_v18, 7 }
 0x59e   :  { %vm4106_vm6 = vcmp.eq.s32.totalorder %v4105_v23, 1 }
 0x59f   :  { %v4107_v7 = vsel %vm4106_vm6, %v4031_v42, %v6858_v26 }
 0x5a0   :  { %v4108_v48 = vsub.f32 %v4107_v7, %v7782_v62 }
 0x5a2   :  { %v4109_v16 = vsel %vm6903_vm10, %v4108_v48, 0.0 }
 0x5a3   :  { %4110 = vst [vmem:[#allocation4 + $0x38] sm:$0xff] %v4109_v16 }
 0x5a4   :  { %4123 = dma.vmem_to_hbm [thread:$0]  %s4116_s23, 1024, %s4118_s26, [#allocation5], %s4808_s27, %s4808_s27, %s4809_s28  }
 0x5a5   :  { %4797 = dma.done.wait [#allocation5], 1024  }
 0x5a6   :  { %4798 = vsyncadd [#allocation5], 4294966272 }
 0x5a7   :  { %4128 = vsyncpa [#allocation5], 1 }

</bundles_post_ra>
